<compile_context>
chip_gen: v5e
topology: v5e:2x2
jax: 0.10.0
libtpu: 0.0.40
codegen_flags: <defaults>
</compile_context>

<pallas_src>
import math
import functools

import jax
import jax.numpy as jnp
from jax import lax
from jax.experimental import pallas as pl
from jax.experimental.pallas import tpu as pltpu


def _round_up(x, m):
    return (x + m - 1) // m * m


# ----------------------------------------------------------------------------
# Pure-JAX glue (reproduces the reference helper functions)
# ----------------------------------------------------------------------------
def inverse_sigmoid(x, eps=1e-3):
    x = jnp.clip(x, 0.0, 1.0)
    x1 = jnp.maximum(x, eps)
    x2 = jnp.maximum(1.0 - x, eps)
    return jnp.log(x1 / x2)


def pos2posemb3d(pos, num_pos_feats=128, temperature=10000.0):
    scale = 2.0 * math.pi
    pos = pos * scale
    dim_t = jnp.arange(num_pos_feats, dtype=jnp.float32)
    dim_t = temperature ** (2.0 * jnp.floor(dim_t / 2.0) / num_pos_feats)

    def emb(p):
        pe = p[..., None] / dim_t                       # (..., num_pos_feats)
        s = jnp.sin(pe[..., 0::2])
        c = jnp.cos(pe[..., 1::2])
        return jnp.stack([s, c], axis=-1).reshape(pe.shape[:-1] + (num_pos_feats,))

    pos_x = emb(pos[..., 0])
    pos_y = emb(pos[..., 1])
    pos_z = emb(pos[..., 2])
    return jnp.concatenate([pos_y, pos_x, pos_z], axis=-1)   # (..., 384)


def normalize(c, scale):
    c1 = (c[..., 0] - scale[0]) / (scale[1] - scale[0])
    c2 = (c[..., 1] - scale[2]) / (scale[3] - scale[2])
    c3 = (c[..., 2] - scale[4]) / (scale[5] - scale[4])
    return jnp.stack([c1, c2, c3], axis=-1)


def denormalize(c, scale):
    c1 = c[..., 0] * (scale[1] - scale[0]) + scale[0]
    c2 = c[..., 1] * (scale[3] - scale[2]) + scale[2]
    c3 = c[..., 2] * (scale[5] - scale[4]) + scale[4]
    return jnp.stack([c1, c2, c3], axis=-1)


def bilinear_sample(feat, gx, gy):
    """grid_sample(bilinear, padding='zeros', align_corners=True) equivalent.
    feat: (M, H, W, C) NHWC, gx/gy: (M, N) in [-1, 1]."""
    M, H, W, C = feat.shape
    x = (gx + 1.0) * (W - 1) / 2.0
    y = (gy + 1.0) * (H - 1) / 2.0
    x0 = jnp.floor(x)
    y0 = jnp.floor(y)
    flat = feat.reshape(M, H * W, C)

    def corner(xf, yf):
        inb = (xf >= 0) & (xf <= W - 1) & (yf >= 0) & (yf <= H - 1)
        xi = jnp.clip(xf, 0, W - 1).astype(jnp.int32)
        yi = jnp.clip(yf, 0, H - 1).astype(jnp.int32)
        idx = yi * W + xi
        g = jnp.take_along_axis(flat, idx[..., None], axis=1)    # (M, N, C)
        return g * inb[..., None].astype(feat.dtype)

    wx1 = x - x0
    wx0 = 1.0 - wx1
    wy1 = y - y0
    wy0 = 1.0 - wy1
    out = (corner(x0, y0) * (wx0 * wy0)[..., None]
           + corner(x0 + 1, y0) * (wx1 * wy0)[..., None]
           + corner(x0, y0 + 1) * (wx0 * wy1)[..., None]
           + corner(x0 + 1, y0 + 1) * (wx1 * wy1)[..., None])
    return out


def project(memory_hw, query_pos_world, T_camera_local, cam, Himg, Wimg):
    """Reference `project`: pinhole-project reference points into every view,
    bilinearly sample the feature map, average over valid views.
    # TODO(synk): the reference uses opaque `camera`/`Transform3d` objects;
    #             a standard pinhole model is used here.
    """
    B, N, _ = query_pos_world.shape
    V = T_camera_local.shape[1]
    C = memory_hw.shape[-1]

    pts_h = jnp.concatenate([query_pos_world, jnp.ones((B, N, 1), jnp.float32)], -1)
    pts_c = jnp.einsum('bvij,bnj->bvni', T_camera_local[:, :, :3, :], pts_h)  # (B,V,N,3)

    z = pts_c[..., 2]
    zc = jnp.where(jnp.abs(z) < 1e-6, 1e-6, z)
    u = cam['fx'] * pts_c[..., 0] / zc + cam['cx']
    v = cam['fy'] * pts_c[..., 1] / zc + cam['cy']
    valid = (z > 1e-6) & (u >= 0) & (u <= Wimg - 1) & (v >= 0) & (v <= Himg - 1)
    center_im = jnp.stack([u, v], axis=-1)

    gx = (2.0 * u / (Wimg - 1) - 1.0).reshape(B * V, N)
    gy = (2.0 * v / (Himg - 1) - 1.0).reshape(B * V, N)
    # TODO(synk): the bilinear gather stays in plain JAX (dynamic gather has no
    #             clean BlockSpec expression); the surrounding matmuls are in Pallas.
    feat = bilinear_sample(memory_hw, gx, gy).reshape(B, V, N, C)

    # Mask invalid-view samples before averaging (earlier review request; the
    # reference relies only on grid_sample zero-padding).  Points valid in zero
    # views yield a zero feature with cnt clamped to 1 (same as reference).
    feat = feat * valid[..., None].astype(feat.dtype)
    feat = feat.sum(axis=1)
    cnt = valid.astype(jnp.float32).sum(axis=1)
    cnt = jnp.where(cnt == 0.0, 1.0, cnt)
    feat = feat / cnt[..., None]
    return feat, center_im, valid


# ----------------------------------------------------------------------------
# Fused decoder-layer Pallas kernel (one grid step == one batch element)
#   position-encoder MLP -> self-attn -> cross-attn -> FFN -> prediction head
# ----------------------------------------------------------------------------
@functools.lru_cache(maxsize=None)
def _make_fused_layer_kernel(C, nhead):
    Dh = C // nhead

    def layernorm(x, g, b):
        mu = jnp.mean(x, axis=-1, keepdims=True)
        xc = x - mu
        var = jnp.mean(xc * xc, axis=-1, keepdims=True)
        return xc * lax.rsqrt(var + 1e-5) * g + b

    def mm(a, w):
        # bf16 MXU operands, f32 accumulation (safe on v5e, fast on v6e/v7x).
        return jnp.dot(a.astype(jnp.bfloat16), w, preferred_element_type=jnp.float32)

    def attention(q, k, v):
        # q: (NQ, C) bf16, k/v: (NK, C) bf16.  The 1/sqrt(Dh) scale is folded
        # into the q-projection weights in the wrapper (no per-head multiply).
        # TODO(synk): batching the heads into one 'bqhd,bkhd->bhqk' contraction
        #   needs a 2-batch-dim dot_general or an in-kernel head transpose,
        #   neither of which is a supported Mosaic lowering pattern today, so
        #   the heads stay as a static loop of 2-D MXU matmuls.
        outs = []
        for h in range(nhead):
            lo = h * Dh
            qh = q[:, lo:lo + Dh]
            kh = k[:, lo:lo + Dh]
            vh = v[:, lo:lo + Dh]
            s = jnp.einsum('qd,kd->qk', qh, kh, preferred_element_type=jnp.float32)
            s = s - jnp.max(s, axis=-1, keepdims=True)
            p = jnp.exp(s)
            p = p * pl.reciprocal(jnp.sum(p, axis=-1, keepdims=True), approx=True)
            outs.append(jnp.dot(p.astype(jnp.bfloat16), vh,
                                preferred_element_type=jnp.float32))
        return jnp.concatenate(outs, axis=-1)            # (NQ, C) f32

    def kernel(posemb_ref, tgt_ref, mem_ref,
               pw1_ref, pw2_ref, pb_ref,
               wqk_s_ref, wv_s_ref, wq_c_ref, wkv_c_ref, wo_ref,
               fw1_ref, fb1_ref, fw2_ref, vec_ref,
               hw_ref, hb_ref, out_ref):
        pb = pb_ref[...]        # (2, C)  position-encoder biases
        vec = vec_ref[...]      # (15, C) [bq_s, bk_s, bv_s, bo_s, bq_c, bk_c,
                                #          bv_c, bo_c, ffn_b2, g1,b1,g2,b2,g3,b3]

        # --- position encoder MLP: (NQ, 384) -> (NQ, C)
        hpos = jnp.maximum(mm(posemb_ref[0], pw1_ref[...]) + pb[0:1], 0.0)
        qpos = mm(hpos, pw2_ref[...]) + pb[1:2]                     # (NQ, C) f32

        tgt = tgt_ref[0]                                            # (NQ, C) f32

        # --- self-attention (q = k = tgt + query_pos, v = tgt); fused QK proj.
        qk_in = tgt + qpos
        qk = mm(qk_in, wqk_s_ref[...])                              # (NQ, 2C)
        q = (qk[:, :C] + vec[0:1]).astype(jnp.bfloat16)
        k = (qk[:, C:] + vec[1:2]).astype(jnp.bfloat16)
        v = (mm(tgt, wv_s_ref[...]) + vec[2:3]).astype(jnp.bfloat16)
        sa = mm(attention(q, k, v), wo_ref[0]) + vec[3:4]
        tgt = layernorm(tgt + sa, vec[9:10], vec[10:11])

        # --- cross-attention over memory (pos for memory is None); fused KV proj.
        # TODO(synk): at production S, tile this over the memory axis with an
        #   online-softmax (flash) accumulator so K/V never exceed v7x's 64 MiB
        #   VMEM; at the shapes used here whole-memory residency is cheaper.
        q = (mm(tgt + qpos, wq_c_ref[...]) + vec[4:5]).astype(jnp.bfloat16)
        kv = mm(mem_ref[0], wkv_c_ref[...])                         # (S, 2C)
        k = (kv[:, :C] + vec[5:6]).astype(jnp.bfloat16)
        v = (kv[:, C:] + vec[6:7]).astype(jnp.bfloat16)
        ca = mm(attention(q, k, v), wo_ref[1]) + vec[7:8]
        tgt = layernorm(tgt + ca, vec[11:12], vec[12:13])

        # --- FFN (relu); hidden width zero-padded to a lane-dense multiple of 128.
        hid = jnp.maximum(mm(tgt, fw1_ref[...]) + fb1_ref[...], 0.0)
        ff = mm(hid, fw2_ref[...]) + vec[8:9]
        tgt = layernorm(tgt + ff, vec[13:14], vec[14:15])

        # --- prediction head, lane-padded to 128 output columns (lane-dense vst)
        out_ref[0] = mm(tgt, hw_ref[...]) + hb_ref[...]

    return kernel


def _vmem_limit_bytes():
    # Generation-aware VMEM cap: v5e/v6e have 128 MiB physical VMEM (defaults
    # are far lower), v7x only 64 MiB per core -> leave headroom there.
    try:
        kind = jax.devices()[0].device_kind.lower()
    except Exception:
        kind = ""
    if "v7" in kind:
        return 48 * 1024 * 1024
    return 96 * 1024 * 1024


def fused_layer_call(posemb, pixel_feat, memory_bf16, shared, lp, nhead):
    B, NQ, C = pixel_feat.shape
    S = memory_bf16.shape[1]
    P = posemb.shape[-1]
    HEAD_PAD = shared['head_w'].shape[-1]
    kernel = _make_fused_layer_kernel(C, nhead)

    def batched(last_dims):
        nd = len(last_dims)
        return pl.BlockSpec((1,) + tuple(last_dims), lambda b: (b,) + (0,) * nd)

    def full(arr):
        nd = arr.ndim
        return pl.BlockSpec(arr.shape, lambda b: (0,) * nd)

    weights = (shared['pos_w1'], shared['pos_w2'], shared['pos_b'],
               lp['wqk_s'], lp['wv_s'], lp['wq_c'], lp['wkv_c'], lp['wo'],
               lp['ffn_w1'], lp['ffn_b1'], lp['ffn_w2'], lp['vec'],
               shared['head_w'], shared['head_b'])

    out = pl.pallas_call(
        kernel,
        grid=(B,),
        out_shape=jax.ShapeDtypeStruct((B, NQ, HEAD_PAD), jnp.float32),
        in_specs=[batched((NQ, P)), batched((NQ, C)), batched((S, C))]
                 + [full(w) for w in weights],
        out_specs=pl.BlockSpec((1, NQ, HEAD_PAD), lambda b: (b, 0, 0)),
        compiler_params=pltpu.CompilerParams(
            dimension_semantics=("parallel",),      # shards B across v7x cores
            vmem_limit_bytes=_vmem_limit_bytes()),
    )(posemb.astype(jnp.bfloat16), pixel_feat, memory_bf16, *weights)
    return out                                       # (B, NQ, HEAD_PAD) f32


# ----------------------------------------------------------------------------
# Full forward (TransformerDecoder loop + bbox3d_prediction)
# ----------------------------------------------------------------------------
def transformer_forward(input_tokens, query_tokens, meta, params, *, cfg):
    B = input_tokens.shape[0]
    scale = cfg['scale']
    C, Himg, Wimg = cfg['C'], cfg['H'], cfg['W']
    ncls = cfg['ncls']

    T_cp = meta['T_camera_pseudoCam']            # (B, V, 4, 4)
    T_wp = meta['T_world_pseudoCam']             # (B, 4, 4)
    T_wl = meta['T_world_local']                 # (B, 4, 4)
    V = T_cp.shape[1]
    T_camera_local = jnp.einsum('bvij,bjk->bvik', T_cp,
                                jnp.einsum('bij,bjk->bik', jnp.linalg.inv(T_wp), T_wl))

    # memory_hw: (B*V, H, W, C) NHWC, f32 for the bilinear sampling glue.
    memory_hw = input_tokens.reshape(B * V, Himg, Wimg, C)
    # Memory is only ever an MXU operand inside the kernel: cast to bf16 ONCE
    # here (halves per-layer HBM traffic and removes the in-kernel casts).
    memory_bf16 = input_tokens.astype(jnp.bfloat16)

    query_pos = jnp.broadcast_to(query_tokens[None], (B,) + query_tokens.shape)
    reference_points = jax.nn.sigmoid(query_pos)     # (B, NQ, 3)

    outputs = []
    for layer_num in range(cfg['layers']):
        lp = params['layers'][layer_num]

        posemb = pos2posemb3d(reference_points)                     # (B, NQ, 384)

        pixel_aligned, center_im, center_valid = project(
            memory_hw, denormalize(reference_points, scale),
            T_camera_local, meta['camera'], Himg, Wimg)

        head_out = fused_layer_call(posemb, pixel_aligned, memory_bf16,
                                    params['shared'], lp, cfg['nhead'])

        # TODO(synk): mlp_heads / box_processor are None in the reference
        #             __init__; synthesized here as shared single-linear heads.
        cls_logits = head_out[..., :ncls]
        center_off = head_out[..., ncls:ncls + 3]
        size_scale = head_out[..., ncls + 3:ncls + 6]
        ortho6d = head_out[..., ncls + 6:ncls + 12]

        coord_pos = denormalize(reference_points, scale)
        # refined normalized reference point (== normalize(center_unnormalized))
        new_ref = jax.nn.sigmoid(center_off + inverse_sigmoid(reference_points))
        center_unnormalized = denormalize(new_ref, scale)
        semcls_prob = jax.nn.softmax(cls_logits, axis=-1)
        # TODO(synk): box_processor.compute_predicted_size is undefined; pass-through.
        size_unnormalized = size_scale

        outputs.append({
            'pred_logits': cls_logits,
            'center_unnormalized': center_unnormalized,
            'size_unnormalized': size_unnormalized,
            'ortho6d': ortho6d,
            'sem_cls_prob': semcls_prob,
            'coord_pos': coord_pos,
        })
        reference_points = lax.stop_gradient(new_ref)    # iterative refinement
    return outputs


# ----------------------------------------------------------------------------
# Deterministic parameter init (xavier-uniform weights, zeros/ones elsewhere).
# Weights are stored bf16 (MXU operands); biases / LayerNorm params in f32.
# The 1/sqrt(Dh) attention scale is folded into the q-projection weights here
# (a checkpoint loader must apply the same fold to weights AND biases).
# ----------------------------------------------------------------------------
def init_params(key, cfg):
    C, F, L, ncls, nhead = cfg['C'], cfg['ffn'], cfg['layers'], cfg['ncls'], cfg['nhead']
    Dh = C // nhead
    qscale = 1.0 / math.sqrt(Dh)
    F_pad = _round_up(F, 128)
    HEAD_PAD = 128
    keys = jax.random.split(key, 512)
    kit = iter(keys)

    def xavier(shape):
        fan_in, fan_out = shape[-2], shape[-1]
        lim = math.sqrt(6.0 / (fan_in + fan_out))
        return jax.random.uniform(next(kit), shape, jnp.float32, -lim, lim)

    layers = []
    for _ in range(L):
        wq_s, wk_s, wv_s = xavier((C, C)), xavier((C, C)), xavier((C, C))
        wq_c, wk_c, wv_c = xavier((C, C)), xavier((C, C)), xavier((C, C))
        wo_s, wo_c = xavier((C, C)), xavier((C, C))
        w1, w2 = xavier((C, F)), xavier((F, C))

        wqk_s = jnp.concatenate([wq_s * qscale, wk_s], axis=1)      # (C, 2C)
        wkv_c = jnp.concatenate([wk_c, wv_c], axis=1)               # (C, 2C)
        # FFN zero-padded to a lane-dense hidden width (math unchanged).
        fw1 = jnp.zeros((C, F_pad), jnp.float32).at[:, :F].set(w1)
        fw2 = jnp.zeros((F_pad, C), jnp.float32).at[:F, :].set(w2)
        # vec rows: [bq_s*qscale, bk_s, bv_s, bo_s, bq_c*qscale, bk_c, bv_c,
        #            bo_c, ffn_b2, g1, b1, g2, b2, g3, b3]
        vec = jnp.concatenate([jnp.zeros((9, C)),
                               jnp.ones((1, C)), jnp.zeros((1, C)),
                               jnp.ones((1, C)), jnp.zeros((1, C)),
                               jnp.ones((1, C)), jnp.zeros((1, C))], axis=0)

        layers.append(dict(
            wqk_s=wqk_s.astype(jnp.bfloat16),
            wv_s=wv_s.astype(jnp.bfloat16),
            wq_c=(wq_c * qscale).astype(jnp.bfloat16),
            wkv_c=wkv_c.astype(jnp.bfloat16),
            wo=jnp.stack([wo_s, wo_c]).astype(jnp.bfloat16),        # (2, C, C)
            ffn_w1=fw1.astype(jnp.bfloat16),
            ffn_b1=jnp.zeros((1, F_pad), jnp.float32),
            ffn_w2=fw2.astype(jnp.bfloat16),
            vec=vec.astype(jnp.float32),
        ))

    head_w = jnp.zeros((C, HEAD_PAD), jnp.float32)
    head_w = head_w.at[:, :ncls + 12].set(xavier((C, ncls + 12)))
    shared = dict(
        pos_w1=xavier((128 * 3, C)).astype(jnp.bfloat16),
        pos_w2=xavier((C, C)).astype(jnp.bfloat16),
        pos_b=jnp.zeros((2, C), jnp.float32),
        head_w=head_w.astype(jnp.bfloat16),          # lane-padded to 128 cols
        head_b=jnp.zeros((1, HEAD_PAD), jnp.float32),
    )
    return dict(layers=layers, shared=shared)


# ----------------------------------------------------------------------------
if __name__ == "__main__":
    cfg = dict(C=32, nhead=4, ffn=64, layers=2, ncls=5, H=8, W=8,
               scale=(-4.0, 4.0, -4.0, 4.0, -2.0, 2.0))
    B, V, NQ = 2, 2, 8

    key = jax.random.PRNGKey(0)
    k1, k2, k3 = jax.random.split(key, 3)

    input_tokens = jax.random.normal(k1, (B, V * cfg['H'] * cfg['W'], cfg['C']), jnp.float32)
    query_tokens = jax.random.normal(k2, (NQ, 3), jnp.float32)
    params = init_params(k3, cfg)

    def make_pose(tz):
        return jnp.eye(4, dtype=jnp.float32).at[2, 3].set(tz)

    T_camera_pseudoCam = jnp.broadcast_to(
        jnp.stack([make_pose(6.0), make_pose(7.0)])[None], (B, V, 4, 4))
    T_world_pseudoCam = jnp.broadcast_to(jnp.eye(4, dtype=jnp.float32), (B, 4, 4))
    T_world_local = jnp.broadcast_to(jnp.eye(4, dtype=jnp.float32), (B, 4, 4))

    meta = dict(
        camera=dict(fx=6.0, fy=6.0, cx=(cfg['W'] - 1) / 2.0, cy=(cfg['H'] - 1) / 2.0),
        T_camera_pseudoCam=T_camera_pseudoCam,
        T_world_pseudoCam=T_world_pseudoCam,
        T_world_local=T_world_local,
    )

    forward_fn = jax.jit(functools.partial(transformer_forward, cfg=cfg))
    outputs = forward_fn(input_tokens, query_tokens, meta, params)
    jax.block_until_ready(outputs[-1]['center_unnormalized'])

    assert len(outputs) == cfg['layers']
    assert outputs[-1]['pred_logits'].shape == (B, NQ, cfg['ncls'])
    assert outputs[-1]['center_unnormalized'].shape == (B, NQ, 3)
    assert outputs[-1]['size_unnormalized'].shape == (B, NQ, 3)
    assert outputs[-1]['ortho6d'].shape == (B, NQ, 6)
    assert outputs[-1]['sem_cls_prob'].shape == (B, NQ, cfg['ncls'])
    print("KERNEL_OK")
</pallas_src>

<mosaic_0001>
module attributes {stable_mosaic.version = 11 : i64} {
  func.func @kernel(%arg0: i32, %arg1: memref<1x8x384xbf16, #tpu.memory_space<vmem>>, %arg2: memref<1x8x32xf32, #tpu.memory_space<vmem>>, %arg3: memref<1x128x32xbf16, #tpu.memory_space<vmem>>, %arg4: memref<384x32xbf16, #tpu.memory_space<vmem>>, %arg5: memref<32x32xbf16, #tpu.memory_space<vmem>>, %arg6: memref<2x32xf32, #tpu.memory_space<vmem>>, %arg7: memref<32x64xbf16, #tpu.memory_space<vmem>>, %arg8: memref<32x32xbf16, #tpu.memory_space<vmem>>, %arg9: memref<32x32xbf16, #tpu.memory_space<vmem>>, %arg10: memref<32x64xbf16, #tpu.memory_space<vmem>>, %arg11: memref<2x32x32xbf16, #tpu.memory_space<vmem>>, %arg12: memref<32x128xbf16, #tpu.memory_space<vmem>>, %arg13: memref<1x128xf32, #tpu.memory_space<vmem>>, %arg14: memref<128x32xbf16, #tpu.memory_space<vmem>>, %arg15: memref<15x32xf32, #tpu.memory_space<vmem>>, %arg16: memref<32x128xbf16, #tpu.memory_space<vmem>>, %arg17: memref<1x128xf32, #tpu.memory_space<vmem>>, %arg18: memref<1x8x128xf32, #tpu.memory_space<vmem>>) attributes {dimension_semantics = [#tpu.dimension_semantics<parallel>], iteration_bounds = array<i64: 2>, scalar_prefetch = 0 : i64, scratch_operands = 0 : i64, tpu.core_type = #tpu.core_type<tc>, window_params = [{transform_indices = @transform_0, window_bounds = array<i64: 1, 8, 384>}, {transform_indices = @transform_1, window_bounds = array<i64: 1, 8, 32>}, {transform_indices = @transform_2, window_bounds = array<i64: 1, 128, 32>}, {pipeline_mode = #tpu.pipeline_mode<synchronous>, transform_indices = @transform_3, window_bounds = array<i64: 384, 32>}, {pipeline_mode = #tpu.pipeline_mode<synchronous>, transform_indices = @transform_4, window_bounds = array<i64: 32, 32>}, {pipeline_mode = #tpu.pipeline_mode<synchronous>, transform_indices = @transform_5, window_bounds = array<i64: 2, 32>}, {pipeline_mode = #tpu.pipeline_mode<synchronous>, transform_indices = @transform_6, window_bounds = array<i64: 32, 64>}, {pipeline_mode = #tpu.pipeline_mode<synchronous>, transform_indices = @transform_7, window_bounds = array<i64: 32, 32>}, {pipeline_mode = #tpu.pipeline_mode<synchronous>, transform_indices = @transform_8, window_bounds = array<i64: 32, 32>}, {pipeline_mode = #tpu.pipeline_mode<synchronous>, transform_indices = @transform_9, window_bounds = array<i64: 32, 64>}, {pipeline_mode = #tpu.pipeline_mode<synchronous>, transform_indices = @transform_10, window_bounds = array<i64: 2, 32, 32>}, {pipeline_mode = #tpu.pipeline_mode<synchronous>, transform_indices = @transform_11, window_bounds = array<i64: 32, 128>}, {pipeline_mode = #tpu.pipeline_mode<synchronous>, transform_indices = @transform_12, window_bounds = array<i64: 1, 128>}, {pipeline_mode = #tpu.pipeline_mode<synchronous>, transform_indices = @transform_13, window_bounds = array<i64: 128, 32>}, {pipeline_mode = #tpu.pipeline_mode<synchronous>, transform_indices = @transform_14, window_bounds = array<i64: 15, 32>}, {pipeline_mode = #tpu.pipeline_mode<synchronous>, transform_indices = @transform_15, window_bounds = array<i64: 32, 128>}, {pipeline_mode = #tpu.pipeline_mode<synchronous>, transform_indices = @transform_16, window_bounds = array<i64: 1, 128>}, {transform_indices = @transform_17, window_bounds = array<i64: 1, 8, 128>}]} {
    %c0 = arith.constant 0 : index
    %c0_0 = arith.constant 0 : index
    %0 = vector.load %arg6[%c0, %c0_0] : memref<2x32xf32, #tpu.memory_space<vmem>>, vector<2x32xf32>
    %c0_1 = arith.constant 0 : index
    %c0_2 = arith.constant 0 : index
    %1 = vector.load %arg15[%c0_1, %c0_2] : memref<15x32xf32, #tpu.memory_space<vmem>>, vector<15x32xf32>
    %c0_3 = arith.constant 0 : index
    %c0_4 = arith.constant 0 : index
    %c0_5 = arith.constant 0 : index
    %2 = vector.load %arg1[%c0_3, %c0_4, %c0_5] : memref<1x8x384xbf16, #tpu.memory_space<vmem>>, vector<1x8x384xbf16>
    %3 = vector.shape_cast %2 : vector<1x8x384xbf16> to vector<8x384xbf16>
    %c0_6 = arith.constant 0 : index
    %c0_7 = arith.constant 0 : index
    %4 = vector.load %arg4[%c0_6, %c0_7] : memref<384x32xbf16, #tpu.memory_space<vmem>>, vector<384x32xbf16>
    %cst = arith.constant dense<0.000000e+00> : vector<8x32xf32>
    %5 = tpu.matmul %3, %4, %cst {dimension_numbers = #tpu.dot_dimension_numbers<[1], [0], [0], [1], [0, 0, 1, 1], [], []>} : vector<8x384xbf16>, vector<384x32xbf16>, vector<8x32xf32> -> vector<8x32xf32>
    %6 = vector.extract_strided_slice %0 {offsets = [0, 0], sizes = [1, 32], strides = [1, 1]} : vector<2x32xf32> to vector<1x32xf32>
    %7 = vector.broadcast %6 : vector<1x32xf32> to vector<8x32xf32>
    %8 = arith.addf %5, %7 : vector<8x32xf32>
    %cst_8 = arith.constant 0.000000e+00 : f32
    %9 = vector.broadcast %cst_8 : f32 to vector<8x32xf32>
    %10 = arith.maximumf %8, %9 : vector<8x32xf32>
    %c0_9 = arith.constant 0 : index
    %c0_10 = arith.constant 0 : index
    %11 = vector.load %arg5[%c0_9, %c0_10] : memref<32x32xbf16, #tpu.memory_space<vmem>>, vector<32x32xbf16>
    %12 = arith.truncf %10 : vector<8x32xf32> to vector<8x32xbf16>
    %cst_11 = arith.constant dense<0.000000e+00> : vector<8x32xf32>
    %13 = tpu.matmul %12, %11, %cst_11 {dimension_numbers = #tpu.dot_dimension_numbers<[1], [0], [0], [1], [0, 0, 1, 1], [], []>} : vector<8x32xbf16>, vector<32x32xbf16>, vector<8x32xf32> -> vector<8x32xf32>
    %14 = vector.extract_strided_slice %0 {offsets = [1, 0], sizes = [1, 32], strides = [1, 1]} : vector<2x32xf32> to vector<1x32xf32>
    %15 = vector.broadcast %14 : vector<1x32xf32> to vector<8x32xf32>
    %16 = arith.addf %13, %15 : vector<8x32xf32>
    %c0_12 = arith.constant 0 : index
    %c0_13 = arith.constant 0 : index
    %c0_14 = arith.constant 0 : index
    %17 = vector.load %arg2[%c0_12, %c0_13, %c0_14] : memref<1x8x32xf32, #tpu.memory_space<vmem>>, vector<1x8x32xf32>
    %18 = vector.shape_cast %17 : vector<1x8x32xf32> to vector<8x32xf32>
    %19 = arith.addf %18, %16 : vector<8x32xf32>
    %c0_15 = arith.constant 0 : index
    %c0_16 = arith.constant 0 : index
    %20 = vector.load %arg7[%c0_15, %c0_16] : memref<32x64xbf16, #tpu.memory_space<vmem>>, vector<32x64xbf16>
    %21 = arith.truncf %19 : vector<8x32xf32> to vector<8x32xbf16>
    %cst_17 = arith.constant dense<0.000000e+00> : vector<8x64xf32>
    %22 = tpu.matmul %21, %20, %cst_17 {dimension_numbers = #tpu.dot_dimension_numbers<[1], [0], [0], [1], [0, 0, 1, 1], [], []>} : vector<8x32xbf16>, vector<32x64xbf16>, vector<8x64xf32> -> vector<8x64xf32>
    %23 = vector.extract_strided_slice %22 {offsets = [0, 0], sizes = [8, 32], strides = [1, 1]} : vector<8x64xf32> to vector<8x32xf32>
    %24 = vector.extract_strided_slice %1 {offsets = [0, 0], sizes = [1, 32], strides = [1, 1]} : vector<15x32xf32> to vector<1x32xf32>
    %25 = vector.broadcast %24 : vector<1x32xf32> to vector<8x32xf32>
    %26 = arith.addf %23, %25 : vector<8x32xf32>
    %27 = arith.truncf %26 : vector<8x32xf32> to vector<8x32xbf16>
    %28 = vector.extract_strided_slice %22 {offsets = [0, 32], sizes = [8, 32], strides = [1, 1]} : vector<8x64xf32> to vector<8x32xf32>
    %29 = vector.extract_strided_slice %1 {offsets = [1, 0], sizes = [1, 32], strides = [1, 1]} : vector<15x32xf32> to vector<1x32xf32>
    %30 = vector.broadcast %29 : vector<1x32xf32> to vector<8x32xf32>
    %31 = arith.addf %28, %30 : vector<8x32xf32>
    %32 = arith.truncf %31 : vector<8x32xf32> to vector<8x32xbf16>
    %c0_18 = arith.constant 0 : index
    %c0_19 = arith.constant 0 : index
    %33 = vector.load %arg8[%c0_18, %c0_19] : memref<32x32xbf16, #tpu.memory_space<vmem>>, vector<32x32xbf16>
    %34 = arith.truncf %18 : vector<8x32xf32> to vector<8x32xbf16>
    %cst_20 = arith.constant dense<0.000000e+00> : vector<8x32xf32>
    %35 = tpu.matmul %34, %33, %cst_20 {dimension_numbers = #tpu.dot_dimension_numbers<[1], [0], [0], [1], [0, 0, 1, 1], [], []>} : vector<8x32xbf16>, vector<32x32xbf16>, vector<8x32xf32> -> vector<8x32xf32>
    %36 = vector.extract_strided_slice %1 {offsets = [2, 0], sizes = [1, 32], strides = [1, 1]} : vector<15x32xf32> to vector<1x32xf32>
    %37 = vector.broadcast %36 : vector<1x32xf32> to vector<8x32xf32>
    %38 = arith.addf %35, %37 : vector<8x32xf32>
    %39 = arith.truncf %38 : vector<8x32xf32> to vector<8x32xbf16>
    %40 = vector.extract_strided_slice %27 {offsets = [0, 0], sizes = [8, 8], strides = [1, 1]} : vector<8x32xbf16> to vector<8x8xbf16>
    %41 = vector.extract_strided_slice %32 {offsets = [0, 0], sizes = [8, 8], strides = [1, 1]} : vector<8x32xbf16> to vector<8x8xbf16>
    %42 = vector.extract_strided_slice %39 {offsets = [0, 0], sizes = [8, 8], strides = [1, 1]} : vector<8x32xbf16> to vector<8x8xbf16>
    "tpu.trace_start"() <{level = 10 : i32, message = "qd,kd->qk"}> : () -> ()
    %cst_21 = arith.constant dense<0.000000e+00> : vector<8x8xf32>
    %43 = tpu.matmul %40, %41, %cst_21 {dimension_numbers = #tpu.dot_dimension_numbers<[1], [1], [0], [0], [0, 0, 1, 0], [], []>} : vector<8x8xbf16>, vector<8x8xbf16>, vector<8x8xf32> -> vector<8x8xf32>
    "tpu.trace_stop"() : () -> ()
    %cst_22 = arith.constant dense<0xFF800000> : vector<8xf32>
    %44 = vector.multi_reduction <maximumf>, %43, %cst_22 [1] : vector<8x8xf32> to vector<8xf32>
    %45 = vector.shape_cast %44 : vector<8xf32> to vector<8x1xf32>
    %46 = vector.broadcast %45 : vector<8x1xf32> to vector<8x8xf32>
    %47 = arith.subf %43, %46 : vector<8x8xf32>
    %48 = math.exp %47 : vector<8x8xf32>
    %cst_23 = arith.constant dense<0.000000e+00> : vector<8xf32>
    %49 = vector.multi_reduction <add>, %48, %cst_23 [1] : vector<8x8xf32> to vector<8xf32>
    %50 = vector.shape_cast %49 : vector<8xf32> to vector<8x1xf32>
    %51 = tpu.reciprocal %50 {approx = true} : vector<8x1xf32> -> vector<8x1xf32>
    %52 = vector.broadcast %51 : vector<8x1xf32> to vector<8x8xf32>
    %53 = arith.mulf %48, %52 : vector<8x8xf32>
    %54 = arith.truncf %53 : vector<8x8xf32> to vector<8x8xbf16>
    %cst_24 = arith.constant dense<0.000000e+00> : vector<8x8xf32>
    %55 = tpu.matmul %54, %42, %cst_24 {dimension_numbers = #tpu.dot_dimension_numbers<[1], [0], [0], [1], [0, 0, 1, 1], [], []>} : vector<8x8xbf16>, vector<8x8xbf16>, vector<8x8xf32> -> vector<8x8xf32>
    %56 = vector.extract_strided_slice %27 {offsets = [0, 8], sizes = [8, 8], strides = [1, 1]} : vector<8x32xbf16> to vector<8x8xbf16>
    %57 = vector.extract_strided_slice %32 {offsets = [0, 8], sizes = [8, 8], strides = [1, 1]} : vector<8x32xbf16> to vector<8x8xbf16>
    %58 = vector.extract_strided_slice %39 {offsets = [0, 8], sizes = [8, 8], strides = [1, 1]} : vector<8x32xbf16> to vector<8x8xbf16>
    "tpu.trace_start"() <{level = 10 : i32, message = "qd,kd->qk"}> : () -> ()
    %cst_25 = arith.constant dense<0.000000e+00> : vector<8x8xf32>
    %59 = tpu.matmul %56, %57, %cst_25 {dimension_numbers = #tpu.dot_dimension_numbers<[1], [1], [0], [0], [0, 0, 1, 0], [], []>} : vector<8x8xbf16>, vector<8x8xbf16>, vector<8x8xf32> -> vector<8x8xf32>
    "tpu.trace_stop"() : () -> ()
    %cst_26 = arith.constant dense<0xFF800000> : vector<8xf32>
    %60 = vector.multi_reduction <maximumf>, %59, %cst_26 [1] : vector<8x8xf32> to vector<8xf32>
    %61 = vector.shape_cast %60 : vector<8xf32> to vector<8x1xf32>
    %62 = vector.broadcast %61 : vector<8x1xf32> to vector<8x8xf32>
    %63 = arith.subf %59, %62 : vector<8x8xf32>
    %64 = math.exp %63 : vector<8x8xf32>
    %cst_27 = arith.constant dense<0.000000e+00> : vector<8xf32>
    %65 = vector.multi_reduction <add>, %64, %cst_27 [1] : vector<8x8xf32> to vector<8xf32>
    %66 = vector.shape_cast %65 : vector<8xf32> to vector<8x1xf32>
    %67 = tpu.reciprocal %66 {approx = true} : vector<8x1xf32> -> vector<8x1xf32>
    %68 = vector.broadcast %67 : vector<8x1xf32> to vector<8x8xf32>
    %69 = arith.mulf %64, %68 : vector<8x8xf32>
    %70 = arith.truncf %69 : vector<8x8xf32> to vector<8x8xbf16>
    %cst_28 = arith.constant dense<0.000000e+00> : vector<8x8xf32>
    %71 = tpu.matmul %70, %58, %cst_28 {dimension_numbers = #tpu.dot_dimension_numbers<[1], [0], [0], [1], [0, 0, 1, 1], [], []>} : vector<8x8xbf16>, vector<8x8xbf16>, vector<8x8xf32> -> vector<8x8xf32>
    %72 = vector.extract_strided_slice %27 {offsets = [0, 16], sizes = [8, 8], strides = [1, 1]} : vector<8x32xbf16> to vector<8x8xbf16>
    %73 = vector.extract_strided_slice %32 {offsets = [0, 16], sizes = [8, 8], strides = [1, 1]} : vector<8x32xbf16> to vector<8x8xbf16>
    %74 = vector.extract_strided_slice %39 {offsets = [0, 16], sizes = [8, 8], strides = [1, 1]} : vector<8x32xbf16> to vector<8x8xbf16>
    "tpu.trace_start"() <{level = 10 : i32, message = "qd,kd->qk"}> : () -> ()
    %cst_29 = arith.constant dense<0.000000e+00> : vector<8x8xf32>
    %75 = tpu.matmul %72, %73, %cst_29 {dimension_numbers = #tpu.dot_dimension_numbers<[1], [1], [0], [0], [0, 0, 1, 0], [], []>} : vector<8x8xbf16>, vector<8x8xbf16>, vector<8x8xf32> -> vector<8x8xf32>
    "tpu.trace_stop"() : () -> ()
    %cst_30 = arith.constant dense<0xFF800000> : vector<8xf32>
    %76 = vector.multi_reduction <maximumf>, %75, %cst_30 [1] : vector<8x8xf32> to vector<8xf32>
    %77 = vector.shape_cast %76 : vector<8xf32> to vector<8x1xf32>
    %78 = vector.broadcast %77 : vector<8x1xf32> to vector<8x8xf32>
    %79 = arith.subf %75, %78 : vector<8x8xf32>
    %80 = math.exp %79 : vector<8x8xf32>
    %cst_31 = arith.constant dense<0.000000e+00> : vector<8xf32>
    %81 = vector.multi_reduction <add>, %80, %cst_31 [1] : vector<8x8xf32> to vector<8xf32>
    %82 = vector.shape_cast %81 : vector<8xf32> to vector<8x1xf32>
    %83 = tpu.reciprocal %82 {approx = true} : vector<8x1xf32> -> vector<8x1xf32>
    %84 = vector.broadcast %83 : vector<8x1xf32> to vector<8x8xf32>
    %85 = arith.mulf %80, %84 : vector<8x8xf32>
    %86 = arith.truncf %85 : vector<8x8xf32> to vector<8x8xbf16>
    %cst_32 = arith.constant dense<0.000000e+00> : vector<8x8xf32>
    %87 = tpu.matmul %86, %74, %cst_32 {dimension_numbers = #tpu.dot_dimension_numbers<[1], [0], [0], [1], [0, 0, 1, 1], [], []>} : vector<8x8xbf16>, vector<8x8xbf16>, vector<8x8xf32> -> vector<8x8xf32>
    %88 = vector.extract_strided_slice %27 {offsets = [0, 24], sizes = [8, 8], strides = [1, 1]} : vector<8x32xbf16> to vector<8x8xbf16>
    %89 = vector.extract_strided_slice %32 {offsets = [0, 24], sizes = [8, 8], strides = [1, 1]} : vector<8x32xbf16> to vector<8x8xbf16>
    %90 = vector.extract_strided_slice %39 {offsets = [0, 24], sizes = [8, 8], strides = [1, 1]} : vector<8x32xbf16> to vector<8x8xbf16>
    "tpu.trace_start"() <{level = 10 : i32, message = "qd,kd->qk"}> : () -> ()
    %cst_33 = arith.constant dense<0.000000e+00> : vector<8x8xf32>
    %91 = tpu.matmul %88, %89, %cst_33 {dimension_numbers = #tpu.dot_dimension_numbers<[1], [1], [0], [0], [0, 0, 1, 0], [], []>} : vector<8x8xbf16>, vector<8x8xbf16>, vector<8x8xf32> -> vector<8x8xf32>
    "tpu.trace_stop"() : () -> ()
    %cst_34 = arith.constant dense<0xFF800000> : vector<8xf32>
    %92 = vector.multi_reduction <maximumf>, %91, %cst_34 [1] : vector<8x8xf32> to vector<8xf32>
    %93 = vector.shape_cast %92 : vector<8xf32> to vector<8x1xf32>
    %94 = vector.broadcast %93 : vector<8x1xf32> to vector<8x8xf32>
    %95 = arith.subf %91, %94 : vector<8x8xf32>
    %96 = math.exp %95 : vector<8x8xf32>
    %cst_35 = arith.constant dense<0.000000e+00> : vector<8xf32>
    %97 = vector.multi_reduction <add>, %96, %cst_35 [1] : vector<8x8xf32> to vector<8xf32>
    %98 = vector.shape_cast %97 : vector<8xf32> to vector<8x1xf32>
    %99 = tpu.reciprocal %98 {approx = true} : vector<8x1xf32> -> vector<8x1xf32>
    %100 = vector.broadcast %99 : vector<8x1xf32> to vector<8x8xf32>
    %101 = arith.mulf %96, %100 : vector<8x8xf32>
    %102 = arith.truncf %101 : vector<8x8xf32> to vector<8x8xbf16>
    %cst_36 = arith.constant dense<0.000000e+00> : vector<8x8xf32>
    %103 = tpu.matmul %102, %90, %cst_36 {dimension_numbers = #tpu.dot_dimension_numbers<[1], [0], [0], [1], [0, 0, 1, 1], [], []>} : vector<8x8xbf16>, vector<8x8xbf16>, vector<8x8xf32> -> vector<8x8xf32>
    %104 = tpu.concatenate %55, %71, %87, %103 in 1 : vector<8x8xf32>, vector<8x8xf32>, vector<8x8xf32>, vector<8x8xf32> -> vector<8x32xf32>
    %c0_37 = arith.constant 0 : index
    %c0_38 = arith.constant 0 : index
    %c0_39 = arith.constant 0 : index
    %105 = vector.load %arg11[%c0_37, %c0_38, %c0_39] : memref<2x32x32xbf16, #tpu.memory_space<vmem>>, vector<1x32x32xbf16>
    %106 = vector.shape_cast %105 : vector<1x32x32xbf16> to vector<32x32xbf16>
    %107 = arith.truncf %104 : vector<8x32xf32> to vector<8x32xbf16>
    %cst_40 = arith.constant dense<0.000000e+00> : vector<8x32xf32>
    %108 = tpu.matmul %107, %106, %cst_40 {dimension_numbers = #tpu.dot_dimension_numbers<[1], [0], [0], [1], [0, 0, 1, 1], [], []>} : vector<8x32xbf16>, vector<32x32xbf16>, vector<8x32xf32> -> vector<8x32xf32>
    %109 = vector.extract_strided_slice %1 {offsets = [3, 0], sizes = [1, 32], strides = [1, 1]} : vector<15x32xf32> to vector<1x32xf32>
    %110 = vector.broadcast %109 : vector<1x32xf32> to vector<8x32xf32>
    %111 = arith.addf %108, %110 : vector<8x32xf32>
    %112 = arith.addf %18, %111 : vector<8x32xf32>
    %113 = vector.extract_strided_slice %1 {offsets = [9, 0], sizes = [1, 32], strides = [1, 1]} : vector<15x32xf32> to vector<1x32xf32>
    %114 = vector.extract_strided_slice %1 {offsets = [10, 0], sizes = [1, 32], strides = [1, 1]} : vector<15x32xf32> to vector<1x32xf32>
    %cst_41 = arith.constant dense<0.000000e+00> : vector<8xf32>
    %115 = vector.multi_reduction <add>, %112, %cst_41 [1] : vector<8x32xf32> to vector<8xf32>
    %116 = vector.shape_cast %115 : vector<8xf32> to vector<8x1xf32>
    %cst_42 = arith.constant 3.200000e+01 : f32
    %117 = vector.broadcast %cst_42 : f32 to vector<8x1xf32>
    %118 = arith.divf %116, %117 : vector<8x1xf32>
    %119 = vector.broadcast %118 : vector<8x1xf32> to vector<8x32xf32>
    %120 = arith.subf %112, %119 : vector<8x32xf32>
    %121 = arith.mulf %120, %120 : vector<8x32xf32>
    %cst_43 = arith.constant dense<0.000000e+00> : vector<8xf32>
    %122 = vector.multi_reduction <add>, %121, %cst_43 [1] : vector<8x32xf32> to vector<8xf32>
    %123 = vector.shape_cast %122 : vector<8xf32> to vector<8x1xf32>
    %cst_44 = arith.constant 3.200000e+01 : f32
    %124 = vector.broadcast %cst_44 : f32 to vector<8x1xf32>
    %125 = arith.divf %123, %124 : vector<8x1xf32>
    %cst_45 = arith.constant 9.99999974E-6 : f32
    %126 = vector.broadcast %cst_45 : f32 to vector<8x1xf32>
    %127 = arith.addf %125, %126 : vector<8x1xf32>
    %128 = math.rsqrt %127 : vector<8x1xf32>
    %129 = vector.broadcast %128 : vector<8x1xf32> to vector<8x32xf32>
    %130 = arith.mulf %120, %129 : vector<8x32xf32>
    %131 = vector.broadcast %113 : vector<1x32xf32> to vector<8x32xf32>
    %132 = arith.mulf %130, %131 : vector<8x32xf32>
    %133 = vector.broadcast %114 : vector<1x32xf32> to vector<8x32xf32>
    %134 = arith.addf %132, %133 : vector<8x32xf32>
    %135 = arith.addf %134, %16 : vector<8x32xf32>
    %c0_46 = arith.constant 0 : index
    %c0_47 = arith.constant 0 : index
    %136 = vector.load %arg9[%c0_46, %c0_47] : memref<32x32xbf16, #tpu.memory_space<vmem>>, vector<32x32xbf16>
    %137 = arith.truncf %135 : vector<8x32xf32> to vector<8x32xbf16>
    %cst_48 = arith.constant dense<0.000000e+00> : vector<8x32xf32>
    %138 = tpu.matmul %137, %136, %cst_48 {dimension_numbers = #tpu.dot_dimension_numbers<[1], [0], [0], [1], [0, 0, 1, 1], [], []>} : vector<8x32xbf16>, vector<32x32xbf16>, vector<8x32xf32> -> vector<8x32xf32>
    %139 = vector.extract_strided_slice %1 {offsets = [4, 0], sizes = [1, 32], strides = [1, 1]} : vector<15x32xf32> to vector<1x32xf32>
    %140 = vector.broadcast %139 : vector<1x32xf32> to vector<8x32xf32>
    %141 = arith.addf %138, %140 : vector<8x32xf32>
    %142 = arith.truncf %141 : vector<8x32xf32> to vector<8x32xbf16>
    %c0_49 = arith.constant 0 : index
    %c0_50 = arith.constant 0 : index
    %c0_51 = arith.constant 0 : index
    %143 = vector.load %arg3[%c0_49, %c0_50, %c0_51] : memref<1x128x32xbf16, #tpu.memory_space<vmem>>, vector<1x128x32xbf16>
    %144 = vector.shape_cast %143 : vector<1x128x32xbf16> to vector<128x32xbf16>
    %c0_52 = arith.constant 0 : index
    %c0_53 = arith.constant 0 : index
    %145 = vector.load %arg10[%c0_52, %c0_53] : memref<32x64xbf16, #tpu.memory_space<vmem>>, vector<32x64xbf16>
    %cst_54 = arith.constant dense<0.000000e+00> : vector<128x64xf32>
    %146 = tpu.matmul %144, %145, %cst_54 {dimension_numbers = #tpu.dot_dimension_numbers<[1], [0], [0], [1], [0, 0, 1, 1], [], []>} : vector<128x32xbf16>, vector<32x64xbf16>, vector<128x64xf32> -> vector<128x64xf32>
    %147 = vector.extract_strided_slice %146 {offsets = [0, 0], sizes = [128, 32], strides = [1, 1]} : vector<128x64xf32> to vector<128x32xf32>
    %148 = vector.extract_strided_slice %1 {offsets = [5, 0], sizes = [1, 32], strides = [1, 1]} : vector<15x32xf32> to vector<1x32xf32>
    %149 = vector.broadcast %148 : vector<1x32xf32> to vector<128x32xf32>
    %150 = arith.addf %147, %149 : vector<128x32xf32>
    %151 = arith.truncf %150 : vector<128x32xf32> to vector<128x32xbf16>
    %152 = vector.extract_strided_slice %146 {offsets = [0, 32], sizes = [128, 32], strides = [1, 1]} : vector<128x64xf32> to vector<128x32xf32>
    %153 = vector.extract_strided_slice %1 {offsets = [6, 0], sizes = [1, 32], strides = [1, 1]} : vector<15x32xf32> to vector<1x32xf32>
    %154 = vector.broadcast %153 : vector<1x32xf32> to vector<128x32xf32>
    %155 = arith.addf %152, %154 : vector<128x32xf32>
    %156 = arith.truncf %155 : vector<128x32xf32> to vector<128x32xbf16>
    %157 = vector.extract_strided_slice %142 {offsets = [0, 0], sizes = [8, 8], strides = [1, 1]} : vector<8x32xbf16> to vector<8x8xbf16>
    %158 = vector.extract_strided_slice %151 {offsets = [0, 0], sizes = [128, 8], strides = [1, 1]} : vector<128x32xbf16> to vector<128x8xbf16>
    %159 = vector.extract_strided_slice %156 {offsets = [0, 0], sizes = [128, 8], strides = [1, 1]} : vector<128x32xbf16> to vector<128x8xbf16>
    "tpu.trace_start"() <{level = 10 : i32, message = "qd,kd->qk"}> : () -> ()
    %cst_55 = arith.constant dense<0.000000e+00> : vector<8x128xf32>
    %160 = tpu.matmul %157, %158, %cst_55 {dimension_numbers = #tpu.dot_dimension_numbers<[1], [1], [0], [0], [0, 0, 1, 0], [], []>} : vector<8x8xbf16>, vector<128x8xbf16>, vector<8x128xf32> -> vector<8x128xf32>
    "tpu.trace_stop"() : () -> ()
    %cst_56 = arith.constant dense<0xFF800000> : vector<8xf32>
    %161 = vector.multi_reduction <maximumf>, %160, %cst_56 [1] : vector<8x128xf32> to vector<8xf32>
    %162 = vector.shape_cast %161 : vector<8xf32> to vector<8x1xf32>
    %163 = vector.broadcast %162 : vector<8x1xf32> to vector<8x128xf32>
    %164 = arith.subf %160, %163 : vector<8x128xf32>
    %165 = math.exp %164 : vector<8x128xf32>
    %cst_57 = arith.constant dense<0.000000e+00> : vector<8xf32>
    %166 = vector.multi_reduction <add>, %165, %cst_57 [1] : vector<8x128xf32> to vector<8xf32>
    %167 = vector.shape_cast %166 : vector<8xf32> to vector<8x1xf32>
    %168 = tpu.reciprocal %167 {approx = true} : vector<8x1xf32> -> vector<8x1xf32>
    %169 = vector.broadcast %168 : vector<8x1xf32> to vector<8x128xf32>
    %170 = arith.mulf %165, %169 : vector<8x128xf32>
    %171 = arith.truncf %170 : vector<8x128xf32> to vector<8x128xbf16>
    %cst_58 = arith.constant dense<0.000000e+00> : vector<8x8xf32>
    %172 = tpu.matmul %171, %159, %cst_58 {dimension_numbers = #tpu.dot_dimension_numbers<[1], [0], [0], [1], [0, 0, 1, 1], [], []>} : vector<8x128xbf16>, vector<128x8xbf16>, vector<8x8xf32> -> vector<8x8xf32>
    %173 = vector.extract_strided_slice %142 {offsets = [0, 8], sizes = [8, 8], strides = [1, 1]} : vector<8x32xbf16> to vector<8x8xbf16>
    %174 = vector.extract_strided_slice %151 {offsets = [0, 8], sizes = [128, 8], strides = [1, 1]} : vector<128x32xbf16> to vector<128x8xbf16>
    %175 = vector.extract_strided_slice %156 {offsets = [0, 8], sizes = [128, 8], strides = [1, 1]} : vector<128x32xbf16> to vector<128x8xbf16>
    "tpu.trace_start"() <{level = 10 : i32, message = "qd,kd->qk"}> : () -> ()
    %cst_59 = arith.constant dense<0.000000e+00> : vector<8x128xf32>
    %176 = tpu.matmul %173, %174, %cst_59 {dimension_numbers = #tpu.dot_dimension_numbers<[1], [1], [0], [0], [0, 0, 1, 0], [], []>} : vector<8x8xbf16>, vector<128x8xbf16>, vector<8x128xf32> -> vector<8x128xf32>
    "tpu.trace_stop"() : () -> ()
    %cst_60 = arith.constant dense<0xFF800000> : vector<8xf32>
    %177 = vector.multi_reduction <maximumf>, %176, %cst_60 [1] : vector<8x128xf32> to vector<8xf32>
    %178 = vector.shape_cast %177 : vector<8xf32> to vector<8x1xf32>
    %179 = vector.broadcast %178 : vector<8x1xf32> to vector<8x128xf32>
    %180 = arith.subf %176, %179 : vector<8x128xf32>
    %181 = math.exp %180 : vector<8x128xf32>
    %cst_61 = arith.constant dense<0.000000e+00> : vector<8xf32>
    %182 = vector.multi_reduction <add>, %181, %cst_61 [1] : vector<8x128xf32> to vector<8xf32>
    %183 = vector.shape_cast %182 : vector<8xf32> to vector<8x1xf32>
    %184 = tpu.reciprocal %183 {approx = true} : vector<8x1xf32> -> vector<8x1xf32>
    %185 = vector.broadcast %184 : vector<8x1xf32> to vector<8x128xf32>
    %186 = arith.mulf %181, %185 : vector<8x128xf32>
    %187 = arith.truncf %186 : vector<8x128xf32> to vector<8x128xbf16>
    %cst_62 = arith.constant dense<0.000000e+00> : vector<8x8xf32>
    %188 = tpu.matmul %187, %175, %cst_62 {dimension_numbers = #tpu.dot_dimension_numbers<[1], [0], [0], [1], [0, 0, 1, 1], [], []>} : vector<8x128xbf16>, vector<128x8xbf16>, vector<8x8xf32> -> vector<8x8xf32>
    %189 = vector.extract_strided_slice %142 {offsets = [0, 16], sizes = [8, 8], strides = [1, 1]} : vector<8x32xbf16> to vector<8x8xbf16>
    %190 = vector.extract_strided_slice %151 {offsets = [0, 16], sizes = [128, 8], strides = [1, 1]} : vector<128x32xbf16> to vector<128x8xbf16>
    %191 = vector.extract_strided_slice %156 {offsets = [0, 16], sizes = [128, 8], strides = [1, 1]} : vector<128x32xbf16> to vector<128x8xbf16>
    "tpu.trace_start"() <{level = 10 : i32, message = "qd,kd->qk"}> : () -> ()
    %cst_63 = arith.constant dense<0.000000e+00> : vector<8x128xf32>
    %192 = tpu.matmul %189, %190, %cst_63 {dimension_numbers = #tpu.dot_dimension_numbers<[1], [1], [0], [0], [0, 0, 1, 0], [], []>} : vector<8x8xbf16>, vector<128x8xbf16>, vector<8x128xf32> -> vector<8x128xf32>
    "tpu.trace_stop"() : () -> ()
    %cst_64 = arith.constant dense<0xFF800000> : vector<8xf32>
    %193 = vector.multi_reduction <maximumf>, %192, %cst_64 [1] : vector<8x128xf32> to vector<8xf32>
    %194 = vector.shape_cast %193 : vector<8xf32> to vector<8x1xf32>
    %195 = vector.broadcast %194 : vector<8x1xf32> to vector<8x128xf32>
    %196 = arith.subf %192, %195 : vector<8x128xf32>
    %197 = math.exp %196 : vector<8x128xf32>
    %cst_65 = arith.constant dense<0.000000e+00> : vector<8xf32>
    %198 = vector.multi_reduction <add>, %197, %cst_65 [1] : vector<8x128xf32> to vector<8xf32>
    %199 = vector.shape_cast %198 : vector<8xf32> to vector<8x1xf32>
    %200 = tpu.reciprocal %199 {approx = true} : vector<8x1xf32> -> vector<8x1xf32>
    %201 = vector.broadcast %200 : vector<8x1xf32> to vector<8x128xf32>
    %202 = arith.mulf %197, %201 : vector<8x128xf32>
    %203 = arith.truncf %202 : vector<8x128xf32> to vector<8x128xbf16>
    %cst_66 = arith.constant dense<0.000000e+00> : vector<8x8xf32>
    %204 = tpu.matmul %203, %191, %cst_66 {dimension_numbers = #tpu.dot_dimension_numbers<[1], [0], [0], [1], [0, 0, 1, 1], [], []>} : vector<8x128xbf16>, vector<128x8xbf16>, vector<8x8xf32> -> vector<8x8xf32>
    %205 = vector.extract_strided_slice %142 {offsets = [0, 24], sizes = [8, 8], strides = [1, 1]} : vector<8x32xbf16> to vector<8x8xbf16>
    %206 = vector.extract_strided_slice %151 {offsets = [0, 24], sizes = [128, 8], strides = [1, 1]} : vector<128x32xbf16> to vector<128x8xbf16>
    %207 = vector.extract_strided_slice %156 {offsets = [0, 24], sizes = [128, 8], strides = [1, 1]} : vector<128x32xbf16> to vector<128x8xbf16>
    "tpu.trace_start"() <{level = 10 : i32, message = "qd,kd->qk"}> : () -> ()
    %cst_67 = arith.constant dense<0.000000e+00> : vector<8x128xf32>
    %208 = tpu.matmul %205, %206, %cst_67 {dimension_numbers = #tpu.dot_dimension_numbers<[1], [1], [0], [0], [0, 0, 1, 0], [], []>} : vector<8x8xbf16>, vector<128x8xbf16>, vector<8x128xf32> -> vector<8x128xf32>
    "tpu.trace_stop"() : () -> ()
    %cst_68 = arith.constant dense<0xFF800000> : vector<8xf32>
    %209 = vector.multi_reduction <maximumf>, %208, %cst_68 [1] : vector<8x128xf32> to vector<8xf32>
    %210 = vector.shape_cast %209 : vector<8xf32> to vector<8x1xf32>
    %211 = vector.broadcast %210 : vector<8x1xf32> to vector<8x128xf32>
    %212 = arith.subf %208, %211 : vector<8x128xf32>
    %213 = math.exp %212 : vector<8x128xf32>
    %cst_69 = arith.constant dense<0.000000e+00> : vector<8xf32>
    %214 = vector.multi_reduction <add>, %213, %cst_69 [1] : vector<8x128xf32> to vector<8xf32>
    %215 = vector.shape_cast %214 : vector<8xf32> to vector<8x1xf32>
    %216 = tpu.reciprocal %215 {approx = true} : vector<8x1xf32> -> vector<8x1xf32>
    %217 = vector.broadcast %216 : vector<8x1xf32> to vector<8x128xf32>
    %218 = arith.mulf %213, %217 : vector<8x128xf32>
    %219 = arith.truncf %218 : vector<8x128xf32> to vector<8x128xbf16>
    %cst_70 = arith.constant dense<0.000000e+00> : vector<8x8xf32>
    %220 = tpu.matmul %219, %207, %cst_70 {dimension_numbers = #tpu.dot_dimension_numbers<[1], [0], [0], [1], [0, 0, 1, 1], [], []>} : vector<8x128xbf16>, vector<128x8xbf16>, vector<8x8xf32> -> vector<8x8xf32>
    %221 = tpu.concatenate %172, %188, %204, %220 in 1 : vector<8x8xf32>, vector<8x8xf32>, vector<8x8xf32>, vector<8x8xf32> -> vector<8x32xf32>
    %c1 = arith.constant 1 : index
    %c0_71 = arith.constant 0 : index
    %c0_72 = arith.constant 0 : index
    %222 = vector.load %arg11[%c1, %c0_71, %c0_72] : memref<2x32x32xbf16, #tpu.memory_space<vmem>>, vector<1x32x32xbf16>
    %223 = vector.shape_cast %222 : vector<1x32x32xbf16> to vector<32x32xbf16>
    %224 = arith.truncf %221 : vector<8x32xf32> to vector<8x32xbf16>
    %cst_73 = arith.constant dense<0.000000e+00> : vector<8x32xf32>
    %225 = tpu.matmul %224, %223, %cst_73 {dimension_numbers = #tpu.dot_dimension_numbers<[1], [0], [0], [1], [0, 0, 1, 1], [], []>} : vector<8x32xbf16>, vector<32x32xbf16>, vector<8x32xf32> -> vector<8x32xf32>
    %226 = vector.extract_strided_slice %1 {offsets = [7, 0], sizes = [1, 32], strides = [1, 1]} : vector<15x32xf32> to vector<1x32xf32>
    %227 = vector.broadcast %226 : vector<1x32xf32> to vector<8x32xf32>
    %228 = arith.addf %225, %227 : vector<8x32xf32>
    %229 = arith.addf %134, %228 : vector<8x32xf32>
    %230 = vector.extract_strided_slice %1 {offsets = [11, 0], sizes = [1, 32], strides = [1, 1]} : vector<15x32xf32> to vector<1x32xf32>
    %231 = vector.extract_strided_slice %1 {offsets = [12, 0], sizes = [1, 32], strides = [1, 1]} : vector<15x32xf32> to vector<1x32xf32>
    %cst_74 = arith.constant dense<0.000000e+00> : vector<8xf32>
    %232 = vector.multi_reduction <add>, %229, %cst_74 [1] : vector<8x32xf32> to vector<8xf32>
    %233 = vector.shape_cast %232 : vector<8xf32> to vector<8x1xf32>
    %cst_75 = arith.constant 3.200000e+01 : f32
    %234 = vector.broadcast %cst_75 : f32 to vector<8x1xf32>
    %235 = arith.divf %233, %234 : vector<8x1xf32>
    %236 = vector.broadcast %235 : vector<8x1xf32> to vector<8x32xf32>
    %237 = arith.subf %229, %236 : vector<8x32xf32>
    %238 = arith.mulf %237, %237 : vector<8x32xf32>
    %cst_76 = arith.constant dense<0.000000e+00> : vector<8xf32>
    %239 = vector.multi_reduction <add>, %238, %cst_76 [1] : vector<8x32xf32> to vector<8xf32>
    %240 = vector.shape_cast %239 : vector<8xf32> to vector<8x1xf32>
    %cst_77 = arith.constant 3.200000e+01 : f32
    %241 = vector.broadcast %cst_77 : f32 to vector<8x1xf32>
    %242 = arith.divf %240, %241 : vector<8x1xf32>
    %cst_78 = arith.constant 9.99999974E-6 : f32
    %243 = vector.broadcast %cst_78 : f32 to vector<8x1xf32>
    %244 = arith.addf %242, %243 : vector<8x1xf32>
    %245 = math.rsqrt %244 : vector<8x1xf32>
    %246 = vector.broadcast %245 : vector<8x1xf32> to vector<8x32xf32>
    %247 = arith.mulf %237, %246 : vector<8x32xf32>
    %248 = vector.broadcast %230 : vector<1x32xf32> to vector<8x32xf32>
    %249 = arith.mulf %247, %248 : vector<8x32xf32>
    %250 = vector.broadcast %231 : vector<1x32xf32> to vector<8x32xf32>
    %251 = arith.addf %249, %250 : vector<8x32xf32>
    %c0_79 = arith.constant 0 : index
    %c0_80 = arith.constant 0 : index
    %252 = vector.load %arg12[%c0_79, %c0_80] : memref<32x128xbf16, #tpu.memory_space<vmem>>, vector<32x128xbf16>
    %253 = arith.truncf %251 : vector<8x32xf32> to vector<8x32xbf16>
    %cst_81 = arith.constant dense<0.000000e+00> : vector<8x128xf32>
    %254 = tpu.matmul %253, %252, %cst_81 {dimension_numbers = #tpu.dot_dimension_numbers<[1], [0], [0], [1], [0, 0, 1, 1], [], []>} : vector<8x32xbf16>, vector<32x128xbf16>, vector<8x128xf32> -> vector<8x128xf32>
    %c0_82 = arith.constant 0 : index
    %c0_83 = arith.constant 0 : index
    %255 = vector.load %arg13[%c0_82, %c0_83] : memref<1x128xf32, #tpu.memory_space<vmem>>, vector<1x128xf32>
    %256 = vector.broadcast %255 : vector<1x128xf32> to vector<8x128xf32>
    %257 = arith.addf %254, %256 : vector<8x128xf32>
    %cst_84 = arith.constant 0.000000e+00 : f32
    %258 = vector.broadcast %cst_84 : f32 to vector<8x128xf32>
    %259 = arith.maximumf %257, %258 : vector<8x128xf32>
    %c0_85 = arith.constant 0 : index
    %c0_86 = arith.constant 0 : index
    %260 = vector.load %arg14[%c0_85, %c0_86] : memref<128x32xbf16, #tpu.memory_space<vmem>>, vector<128x32xbf16>
    %261 = arith.truncf %259 : vector<8x128xf32> to vector<8x128xbf16>
    %cst_87 = arith.constant dense<0.000000e+00> : vector<8x32xf32>
    %262 = tpu.matmul %261, %260, %cst_87 {dimension_numbers = #tpu.dot_dimension_numbers<[1], [0], [0], [1], [0, 0, 1, 1], [], []>} : vector<8x128xbf16>, vector<128x32xbf16>, vector<8x32xf32> -> vector<8x32xf32>
    %263 = vector.extract_strided_slice %1 {offsets = [8, 0], sizes = [1, 32], strides = [1, 1]} : vector<15x32xf32> to vector<1x32xf32>
    %264 = vector.broadcast %263 : vector<1x32xf32> to vector<8x32xf32>
    %265 = arith.addf %262, %264 : vector<8x32xf32>
    %266 = arith.addf %251, %265 : vector<8x32xf32>
    %267 = vector.extract_strided_slice %1 {offsets = [13, 0], sizes = [1, 32], strides = [1, 1]} : vector<15x32xf32> to vector<1x32xf32>
    %268 = vector.extract_strided_slice %1 {offsets = [14, 0], sizes = [1, 32], strides = [1, 1]} : vector<15x32xf32> to vector<1x32xf32>
    %cst_88 = arith.constant dense<0.000000e+00> : vector<8xf32>
    %269 = vector.multi_reduction <add>, %266, %cst_88 [1] : vector<8x32xf32> to vector<8xf32>
    %270 = vector.shape_cast %269 : vector<8xf32> to vector<8x1xf32>
    %cst_89 = arith.constant 3.200000e+01 : f32
    %271 = vector.broadcast %cst_89 : f32 to vector<8x1xf32>
    %272 = arith.divf %270, %271 : vector<8x1xf32>
    %273 = vector.broadcast %272 : vector<8x1xf32> to vector<8x32xf32>
    %274 = arith.subf %266, %273 : vector<8x32xf32>
    %275 = arith.mulf %274, %274 : vector<8x32xf32>
    %cst_90 = arith.constant dense<0.000000e+00> : vector<8xf32>
    %276 = vector.multi_reduction <add>, %275, %cst_90 [1] : vector<8x32xf32> to vector<8xf32>
    %277 = vector.shape_cast %276 : vector<8xf32> to vector<8x1xf32>
    %cst_91 = arith.constant 3.200000e+01 : f32
    %278 = vector.broadcast %cst_91 : f32 to vector<8x1xf32>
    %279 = arith.divf %277, %278 : vector<8x1xf32>
    %cst_92 = arith.constant 9.99999974E-6 : f32
    %280 = vector.broadcast %cst_92 : f32 to vector<8x1xf32>
    %281 = arith.addf %279, %280 : vector<8x1xf32>
    %282 = math.rsqrt %281 : vector<8x1xf32>
    %283 = vector.broadcast %282 : vector<8x1xf32> to vector<8x32xf32>
    %284 = arith.mulf %274, %283 : vector<8x32xf32>
    %285 = vector.broadcast %267 : vector<1x32xf32> to vector<8x32xf32>
    %286 = arith.mulf %284, %285 : vector<8x32xf32>
    %287 = vector.broadcast %268 : vector<1x32xf32> to vector<8x32xf32>
    %288 = arith.addf %286, %287 : vector<8x32xf32>
    %c0_93 = arith.constant 0 : index
    %c0_94 = arith.constant 0 : index
    %289 = vector.load %arg16[%c0_93, %c0_94] : memref<32x128xbf16, #tpu.memory_space<vmem>>, vector<32x128xbf16>
    %290 = arith.truncf %288 : vector<8x32xf32> to vector<8x32xbf16>
    %cst_95 = arith.constant dense<0.000000e+00> : vector<8x128xf32>
    %291 = tpu.matmul %290, %289, %cst_95 {dimension_numbers = #tpu.dot_dimension_numbers<[1], [0], [0], [1], [0, 0, 1, 1], [], []>} : vector<8x32xbf16>, vector<32x128xbf16>, vector<8x128xf32> -> vector<8x128xf32>
    %c0_96 = arith.constant 0 : index
    %c0_97 = arith.constant 0 : index
    %292 = vector.load %arg17[%c0_96, %c0_97] : memref<1x128xf32, #tpu.memory_space<vmem>>, vector<1x128xf32>
    %293 = vector.broadcast %292 : vector<1x128xf32> to vector<8x128xf32>
    %294 = arith.addf %291, %293 : vector<8x128xf32>
    %c0_98 = arith.constant 0 : index
    %c0_99 = arith.constant 0 : index
    %c0_100 = arith.constant 0 : index
    %295 = vector.load %arg18[%c0_98, %c0_99, %c0_100] : memref<1x8x128xf32, #tpu.memory_space<vmem>>, vector<1x8x128xf32>
    %296 = vector.shape_cast %295 : vector<1x8x128xf32> to vector<8x128xf32>
    %297 = vector.shape_cast %294 : vector<8x128xf32> to vector<1x8x128xf32>
    tpu.vector_store %arg18[%c0_98, %c0_99, %c0_100], %297 {strides = array<i32>} : memref<1x8x128xf32, #tpu.memory_space<vmem>>, vector<1x8x128xf32>,
    return
  }
  func.func @transform_0(%arg0: i32) -> (i32, i32, i32) {
    %c0_i32 = arith.constant 0 : i32
    %c0_i32_0 = arith.constant 0 : i32
    %c0_i32_1 = arith.constant 0 : i32
    return %arg0, %c0_i32, %c0_i32_0 : i32, i32, i32
  }
  func.func @transform_1(%arg0: i32) -> (i32, i32, i32) {
    %c0_i32 = arith.constant 0 : i32
    %c0_i32_0 = arith.constant 0 : i32
    %c0_i32_1 = arith.constant 0 : i32
    return %arg0, %c0_i32, %c0_i32_0 : i32, i32, i32
  }
  func.func @transform_2(%arg0: i32) -> (i32, i32, i32) {
    %c0_i32 = arith.constant 0 : i32
    %c0_i32_0 = arith.constant 0 : i32
    %c0_i32_1 = arith.constant 0 : i32
    return %arg0, %c0_i32, %c0_i32_0 : i32, i32, i32
  }
  func.func @transform_3(%arg0: i32) -> (i32, i32) {
    %c0_i32 = arith.constant 0 : i32
    %c0_i32_0 = arith.constant 0 : i32
    %c0_i32_1 = arith.constant 0 : i32
    return %c0_i32, %c0_i32_0 : i32, i32
  }
  func.func @transform_4(%arg0: i32) -> (i32, i32) {
    %c0_i32 = arith.constant 0 : i32
    %c0_i32_0 = arith.constant 0 : i32
    %c0_i32_1 = arith.constant 0 : i32
    return %c0_i32, %c0_i32_0 : i32, i32
  }
  func.func @transform_5(%arg0: i32) -> (i32, i32) {
    %c0_i32 = arith.constant 0 : i32
    %c0_i32_0 = arith.constant 0 : i32
    %c0_i32_1 = arith.constant 0 : i32
    return %c0_i32, %c0_i32_0 : i32, i32
  }
  func.func @transform_6(%arg0: i32) -> (i32, i32) {
    %c0_i32 = arith.constant 0 : i32
    %c0_i32_0 = arith.constant 0 : i32
    %c0_i32_1 = arith.constant 0 : i32
    return %c0_i32, %c0_i32_0 : i32, i32
  }
  func.func @transform_7(%arg0: i32) -> (i32, i32) {
    %c0_i32 = arith.constant 0 : i32
    %c0_i32_0 = arith.constant 0 : i32
    %c0_i32_1 = arith.constant 0 : i32
    return %c0_i32, %c0_i32_0 : i32, i32
  }
  func.func @transform_8(%arg0: i32) -> (i32, i32) {
    %c0_i32 = arith.constant 0 : i32
    %c0_i32_0 = arith.constant 0 : i32
    %c0_i32_1 = arith.constant 0 : i32
    return %c0_i32, %c0_i32_0 : i32, i32
  }
  func.func @transform_9(%arg0: i32) -> (i32, i32) {
    %c0_i32 = arith.constant 0 : i32
    %c0_i32_0 = arith.constant 0 : i32
    %c0_i32_1 = arith.constant 0 : i32
    return %c0_i32, %c0_i32_0 : i32, i32
  }
  func.func @transform_10(%arg0: i32) -> (i32, i32, i32) {
    %c0_i32 = arith.constant 0 : i32
    %c0_i32_0 = arith.constant 0 : i32
    %c0_i32_1 = arith.constant 0 : i32
    %c0_i32_2 = arith.constant 0 : i32
    return %c0_i32, %c0_i32_0, %c0_i32_1 : i32, i32, i32
  }
  func.func @transform_11(%arg0: i32) -> (i32, i32) {
    %c0_i32 = arith.constant 0 : i32
    %c0_i32_0 = arith.constant 0 : i32
    %c0_i32_1 = arith.constant 0 : i32
    return %c0_i32, %c0_i32_0 : i32, i32
  }
  func.func @transform_12(%arg0: i32) -> (i32, i32) {
    %c0_i32 = arith.constant 0 : i32
    %c0_i32_0 = arith.constant 0 : i32
    %c0_i32_1 = arith.constant 0 : i32
    return %c0_i32, %c0_i32_0 : i32, i32
  }
  func.func @transform_13(%arg0: i32) -> (i32, i32) {
    %c0_i32 = arith.constant 0 : i32
    %c0_i32_0 = arith.constant 0 : i32
    %c0_i32_1 = arith.constant 0 : i32
    return %c0_i32, %c0_i32_0 : i32, i32
  }
  func.func @transform_14(%arg0: i32) -> (i32, i32) {
    %c0_i32 = arith.constant 0 : i32
    %c0_i32_0 = arith.constant 0 : i32
    %c0_i32_1 = arith.constant 0 : i32
    return %c0_i32, %c0_i32_0 : i32, i32
  }
  func.func @transform_15(%arg0: i32) -> (i32, i32) {
    %c0_i32 = arith.constant 0 : i32
    %c0_i32_0 = arith.constant 0 : i32
    %c0_i32_1 = arith.constant 0 : i32
    return %c0_i32, %c0_i32_0 : i32, i32
  }
  func.func @transform_16(%arg0: i32) -> (i32, i32) {
    %c0_i32 = arith.constant 0 : i32
    %c0_i32_0 = arith.constant 0 : i32
    %c0_i32_1 = arith.constant 0 : i32
    return %c0_i32, %c0_i32_0 : i32, i32
  }
  func.func @transform_17(%arg0: i32) -> (i32, i32, i32) {
    %c0_i32 = arith.constant 0 : i32
    %c0_i32_0 = arith.constant 0 : i32
    %c0_i32_1 = arith.constant 0 : i32
    return %arg0, %c0_i32, %c0_i32_0 : i32, i32, i32
  }
}

</mosaic_0001>

<bundles_post_ra>
// kernel: custom-call.11
= control target key start
LH: loop header
LB: loop body
LE: loop exit
PB: predicated region body
PF: predicated region fallthrough
CT: control target
= control target key end

     0   :  { %5 = vsyncpa [#allocation2], 0  ;;  %s939_s0 = inlined_call_operand.hbm [shape: f32[2,4,4], index: 0, kind: input, shape index: {}]   ;;  %s940_s1 = inlined_call_operand.vmem [shape: f32[2,4,4], index: 1, kind: output, shape index: {0}]   ;;  %s941_s2 = inlined_call_operand.hbm [shape: s32[2,4], index: 2, kind: output, shape index: {1}]   ;;  %s942_s3 = inlined_call_operand.vmem [shape: s32[2,4], index: 3, kind: output, shape index: {2}]  }
   0x1   :  { %7 = vsyncpa [#allocation2 + $0x1], 0 }
   0x2   :  { %8 = vsyncpa [#allocation3], 0 }
   0x3   :  { %10 = vsyncpa [#allocation3 + $0x1], 0  ;;  %s754_s12 = smov 0   ;;  %s756_s13 = smov 0  }
   0x4   :  { %s758_s14 = smov 0   ;;  %s760_s15 = smov 0  }
   0x5 LB: > { %s775_s16 = sadd.s32 4294967295, %s727_s15   ;;  %s557_s17 = sadd.s32 4294967294, %s727_s15   ;;  %s727_s15 = sphi %s760_s15, %s948_s15   ;;  %s723_s14 = sphi %s758_s14, %s947_s14   ;;  %s719_s13 = sphi %s756_s13, %s946_s13   ;;  %s715_s12 = sphi %s754_s12, %s945_s12  }
   0x6   : > { %s779_s18 = sadd.s32 1, %s727_s15   ;;  %s20_s19 = sshrl.u32 %s727_s15, 3 }
   0x7   : > { %s21_s20 = sshrl.u32 %s779_s18, 3  ;;  %s25_s21 = sadd.s32 1, %s723_s14 }
   0x8   : > { %s22_s22 = ssub.s32 %s20_s19, %s21_s20  ;;  %p35_p0 = scmp.ne.s32.totalorder %s723_s14, %s719_s13 }
   0x9   : > { %p23_p1 = scmp.eq.s32.totalorder %s22_s22, 0  ;;  %p36_p2 = scmp.eq.s32.totalorder %s775_s16, 1 }
   0xa   : > { %p41_p3 = scmp.ne.s32.totalorder %s719_s13, %s715_s12  ;;  %p42_p4 = scmp.eq.s32.totalorder %s557_s17, 1 }
   0xb   : > { %s790_s23 = scalar_select %p23_p1, %s723_s14, %s25_s21  }
   0xc   : > { %p792_p5 = por %p36_p2, %p35_p0  ;;  %p796_p6 = por %p42_p4, %p41_p3 }
   0xd   : > { %p559_p7 = scmp.ge.s32.totalorder %s727_s15, 2  ;;  %p586_p8 = scmp.lt.s32.totalorder %s727_s15, 2 }
   0xe   : > { %s87_s26 = sand.u32 1, %s727_s15   ;;  %s561_s27 = sshll.u32 %s727_s15, 2 }
   0xf   : > { %s560_s28 = sshll.u32 %s87_s26, 2  ;;  %s95_s4 = scalar_lea.hbm %s939_s0, %s561_s27 }
  0x10   : > { %s97_s5 = sshll.u32 %s95_s4, 4  ;;  %s91_s6 = scalar_lea.vmem [#allocation1], %s560_s28  ;;  %s98_s5 = int_to_ptr.hbm [resolvable:$true] %s97_s5 }
  0x11   : > { %s99_s7 = sshll.u32 %s91_s6, 4  ;;  %s88_s8 = scalar_lea.sflag [#allocation2], %s87_s26  ;;  %s100_s7 = int_to_ptr.vmem [resolvable:$true] %s99_s7 }
  0x12   : > { %s631_s9 = sshra.s32 %s98_s5, 4  ;;  %s637_s19 = scalar_lea.hbm %s939_s0, 8  ;;  %s632_s9 = int_to_ptr.hbm [resolvable:$true] %s631_s9 }
  0x13   : > { %s633_s10 = scalar_lea.hbm %s632_s9, 4  ;;  %p638_p12 = scmp.lt.s32.totalorder %s632_s9, %s939_s0 }
  0x14   : > { %p634_p9 = scmp.ne.s32.totalorder %s632_s9, %s633_s10  ;;  %p639_p13 = scmp.lt.s32.totalorder %s637_s19, %s633_s10 }
  0x16   : > { %p635_p10 = pnand %p634_p9, %p586_p8  ;;  %p640_p0 = por %p639_p13, %p638_p12 }
  0x18   : > { %p636_p11 = pneg %p635_p10 }
  0x1a   : > { %p641_p1 = pnand %p640_p0, %p636_p11 }
  0x1c   : > { %644 = shalt.err (!%p641_p1)
}
  0x1d   : > { %579 = dma.hbm_to_vmem [thread:$0]  (%p586_p8), %s98_s5, 64, %s100_s7, %s88_s8  }
  0x1e   : > { %p562_p2 = scmp.ge.s32.totalorder %s727_s15, 1  ;;  %p104_p3 = scmp.lt.s32.totalorder %s727_s15, 3 }
  0x20   : > { %p105_p4 = pnand %p562_p2, %p104_p3 }
  0x22   : > { %108 = sbr.rel (%p105_p4) target bundleno = 498 (0x1f2), region = 20 }
  0x27   : > { %s110_s22 = sand.u32 1, %s775_s16  }
  0x28   : > { %s111_s26 = scalar_lea.sflag [#allocation2], %s110_s22 }
  0x29   : > { %707 = dma.done.wait %s111_s26, 64  }
  0x2a   : > { %708 = vsyncadd %s111_s26, 4294967232  ;;  %s820_s27 = sshll.u32 %s110_s22, 2  ;;  %s147_s28 = sand.u32 7, %s775_s16   ;;  %v152_v0 = vlaneseq  ;;  %v733_v2 = vmov 0  }
  0x2b   : > { %s826_s29 = scalar_lea.vmem [#allocation6], %s147_s28  ;;  %s130_s30 = sand.u32 1, %s719_s13  }
  0x2c   : > { %v824_v1 = vshrl.u32 %v152_v0, 7  ;;  %151 = vst [vmem:[%s826_s29] sm:$0x1] %v733_v2  ;;  %s833_s4 = sshll.u32 %s130_s30, 1  ;;  %s121_s5 = scalar_lea.vmem [#allocation1], %s820_s27 }
  0x2d   : > { %v141_v3 = vld [vmem:[%s121_s5] sm:$0xf]  ;;  %s125_s6 = scalar_lea.vmem [#allocation5], %s820_s27  ;;  %s132_s7 = scalar_lea.vmem [#allocation7], %s833_s4 }
  0x2e   : > { %156 = vst [vmem:[#allocation10] sm:$0xff] %v824_v1  ;;  %s138_s8 = scalar_lea.vmem [#allocation9], %s833_s4  ;;  %s839_s9 = scalar_lea.vmem [#allocation8], %s147_s28 }
  0x2f   : > { %142 = vst [vmem:[#allocation0] sm:$0xf] %v141_v3  ;;  %s841_s10 = smov 0  }
  0x36   : > { %v145_v4 = vld [vmem:[#allocation0] sm:$0xff] }
  0x37   : > { %146 = vst [vmem:[#allocation4] sm:$0xff] %v145_v4 }
  0x38 LB: >> { %vm172_vm0 = vcmp.lt.s32.totalorder %v824_v1, 4  ;;  %v848_v7 = vstv %s731_s10  ;;  %s213_s11 = ssub.s32 128, %s731_s10  ;;  %v219_v38 = vand.u32 127, %v152_v0  ;;  %s225_s17 = scalar_lea.vmem [#allocation4], %s731_s10  ;;  %v222_v41 = vld [vmem:[%s826_s29] ss:$0 sm:$0xff]  ;;  %s731_s10 = sphi %s841_s10, %s162_s10  }
  0x39   : >> { %vm171_vm1 = vcmp.ge.s32.totalorder %v824_v1, %v848_v7  ;;  %s231_s21 = scalar_lea.vmem [#allocation10], %s731_s10  ;;  %vm251_vm14 = vcmp.gt.s32.totalorder %v824_v1, %v848_v7  ;;  %s162_s10 = sadd.s32 1, %s731_s10  }
  0x3a   : >> { %vm173_vm3 = vmand %vm171_vm1, %vm172_vm0  ;;  %vm220_vm12 = vcmp.eq.s32.totalorder %v219_v38, %v848_v7  ;;  %v233_v43 = vld [vmem:[%s231_s21] ss:$0 sm:$0xff]  ;;  %p159_p8 = scmp.ge.s32.totalorder %s162_s10, 4  }
  0x3b   : > { %s393_s26 = sshrl.u32 (%p159_p8), %s775_s16, 3  ;;  %s399_s10 = sshll.u32 (%p159_p8), %s132_s7, 4  ;;  %s400_s10 = int_to_ptr.vmem [resolvable:$true] %s399_s10 }
  0x3c   : > { %s880_s28 = sshll.u32 (%p159_p8), %s393_s26, 1  ;;  %s347_s26 = scalar_lea.sflag (%p159_p8), [#allocation3], %s130_s30 }
  0x3e   : >> { %v167_v5 = vld [vmem:[#allocation4] sm:$0xff]  ;;  %v227_v39 = vld [vmem:[%s225_s17] ss:$0 sm:$0xff] }
  0x3f   : >> { %v168_v6 = vand.u32 2147483647, %v167_v5 }
  0x41   : >> { %vm567_vm2 = vcmp.gt.f32.partialorder %v168_v6, -inf }
  0x42   : >> { %vm175_vm4 = vmand %vm173_vm3, %vm567_vm2 }
  0x43   : >> { %v176_v8 = vsel %vm175_vm4, %v824_v1, %v848_v7  ;;  %v177_v9 = vsel %vm175_vm4, %v168_v6, -inf  ;;  %vm268_vm4 = vmand %vm251_vm14, %vm220_vm12 }
  0x44   : >> { %v178_v10 = vrot.slane %v177_v9, 1  ;;  %v179_v11 = vrot.slane %v176_v8, 1 }
  0x46   : >> { %vm180_vm5 = vcmp.ge.f32.partialorder %v178_v10, %v177_v9  ;;  %v183_v12 = vrot.slane %v178_v10, 1  ;;  %v184_v13 = vrot.slane %v179_v11, 1 }
  0x47   : >> { %v181_v14 = vsel %vm180_vm5, %v178_v10, %v177_v9  ;;  %v182_v15 = vsel %vm180_vm5, %v179_v11, %v176_v8  ;;  %vm243_vm5 = vcmp.gt.s32.totalorder %v219_v38, %v848_v7 }
  0x48   : >> { %vm185_vm6 = vcmp.ge.f32.partialorder %v183_v12, %v181_v14  ;;  %v188_v16 = vrot.slane %v183_v12, 1  ;;  %v189_v17 = vrot.slane %v184_v13, 1 }
  0x49   : >> { %v186_v18 = vsel %vm185_vm6, %v183_v12, %v181_v14  ;;  %v187_v19 = vsel %vm185_vm6, %v184_v13, %v182_v15 }
  0x4a   : >> { %vm190_vm7 = vcmp.ge.f32.partialorder %v188_v16, %v186_v18  ;;  %v193_v20 = vrot.slane %v188_v16, 1  ;;  %v194_v21 = vrot.slane %v189_v17, 1 }
  0x4b   : >> { %v191_v22 = vsel %vm190_vm7, %v188_v16, %v186_v18  ;;  %v192_v23 = vsel %vm190_vm7, %v189_v17, %v187_v19 }
  0x4c   : >> { %vm195_vm8 = vcmp.ge.f32.partialorder %v193_v20, %v191_v22  ;;  %v198_v24 = vrot.slane %v193_v20, 1  ;;  %v199_v25 = vrot.slane %v194_v21, 1 }
  0x4d   : >> { %v196_v26 = vsel %vm195_vm8, %v193_v20, %v191_v22  ;;  %v197_v27 = vsel %vm195_vm8, %v194_v21, %v192_v23 }
  0x4e   : >> { %vm200_vm9 = vcmp.ge.f32.partialorder %v198_v24, %v196_v26  ;;  %v203_v28 = vrot.slane %v198_v24, 1  ;;  %v204_v29 = vrot.slane %v199_v25, 1 }
  0x4f   : >> { %v201_v30 = vsel %vm200_vm9, %v198_v24, %v196_v26  ;;  %v202_v31 = vsel %vm200_vm9, %v199_v25, %v197_v27 }
  0x50   : >> { %vm205_vm10 = vcmp.ge.f32.partialorder %v203_v28, %v201_v30  ;;  %v208_v32 = vrot.slane %v203_v28, 1  ;;  %v209_v33 = vrot.slane %v204_v29, 1 }
  0x51   : >> { %v206_v34 = vsel %vm205_vm10, %v203_v28, %v201_v30  ;;  %v207_v35 = vsel %vm205_vm10, %v204_v29, %v202_v31 }
  0x52   : >> { %vm210_vm11 = vcmp.ge.f32.partialorder %v208_v32, %v206_v34 }
  0x53   : >> { %v212_v36 = vsel %vm210_vm11, %v209_v33, %v207_v35 }
  0x54   : >> { %214 = vrot.lane.b32.xlu0 %v212_v36, %s213_s11 }
  0xc6   : >> { %v215_v37 = vpop.permute.xlu0 %214 }
  0xc7   : >> { %576 = vpush %v215_v37 }
  0xf8   : >> { %s577_s19 = spop %576 }
  0xf9   : >> { %v221_v40 = vstv %s577_s19  ;;  %s226_s20 = scalar_lea.vmem [#allocation4], %s577_s19  ;;  %s232_s22 = scalar_lea.vmem [#allocation10], %s577_s19 }
  0xfa   : >> { %v228_v42 = vld [vmem:[%s226_s20] ss:$0 sm:$0xff]  ;;  %v223_v45 = vsel %vm220_vm12, %v221_v40, %v222_v41 }
  0xfb   : >> { %v234_v44 = vld [vmem:[%s232_s22] ss:$0 sm:$0xff]  ;;  %229 = vst [vmem:[%s226_s20] sm:$0x1] %v227_v39  ;;  %vm237_vm13 = vcmp.ne.f32.partialorder %v228_v42, 0.0  ;;  %v244_v61 = vsel %vm243_vm5, %v228_v42, 0.0 }
  0xfc   : >> { %230 = vst [vmem:[%s225_s17] sm:$0x1] %v228_v42  ;;  %vm238_vm15 = vmand %vm220_vm12, %vm237_vm13  ;;  %s397_s17 = scalar_lea.hbm (%p159_p8), %s941_s2, %s880_s28 }
  0xfd   : >> { %235 = vst [vmem:[%s232_s22] sm:$0x1] %v233_v43  ;;  %v239_v46 = vsel %vm238_vm15, %v228_v42, 1.0  ;;  %s401_s19 = sshll.u32 (%p159_p8), %s397_s17, 4  ;;  %s402_s19 = int_to_ptr.hbm [resolvable:$true] %s401_s19 }
  0xfe   : >> { %236 = vst [vmem:[%s231_s21] sm:$0x1] %v234_v44  ;;  %v252_v47 = vsel %vm251_vm14, %v239_v46, 1.0  ;;  %s673_s5 = sshra.s32 (%p159_p8), %s402_s19, 4  ;;  %s674_s5 = int_to_ptr.hbm [resolvable:$true] %s673_s5 }
  0xff   : >> { %629 = vrcp.f32 %v252_v47  ;;  %224 = vst [vmem:[%s826_s29] sm:$0x1] %v223_v45  ;;  %v264_v51 = vand.u32 2147483648, %v252_v47  ;;  %v262_v53 = vand.u32 2147483647, %v252_v47  ;;  %vm258_vm1 = vweird.f32 %v252_v47  ;;  %s571_s29 = sshll.u32 (%p159_p8), %s775_s16, 2  ;;  %s675_s16 = scalar_lea.hbm (%p159_p8), %s674_s5, 2 }
 0x100   : > { %s356_s22 = scalar_lea.vmem (%p159_p8), %s940_s1, %s571_s29  ;;  %p676_p9 = scmp.ne.s32.totalorder (%p159_p8), %s674_s5, %s675_s16 }
 0x101   : >> { %v265_v55 = vor.u32 1.1754944e-38, %v264_v51  ;;  %vm263_vm3 = vcmp.eq.f32.partialorder %v262_v53, 8.507059e+37  ;;  %s679_s29 = scalar_lea.hbm (%p159_p8), %s941_s2, 2  ;;  %p680_p12 = scmp.lt.s32.totalorder (%p159_p8), %s674_s5, %s941_s2 }
 0x102   : > { %p677_p10 = pnand (%p159_p8), %p676_p9, %p792_p5  ;;  %p681_p13 = scmp.lt.s32.totalorder (%p159_p8), %s679_s29, %s675_s16 }
 0x103   : >> { %v248_v57 = vld [vmem:[#allocation4] sm:$0xff] }
 0x104   : > { %p678_p11 = pneg (%p159_p8), %p677_p10  ;;  %p682_p0 = por (%p159_p8), %p681_p13, %p680_p12 }
 0x105   : >> { %v630_v48 = vpop.eup %629  ;;  %v275_v3 = vld [vmem:[#allocation10] sm:$0xff] (%p159_p8) }
 0x106   : >> { %v254_v49 = vmul.f32 %v630_v48, %v252_v47  ;;  %vm259_vm0 = vweird.f32 %v630_v48  ;;  %v332_v0 = vld [vmem:[#allocation6] sm:$0x3] (%p159_p8)  ;;  %p683_p1 = pnand (%p159_p8), %p682_p0, %p678_p11 }
 0x107   : >> { %vm260_vm2 = vmor %vm258_vm1, %vm259_vm0  ;;  %335 = vst [vmem:[%s132_s7] sm:$0x3] (%p159_p8), %v332_v0 }
 0x108   : >> { %v255_v50 = vsub.f32 1.0, %v254_v49 }
 0x10a   : >> { %v256_v52 = vmul.f32 %v630_v48, %v255_v50 }
 0x10c   : >> { %v257_v54 = vadd.f32 %v630_v48, %v256_v52 }
 0x10e   : >> { %v261_v56 = vsel %vm260_vm2, %v630_v48, %v257_v54 }
 0x10f   : >> { %v266_v58 = vsel %vm263_vm3, %v265_v55, %v261_v56 }
 0x110   : >> { %v267_v59 = vmul.f32 %v266_v58, %v248_v57 }
 0x112   : >> { %v269_v60 = vsel %vm268_vm4, %v267_v59, 0.0 }
 0x113   : >> { %270 = vadd.xlane.f32.xlu0 %v269_v60 }
 0x13c   : > { %291 = vxpose.xlu0.b32.start.end [1/1] (short) (narrow) (%p159_p8), %v275_v3, 8 }
 0x186   : >> { %v271_v62 = vpop.xlane.xlu0 %270 }
 0x187   : >> { %v272_v63 = vmul.f32 %v271_v62, %v244_v61  ;;  %161 = sbr.rel (!%p159_p8) target bundleno = 56 (0x38), region = 173 }
 0x189   : >> { %v273_v2 = vsub.f32 %v267_v59, %v272_v63 }
 0x18b   : >> { %274 = vst [vmem:[#allocation4] sm:$0xff] %v273_v2 }
 0x192   : > { %v326_v4 = vld [vmem:[#allocation4] sm:$0xf] }
 0x193   : > { %329 = vst [vmem:[%s125_s6] sm:$0xf] %v326_v4 }
 0x19a   : > { %v373_v1 = vld [vmem:[%s125_s6] sm:$0xf] }
 0x19b   : > { %374 = vst [vmem:[%s356_s22] sm:$0xf] %v373_v1 }
 0x19c   : > { %686 = shalt.err (!%p683_p1)
}
 0x19d   : > { %580 = dma.vmem_to_hbm [thread:$0]  (%p792_p5), %s400_s10, 32, %s402_s19, %s347_s26  }
 0x19e   : > { %s410_s6 = scalar_lea.vmem (%p792_p5), %s942_s3, %s880_s28 }
 0x1e0   : > { %v307_v5 = vpop.trf.xlu0 }
 0x1e1   : > { %323 = vst [vmem:[%s839_s9] sm:$0x1] %v307_v5 }
 0x1e5   : > { %407 = sbr.rel (!%p792_p5) target bundleno = 498 (0x1f2), region = 66 }
 0x1e8   : > { %v338_v6 = vld [vmem:[#allocation8] sm:$0x3] }
 0x1e9   : > { %341 = vst [vmem:[%s138_s8] sm:$0x3] %v338_v6 }
 0x1f0   : > { %v427_v7 = vld [vmem:[%s138_s8] sm:$0x3] }
 0x1f1   : > { %428 = vst [vmem:[%s410_s6] sm:$0x3] %v427_v7 }
 0x1f2 PF: > { %s456_s7 = sand.u32 1, %s715_s12   ;;  %p583_p2 = pnand %p559_p7, %p796_p6 }
 0x1f3   : > { %s457_s24 = scalar_lea.sflag [#allocation3], %s456_s7 }
 0x1f4   : > { %p584_p3 = pneg %p583_p2 }
 0x1f6   : > { %710 = dma.done.wait (%p584_p3), %s457_s24, 32  }
 0x1f7   : > { %712 = vsyncadd (%p584_p3), %s457_s24, 4294967264  ;;  %p13_p5 = scmp.ge.s32.totalorder %s779_s18, 4   ;;  %s945_s12 = smov %s719_s13 }
 0x1f8   : > { %s946_s13 = smov %s723_s14  ;;  %s947_s14 = smov %s790_s23 }
 0x1f9   : > { %s948_s15 = smov %s779_s18  ;;  %15 = sbr.rel (!%p13_p5) target bundleno = 5 (0x5), region = 184 }
 0x1fe   :  { %470 = vsyncpa [#allocation2], 1 }
 0x1ff   :  { %472 = vsyncpa [#allocation2 + $0x1], 1 }
 0x200   :  { %473 = vsyncpa [#allocation3], 1 }
 0x201   :  { %475 = vsyncpa [#allocation3 + $0x1], 1 }

// kernel: custom-call.13
= control target key start
LH: loop header
LB: loop body
LE: loop exit
PB: predicated region body
PF: predicated region fallthrough
CT: control target
= control target key end

     0   :  { %s383_s6 = smov 0   ;;  %s385_s7 = smov 0   ;;  %s432_s0 = inlined_call_operand.vmem [shape: f32[2,1,4,4], index: 0, kind: input, shape index: {}]   ;;  %s433_s1 = inlined_call_operand.vmem [shape: f32[2,1,4,4], index: 1, kind: output, shape index: {}]  }
   0x1   :  { %s387_s8 = smov 0  }
   0x2 LB: > { %s309_s9 = sadd.s32 4294967295, %s370_s8   ;;  %s33_s10 = sadd.s32 1, %s366_s7  ;;  %s370_s8 = sphi %s387_s8, %s7_s8   ;;  %s366_s7 = sphi %s385_s7, %s435_s7   ;;  %s362_s6 = sphi %s383_s6, %s434_s6  }
   0x3   : > { %p35_p0 = scmp.ge.s32.totalorder %s33_s10, 2  ;;  %p311_p1 = scmp.ge.s32.totalorder %s370_s8, 2 }
   0x4   : > { %s49_s11 = sand.u32 (!%p311_p1), 1, %s370_s8   ;;  %s313_s12 = sshll.u32 (!%p311_p1), %s366_s7, 2 }
   0x5   : > { %s437_s10 = smov (%p35_p0, %s33_s10), 0  ;;  %47 = sbr.rel (%p311_p1) target bundleno = 12 (0xc), region = 16 }
   0x6   : > { %s312_s13 = sshll.u32 (!%p311_p1), %s49_s11, 2  ;;  %s56_s16 = scalar_lea.vmem (!%p311_p1), %s432_s0, %s313_s12 }
   0x7   : > { %s51_s17 = scalar_lea.vmem (!%p311_p1), [#allocation1], %s312_s13 }
   0xa   : > { %v73_v0 = vld [vmem:[%s56_s16] sm:$0xf] }
   0xb   : > { %74 = vst [vmem:[%s51_s17] sm:$0xf] %v73_v0 }
   0xc PF: > { %p314_p2 = scmp.ge.s32.totalorder %s370_s8, 1  ;;  %p91_p3 = scmp.lt.s32.totalorder %s370_s8, 3 }
   0xe   : > { %p92_p4 = pnand %p314_p2, %p91_p3 }
  0x10   : > { %95 = sbr.rel (%p92_p4) target bundleno = 556 (0x22c), region = 50 }
  0x15   : > { %s410_s18 = sand.u32 1, %s309_s9   ;;  %v113_v1 = vlaneseq  ;;  %v372_v20 = vmov -1.0   ;;  %s318_s22 = sshll.u32 %s362_s6, 2 }
  0x16   : > { %s315_s19 = sshll.u32 %s410_s18, 2  ;;  %s216_s25 = scalar_lea.vmem %s433_s1, %s318_s22 }
  0x17   : > { %s104_s20 = scalar_lea.vmem [#allocation1], %s315_s19  ;;  %v114_v3 = vand.u32 127, %v113_v1  ;;  %v117_v4 = vshrl.u32 %v113_v1, 7  ;;  %s108_s21 = scalar_lea.vmem [#allocation3], %s315_s19 }
  0x18   : > { %v111_v2 = vld [vmem:[%s104_s20] sm:$0xf] }
  0x19   : > { %112 = vst [vmem:[#allocation0] sm:$0xf] %v111_v2  ;;  %vm119_vm0 = vcmp.eq.s32.totalorder %v117_v4, %v114_v3  ;;  %vm115_vm1 = vcmp.lt.s32.totalorder %v114_v3, 4  ;;  %vm124_vm2 = vcmp.ge.s32.totalorder %v117_v4, %v114_v3  ;;  %vm151_vm8 = vcmp.eq.s32.totalorder %v114_v3, 0 }
  0x1a   : > { %vm125_vm3 = vmand %vm124_vm2, %vm115_vm1  ;;  %vm148_vm9 = vcmp.eq.s32.totalorder %v114_v3, %v117_v4  ;;  %v152_v21 = vsel %vm151_vm8, 1.0, %v372_v20  ;;  %vm159_vm10 = vcmp.eq.s32.totalorder %v114_v3, 1  ;;  %vm169_vm11 = vcmp.eq.s32.totalorder %v114_v3, 2 }
  0x1b   : > { %v153_v22 = vsel %vm148_vm9, %v152_v21, 0.0  ;;  %vm179_vm12 = vcmp.eq.s32.totalorder %v114_v3, 3 }
  0x20   : > { %v120_v5 = vld [vmem:[#allocation0] sm:$0xff] }
  0x21   : > { %v121_v6 = vsel %vm119_vm0, %v120_v5, 0.0  ;;  %v126_v15 = vsel %vm125_vm3, %v120_v5, 0.0 }
  0x22   : > { %122 = vadd.xlane.f32.xlu0 %v121_v6 }
  0x95   : > { %v123_v7 = vpop.xlane.xlu0 %122 }
  0x96   : > { %346 = vrcp.f32 %v123_v7  ;;  %v138_v11 = vand.u32 2147483648, %v123_v7  ;;  %v136_v13 = vand.u32 2147483647, %v123_v7  ;;  %vm132_vm5 = vweird.f32 %v123_v7 }
  0x98   : > { %v139_v16 = vor.u32 1.1754944e-38, %v138_v11  ;;  %vm137_vm7 = vcmp.eq.f32.partialorder %v136_v13, 8.507059e+37 }
  0x9c   : > { %v347_v8 = vpop.eup %346 }
  0x9d   : > { %v128_v9 = vmul.f32 %v347_v8, %v123_v7  ;;  %vm133_vm4 = vweird.f32 %v347_v8 }
  0x9e   : > { %vm134_vm6 = vmor %vm132_vm5, %vm133_vm4 }
  0x9f   : > { %v129_v10 = vsub.f32 1.0, %v128_v9 }
  0xa1   : > { %v130_v12 = vmul.f32 %v347_v8, %v129_v10 }
  0xa3   : > { %v131_v14 = vadd.f32 %v347_v8, %v130_v12 }
  0xa5   : > { %v135_v17 = vsel %vm134_vm6, %v347_v8, %v131_v14 }
  0xa6   : > { %v140_v18 = vsel %vm137_vm7, %v139_v16, %v135_v17 }
  0xa7   : > { %v141_v19 = vmul.f32 %v140_v18, %v126_v15 }
  0xa9   : > { %142 = vst [vmem:[#allocation4] sm:$0xff] %v141_v19 }
  0xb0   : > { %v155_v23 = vld [vmem:[#allocation4 + $0x1] ss:$0 sm:$0xff]  ;;  %v165_v26 = vld [vmem:[#allocation4 + $0x2] ss:$0 sm:$0xff]  ;;  %v175_v31 = vld [vmem:[#allocation4 + $0x3] ss:$0 sm:$0xff] }
  0xb1   : > { %v156_v24 = vxor.u32 2147483648, %v155_v23  ;;  %v166_v28 = vxor.u32 2147483648, %v165_v26  ;;  %v176_v33 = vxor.u32 2147483648, %v175_v31 }
  0xb3   : > { %v160_v25 = vmul.f32 %v156_v24, %v153_v22 }
  0xb5   : > { %161 = vadd.xlane.f32.xlu0 %v160_v25 }
 0x128   : > { %v162_v27 = vpop.xlane.xlu0 %161 }
 0x129   : > { %v163_v29 = vsel %vm159_vm10, %v162_v27, %v153_v22 }
 0x12a   : > { %v170_v30 = vmul.f32 %v166_v28, %v163_v29 }
 0x12c   : > { %171 = vadd.xlane.f32.xlu1 %v170_v30 }
 0x19f   : > { %v172_v32 = vpop.xlane.xlu1 %171 }
 0x1a0   : > { %v173_v34 = vsel %vm169_vm11, %v172_v32, %v163_v29 }
 0x1a1   : > { %v180_v35 = vmul.f32 %v176_v33, %v173_v34 }
 0x1a3   : > { %181 = vadd.xlane.f32.xlu1 %v180_v35 }
 0x216   : > { %v182_v36 = vpop.xlane.xlu1 %181 }
 0x217   : > { %v183_v37 = vsel %vm179_vm12, %v182_v36, %v173_v34 }
 0x218   : > { %v198_v38 = vmul.f32 %v183_v37, %v140_v18 }
 0x21a   : > { %v200_v39 = vsel %vm132_vm5, %v183_v37, %v198_v38 }
 0x21b   : > { %201 = vst [vmem:[#allocation2] sm:$0xff] %v200_v39 }
 0x222   : > { %v204_v40 = vld [vmem:[#allocation2] sm:$0xf] }
 0x223   : > { %207 = vst [vmem:[%s108_s21] sm:$0xf] %v204_v40 }
 0x22a   : > { %v233_v41 = vld [vmem:[%s108_s21] sm:$0xf] }
 0x22b   : > { %234 = vst [vmem:[%s216_s25] sm:$0xf] %v233_v41 }
 0x22c PF: > { %s7_s8 = sadd.s32 1, %s370_s8   ;;  %s434_s6 = smov %s366_s7 }
 0x22d   : > { %p4_p5 = scmp.ge.s32.totalorder %s7_s8, 4   ;;  %s435_s7 = smov %s437_s10 }
 0x22f   :  { %6 = sbr.rel (!%p4_p5) target bundleno = 2 (0x2), region = 113 }

// kernel: custom-call.12
= control target key start
LH: loop header
LB: loop body
LE: loop exit
PB: predicated region body
PF: predicated region fallthrough
CT: control target
= control target key end

     0   :  { %s382_s6 = smov 0   ;;  %s384_s7 = smov 0   ;;  %s431_s0 = inlined_call_operand.vmem [shape: f32[2,1,4,4], index: 0, kind: input, shape index: {}]   ;;  %s432_s1 = inlined_call_operand.vmem [shape: f32[2,1,4,4], index: 1, kind: output, shape index: {}]  }
   0x1   :  { %s386_s8 = smov 0  }
   0x2 LB: > { %s308_s9 = sadd.s32 4294967295, %s369_s8   ;;  %s33_s10 = sadd.s32 1, %s365_s7  ;;  %s369_s8 = sphi %s386_s8, %s7_s8   ;;  %s365_s7 = sphi %s384_s7, %s434_s7   ;;  %s361_s6 = sphi %s382_s6, %s433_s6  }
   0x3   : > { %p35_p0 = scmp.ge.s32.totalorder %s33_s10, 2  ;;  %p310_p1 = scmp.ge.s32.totalorder %s369_s8, 2 }
   0x4   : > { %s49_s11 = sand.u32 (!%p310_p1), 1, %s369_s8   ;;  %s312_s12 = sshll.u32 (!%p310_p1), %s365_s7, 2 }
   0x5   : > { %s436_s10 = smov (%p35_p0, %s33_s10), 0  ;;  %47 = sbr.rel (%p310_p1) target bundleno = 12 (0xc), region = 16 }
   0x6   : > { %s311_s13 = sshll.u32 (!%p310_p1), %s49_s11, 2  ;;  %s56_s16 = scalar_lea.vmem (!%p310_p1), %s431_s0, %s312_s12 }
   0x7   : > { %s51_s17 = scalar_lea.vmem (!%p310_p1), [#allocation1], %s311_s13 }
   0xa   : > { %v73_v0 = vld [vmem:[%s56_s16] sm:$0xf] }
   0xb   : > { %74 = vst [vmem:[%s51_s17] sm:$0xf] %v73_v0 }
   0xc PF: > { %p313_p2 = scmp.ge.s32.totalorder %s369_s8, 1  ;;  %p91_p3 = scmp.lt.s32.totalorder %s369_s8, 3 }
   0xe   : > { %p92_p4 = pnand %p313_p2, %p91_p3 }
  0x10   : > { %95 = sbr.rel (%p92_p4) target bundleno = 556 (0x22c), region = 50 }
  0x15   : > { %s409_s18 = sand.u32 1, %s308_s9   ;;  %v113_v1 = vlaneseq  ;;  %v371_v20 = vmov -1.0   ;;  %s317_s22 = sshll.u32 %s361_s6, 2 }
  0x16   : > { %s314_s19 = sshll.u32 %s409_s18, 2  ;;  %s215_s25 = scalar_lea.vmem %s432_s1, %s317_s22 }
  0x17   : > { %s104_s20 = scalar_lea.vmem [#allocation1], %s314_s19  ;;  %v114_v3 = vand.u32 127, %v113_v1  ;;  %v117_v4 = vshrl.u32 %v113_v1, 7  ;;  %s108_s21 = scalar_lea.vmem [#allocation3], %s314_s19 }
  0x18   : > { %v111_v2 = vld [vmem:[%s104_s20] sm:$0xf] }
  0x19   : > { %112 = vst [vmem:[#allocation0] sm:$0xf] %v111_v2  ;;  %vm119_vm0 = vcmp.eq.s32.totalorder %v117_v4, %v114_v3  ;;  %vm115_vm1 = vcmp.lt.s32.totalorder %v114_v3, 4  ;;  %vm124_vm2 = vcmp.le.s32.totalorder %v117_v4, %v114_v3  ;;  %vm151_vm8 = vcmp.eq.s32.totalorder %v114_v3, 3 }
  0x1a   : > { %vm125_vm3 = vmand %vm124_vm2, %vm115_vm1  ;;  %vm148_vm9 = vcmp.eq.s32.totalorder %v114_v3, %v117_v4  ;;  %v152_v21 = vsel %vm151_vm8, 1.0, %v371_v20  ;;  %vm159_vm10 = vcmp.eq.s32.totalorder %v114_v3, 2  ;;  %vm169_vm11 = vcmp.eq.s32.totalorder %v114_v3, 1 }
  0x1b   : > { %v153_v22 = vsel %vm148_vm9, %v152_v21, 0.0  ;;  %vm178_vm12 = vcmp.eq.s32.totalorder %v114_v3, 0 }
  0x20   : > { %v120_v5 = vld [vmem:[#allocation0] sm:$0xff] }
  0x21   : > { %v121_v6 = vsel %vm119_vm0, %v120_v5, 0.0  ;;  %v126_v15 = vsel %vm125_vm3, %v120_v5, 0.0 }
  0x22   : > { %122 = vadd.xlane.f32.xlu0 %v121_v6 }
  0x95   : > { %v123_v7 = vpop.xlane.xlu0 %122 }
  0x96   : > { %345 = vrcp.f32 %v123_v7  ;;  %v138_v11 = vand.u32 2147483648, %v123_v7  ;;  %v136_v13 = vand.u32 2147483647, %v123_v7  ;;  %vm132_vm5 = vweird.f32 %v123_v7 }
  0x98   : > { %v139_v16 = vor.u32 1.1754944e-38, %v138_v11  ;;  %vm137_vm7 = vcmp.eq.f32.partialorder %v136_v13, 8.507059e+37 }
  0x9c   : > { %v346_v8 = vpop.eup %345 }
  0x9d   : > { %v128_v9 = vmul.f32 %v346_v8, %v123_v7  ;;  %vm133_vm4 = vweird.f32 %v346_v8 }
  0x9e   : > { %vm134_vm6 = vmor %vm132_vm5, %vm133_vm4 }
  0x9f   : > { %v129_v10 = vsub.f32 1.0, %v128_v9 }
  0xa1   : > { %v130_v12 = vmul.f32 %v346_v8, %v129_v10 }
  0xa3   : > { %v131_v14 = vadd.f32 %v346_v8, %v130_v12 }
  0xa5   : > { %v135_v17 = vsel %vm134_vm6, %v346_v8, %v131_v14 }
  0xa6   : > { %v140_v18 = vsel %vm137_vm7, %v139_v16, %v135_v17 }
  0xa7   : > { %v141_v19 = vmul.f32 %v140_v18, %v126_v15 }
  0xa9   : > { %142 = vst [vmem:[#allocation4] sm:$0xff] %v141_v19 }
  0xb0   : > { %v155_v23 = vld [vmem:[#allocation4 + $0x2] ss:$0 sm:$0xff]  ;;  %v165_v26 = vld [vmem:[#allocation4 + $0x1] ss:$0 sm:$0xff]  ;;  %v174_v31 = vld [vmem:[#allocation4] ss:$0 sm:$0xff] }
  0xb1   : > { %v156_v24 = vxor.u32 2147483648, %v155_v23  ;;  %v166_v28 = vxor.u32 2147483648, %v165_v26  ;;  %v175_v33 = vxor.u32 2147483648, %v174_v31 }
  0xb3   : > { %v160_v25 = vmul.f32 %v156_v24, %v153_v22 }
  0xb5   : > { %161 = vadd.xlane.f32.xlu0 %v160_v25 }
 0x128   : > { %v162_v27 = vpop.xlane.xlu0 %161 }
 0x129   : > { %v163_v29 = vsel %vm159_vm10, %v162_v27, %v153_v22 }
 0x12a   : > { %v170_v30 = vmul.f32 %v166_v28, %v163_v29 }
 0x12c   : > { %171 = vadd.xlane.f32.xlu1 %v170_v30 }
 0x19f   : > { %v172_v32 = vpop.xlane.xlu1 %171 }
 0x1a0   : > { %v173_v34 = vsel %vm169_vm11, %v172_v32, %v163_v29 }
 0x1a1   : > { %v179_v35 = vmul.f32 %v175_v33, %v173_v34 }
 0x1a3   : > { %180 = vadd.xlane.f32.xlu1 %v179_v35 }
 0x216   : > { %v181_v36 = vpop.xlane.xlu1 %180 }
 0x217   : > { %v182_v37 = vsel %vm178_vm12, %v181_v36, %v173_v34 }
 0x218   : > { %v197_v38 = vmul.f32 %v182_v37, %v140_v18 }
 0x21a   : > { %v199_v39 = vsel %vm132_vm5, %v182_v37, %v197_v38 }
 0x21b   : > { %200 = vst [vmem:[#allocation2] sm:$0xff] %v199_v39 }
 0x222   : > { %v203_v40 = vld [vmem:[#allocation2] sm:$0xf] }
 0x223   : > { %206 = vst [vmem:[%s108_s21] sm:$0xf] %v203_v40 }
 0x22a   : > { %v232_v41 = vld [vmem:[%s108_s21] sm:$0xf] }
 0x22b   : > { %233 = vst [vmem:[%s215_s25] sm:$0xf] %v232_v41 }
 0x22c PF: > { %s7_s8 = sadd.s32 1, %s369_s8   ;;  %s433_s6 = smov %s365_s7 }
 0x22d   : > { %p4_p5 = scmp.ge.s32.totalorder %s7_s8, 4   ;;  %s434_s7 = smov %s436_s10 }
 0x22f   :  { %6 = sbr.rel (!%p4_p5) target bundleno = 2 (0x2), region = 112 }

// kernel: transformer_forward.2
= control target key start
LH: loop header
LB: loop body
LE: loop exit
PB: predicated region body
PF: predicated region fallthrough
CT: control target
= control target key end

     0   :  { %s2846_s24 = smov 0   ;;  %s3445_s0 = inlined_call_operand.vmem [shape: bf16[2,8,384], index: 0, kind: input, shape index: {}]   ;;  %s3446_s1 = inlined_call_operand.vmem [shape: f32[2,8,32], index: 1, kind: input, shape index: {}]   ;;  %s3447_s2 = inlined_call_operand.vmem [shape: bf16[2,128,32], index: 2, kind: input, shape index: {}]   ;;  %s3448_s3 = inlined_call_operand.vmem [shape: bf16[384,32], index: 3, kind: input, shape index: {}]   ;;  %s3449_s4 = inlined_call_operand.vmem [shape: bf16[32,32], index: 4, kind: input, shape index: {}]   ;;  %s3450_s5 = inlined_call_operand.vmem [shape: f32[2,32], index: 5, kind: input, shape index: {}]   ;;  %s3451_s6 = inlined_call_operand.vmem [shape: bf16[32,64], index: 6, kind: input, shape index: {}]   ;;  %s3452_s7 = inlined_call_operand.vmem [shape: bf16[32,32], index: 7, kind: input, shape index: {}]   ;;  %s3453_s8 = inlined_call_operand.vmem [shape: bf16[32,32], index: 8, kind: input, shape index: {}]   ;;  %s3454_s9 = inlined_call_operand.vmem [shape: bf16[32,64], index: 9, kind: input, shape index: {}]   ;;  %s3455_s10 = inlined_call_operand.vmem [shape: bf16[2,32,32], index: 10, kind: input, shape index: {}]   ;;  %s3456_s11 = inlined_call_operand.vmem [shape: bf16[32,128], index: 11, kind: input, shape index: {}]   ;;  %s3457_s12 = inlined_call_operand.vmem [shape: f32[1,128], index: 12, kind: input, shape index: {}]   ;;  %s3458_s13 = inlined_call_operand.vmem [shape: bf16[128,32], index: 13, kind: input, shape index: {}]   ;;  %s3459_s14 = inlined_call_operand.vmem [shape: f32[15,32], index: 14, kind: input, shape index: {}]   ;;  %s3460_s15 = inlined_call_operand.vmem [shape: bf16[32,128], index: 15, kind: input, shape index: {}]   ;;  %s3461_s16 = inlined_call_operand.vmem [shape: f32[1,128], index: 16, kind: input, shape index: {}]   ;;  %s3462_s17 = inlined_call_operand.vmem [shape: f32[2,8,128], index: 17, kind: output, shape index: {}]  }
   0x1   :  { %3472 = sst [smem:[#allocation2_spill]] %s3445_s0 }
   0x2   :  { %3473 = sst [smem:[#allocation3_spill]] %s3446_s1 }
   0x3 LB: > { %s2337_s25 = sadd.s32 4294967295, %s2742_s24   ;;  %p2341_p0 = scmp.ge.s32.totalorder %s2742_s24, 1  ;;  %s2742_s24 = sphi %s2846_s24, %s27_s24  }
   0x4   : > { %p506_p1 = scmp.lt.s32.totalorder %s2742_s24, 3 }
   0x6   : > { %p507_p2 = pnand %p2341_p0, %p506_p1 }
   0x7   : > { %p566_p3 = scmp.lt.s32.totalorder (!%p507_p2), %s2337_s25, 1  ;;  %s3474_s26 = sld [smem:[#allocation2_spill]] (!%p507_p2) }
   0x8   : > { %510 = sbr.rel (%p507_p2) target bundleno = 3646 (0xe3e), region = 88  ;;  %s3475_s30 = sld [smem:[#allocation3_spill]] (!%p507_p2) }
   0x9   : > { %s3464_s19 = smov (!%p507_p2), 72   ;;  %s3469_s1 = smov (!%p507_p2), 88  }
   0xa   : > { %s2748_s20 = smov (!%p507_p2), 104   ;;  %s2749_s21 = smov (!%p507_p2), 120  }
   0xb   : > { %s3467_s22 = smov (!%p507_p2), 80   ;;  %s2751_s23 = smov (!%p507_p2), 112  }
   0xc   : > { %s3466_s28 = smov (!%p507_p2), 8  }
   0xd   : > { %v2621_v0 = vld [vmem:[%s3448_s3 + $0x38] sm:$0xff]  ;;  %v2620_v3 = vld [vmem:[%s3448_s3 + $0x30] sm:$0xff]  ;;  %v2619_v6 = vld [vmem:[%s3448_s3 + $0x28] sm:$0xff]  ;;  %s3483_s25 = smov (!%p566_p3, %s2337_s25), 1  ;;  %vm852_vm0 = vcmask 261120   ;;  %vm954_vm1 = vcmask 64512  }
   0xe   : > { %v2629_v1 = vld [vmem:[%s3448_s3 + $0x78] sm:$0xff]  ;;  %794 = vmatpush.bf16.msra.mxu0 %v2621_v0  ;;  %v2628_v4 = vld [vmem:[%s3448_s3 + $0x70] sm:$0xff]  ;;  %v2627_v7 = vld [vmem:[%s3448_s3 + $0x68] sm:$0xff]  ;;  %s2672_s0 = smul.u32 12, %s3483_s25  ;;  %vm989_vm2 = vcmask 1043456   ;;  %vm1193_vm3 = vcmask 130048  }
   0xf   : > { %v2637_v2 = vld [vmem:[%s3448_s3 + $0xb8] sm:$0xff]  ;;  %807 = vmatpush.bf16.msra.mxu1 %v2629_v1  ;;  %v2636_v5 = vld [vmem:[%s3448_s3 + $0xb0] sm:$0xff]  ;;  %v2635_v8 = vld [vmem:[%s3448_s3 + $0xa8] sm:$0xff]  ;;  %vm1195_vm4 = vcmask 195584  }
  0x10   : > { %820 = vmatpush.bf16.msra.mxu2 %v2637_v2  ;;  %v2618_v9 = vld [vmem:[%s3448_s3 + $0x20] sm:$0xff]  ;;  %v2617_v12 = vld [vmem:[%s3448_s3 + $0x18] sm:$0xff]  ;;  %v2616_v15 = vld [vmem:[%s3448_s3 + $0x10] sm:$0xff]  ;;  %s570_s27 = scalar_lea.vmem %s3474_s26, %s2672_s0  ;;  %s2744_s26 = smov 32  }
  0x11   : > { %v2626_v10 = vld [vmem:[%s3448_s3 + $0x60] sm:$0xff]  ;;  %v2625_v13 = vld [vmem:[%s3448_s3 + $0x58] sm:$0xff]  ;;  %v2624_v16 = vld [vmem:[%s3448_s3 + $0x50] sm:$0xff]  ;;  %s2747_s0 = smov 96  }
  0x12   : > { %795 = vmatpush.bf16.msra.mxu0 %v2620_v3  ;;  %v2634_v11 = vld [vmem:[%s3448_s3 + $0xa0] sm:$0xff]  ;;  %v2633_v14 = vld [vmem:[%s3448_s3 + $0x98] sm:$0xff]  ;;  %v2632_v17 = vld [vmem:[%s3448_s3 + $0x90] sm:$0xff] }
  0x13   : > { %808 = vmatpush.bf16.msra.mxu1 %v2628_v4  ;;  %v2615_v18 = vld [vmem:[%s3448_s3 + $0x8] sm:$0xff]  ;;  %v588_v20 = vld [vmem:[%s570_s27] sm:$0xff] }
  0x14   : > { %821 = vmatpush.bf16.msra.mxu2 %v2636_v5  ;;  %v2623_v19 = vld [vmem:[%s3448_s3 + $0x48] sm:$0xff]  ;;  %v641_v23 = vunpack.c.l.b16 %v588_v20  ;;  %v642_v24 = vunpack.c.h.b16 %v588_v20  ;;  %v2614_v25 = vld [vmem:[%s3448_s3] sm:$0xff] }
  0x15   : > { %v2631_v21 = vld [vmem:[%s3448_s3 + $0x88] sm:$0xff]  ;;  %v2622_v26 = vld [vmem:[%s3448_s3 + $0x40] sm:$0xff] }
  0x16   : > { %796 = vmatpush.bf16.msra.mxu0 %v2619_v6  ;;  %v589_v22 = vld [vmem:[%s570_s27 + $0x8] sm:$0xf]  ;;  %v2630_v28 = vld [vmem:[%s3448_s3 + $0x80] sm:$0xff]  ;;  %v644_v29 = vpack.c.b16 %v641_v23, %v641_v23  ;;  %v645_v30 = vpack.c.b16 %v642_v24, %v642_v24  ;;  %s3463_s27 = sshll.u32 %s3483_s25, 3 }
  0x17   : > { %809 = vmatpush.bf16.msra.mxu1 %v2627_v7  ;;  %v643_v27 = vunpack.c.l.b16 %v589_v22  ;;  %v2639_v32 = vld [vmem:[%s3449_s4 + $0x8] sm:$0xff]  ;;  %v2638_v33 = vld [vmem:[%s3449_s4] sm:$0xff]  ;;  %s574_s18 = scalar_lea.vmem %s3475_s30, %s3463_s27  ;;  %s2754_s27 = smov 16  }
  0x18   : > { %822 = vmatpush.bf16.msra.mxu2 %v2635_v8  ;;  %862 = vmatpush.bf16.msra.mxu3 %v2639_v32  ;;  %v585_v34 = vld [vmem:[%s3450_s5] sm:$0x3]  ;;  %v2641_v47 = vld [vmem:[%s3451_s6 + $0x8] sm:$0xff] }
  0x19   : > { %v646_v31 = vpack.c.b16 %v643_v27, %v643_v27  ;;  %v638_v35 = vperm.slane %v585_v34, 0  ;;  %v2640_v48 = vld [vmem:[%s3451_s6] sm:$0xff]  ;;  %v839_v51 = vperm.slane %v585_v34, 1 }
  0x1a   : > { %797 = vmatpush.bf16.msra.mxu0 %v2618_v9  ;;  %v2951_v49 = vld [vmem:[%s3459_s14] sm:$0xff] }
  0x1b   : > { %810 = vmatpush.bf16.msra.mxu1 %v2626_v10  ;;  %v907_v50 = vperm.slane %v2951_v49, 1  ;;  %v2961_v53 = vld [vmem:[%s574_s18] sm:$0xff]  ;;  %v904_v59 = vperm.slane %v2951_v49, 0  ;;  %v919_v32 = vperm.slane %v2951_v49, 2  ;;  %s3471_s18 = smov 24  }
  0x1c   : > { %823 = vmatpush.bf16.msra.mxu2 %v2634_v11  ;;  %863 = vmatpush.bf16.msra.mxu3 %v2638_v33 }
  0x1d   : > { %909 = vrot.lane.b32.xlu0 %v907_v50, %s2744_s26 }
  0x1e   : > { %798 = vmatpush.bf16.msra.mxu0 %v2617_v12 }
  0x1f   : > { %811 = vmatpush.bf16.msra.mxu1 %v2625_v13 }
  0x20   : > { %824 = vmatpush.bf16.msra.mxu2 %v2633_v14  ;;  %897 = vmatpush.bf16.msrb.mxu3 %v2641_v47 }
  0x22   : > { %799 = vmatpush.bf16.msra.mxu0 %v2616_v15 }
  0x23   : > { %812 = vmatpush.bf16.msra.mxu1 %v2624_v16 }
  0x24   : > { %825 = vmatpush.bf16.msra.mxu2 %v2632_v17  ;;  %898 = vmatpush.bf16.msrb.mxu3 %v2640_v48  ;;  %v2643_v17 = vld [vmem:[%s3452_s7 + $0x8] sm:$0xff] }
  0x26   : > { %800 = vmatpush.bf16.msra.mxu0 %v2615_v18  ;;  %v2642_v18 = vld [vmem:[%s3452_s7] sm:$0xff] }
  0x27   : > { %813 = vmatpush.bf16.msra.mxu1 %v2623_v19  ;;  %v918_v19 = vpack.c.bf16 %v2961_v53, %v2961_v53 }
  0x28   : > { %826 = vmatpush.bf16.msra.mxu2 %v2631_v21 }
  0x2a   : > { %801 = vmatpush.bf16.msra.mxu0 %v2614_v25 }
  0x2b   : > { %814 = vmatpush.bf16.msra.mxu1 %v2622_v26 }
  0x2c   : > { %827 = vmatpush.bf16.msra.mxu2 %v2630_v28 }
  0x2d   : > { %802 = vmatmul.bf16.vlgmr.msra.gmra.mxu0 %v644_v29 }
  0x2e   : > { %815 = vmatmul.bf16.vlgmr.msra.gmra.mxu1 %v645_v30 }
  0x2f   : > { %828 = vmatmul.bf16.vlgmr.msra.gmra.mxu2 %v646_v31 }
  0x8f   : > { %v910_v58 = vpop.permute.xlu0 %909 }
  0xaa   : > { %v803_v36 = vpop.f32.mrf.mxu0 }
  0xab   : > { %v816_v37 = vpop.f32.mrf.mxu1  ;;  %v804_v38 = vadd.f32 %v803_v36, %v638_v35 }
  0xad   : > { %v817_v39 = vadd.f32 %v816_v37, %v804_v38 }
  0xb2   : > { %v829_v40 = vpop.f32.mrf.mxu2  ;;  %v805_v42 = vpop.f32.mrf.mxu0 }
  0xb3   : > { %v830_v41 = vadd.f32 %v829_v40, %v817_v39  ;;  %v818_v43 = vpop.f32.mrf.mxu1 }
  0xb5   : > { %v833_v44 = vmax.f32 %v830_v41, 0.0 }
  0xb7   : > { %v838_v45 = vpack.c.bf16 %v833_v44, %v833_v44 }
  0xb9   : > { %2451 = vmatmul.msk.bf16.vlgmr.msra.gmra.mxu3 %vm852_vm0, %v838_v45 }
  0xba   : > { %v831_v46 = vpop.f32.mrf.mxu2  ;;  %941 = vmatpush.bf16.msra.mxu3 %v2643_v17 }
  0xbe   : > { %942 = vmatpush.bf16.msra.mxu3 %v2642_v18 }
 0x13c   : > { %v865_v52 = vpop.f32.mrf.mxu3 }
 0x13d   : > { %v2963_v54 = vadd.f32 %v865_v52, %v839_v51 }
 0x13f   : > { %v870_v55 = vadd.f32 %v2961_v53, %v2963_v54 }
 0x141   : > { %v875_v56 = vpack.c.bf16 %v870_v55, %v870_v55 }
 0x143   : > { %2460 = vmatmul.msk.bf16.vlgmr.msrb.gmra.mxu3 %vm852_vm0, %v875_v56 }
 0x144   : > { %v867_v57 = vpop.f32.mrf.mxu3 }
 0x153   : > { %2469 = vmatmul.msk.bf16.vlgmr.msra.gmra.mxu3 %vm852_vm0, %v918_v19 }
 0x1c6   : > { %v900_v60 = vpop.f32.mrf.mxu3 }
 0x1c7   : > { %v912_v61 = vadd.f32 %v910_v58, %v900_v60  ;;  %v905_v62 = vadd.f32 %v904_v59, %v900_v60 }
 0x1c9   : > { %v913_v63 = vpack.c.bf16 %v912_v61, %v912_v61  ;;  %v906_v1 = vpack.c.bf16 %v905_v62, %v905_v62 }
 0x1cb   : > { %v950_v0 = vunpack.c.l.b16 %v913_v63  ;;  %v1007_v4 = vunpack.c.l.b16 %v906_v1 }
 0x1cd   : > { %v951_v2 = vpack.c.b16 %v950_v0, %v950_v0  ;;  %v1008_v5 = vpack.c.b16 %v1007_v4, %v1007_v4 }
 0x1ce   : > { %v902_v3 = vpop.f32.mrf.mxu3 }
 0x1cf   : > { %1126 = vrot.lane.b32.xlu2 %v951_v2, %s3464_s19  ;;  %1011 = vrot.lane.b32.xlu1 %v951_v2, %s3469_s1  ;;  %s2613_s19 = sshll.u32 %s3483_s25, 6  ;;  %s3477_s1 = smov 80  }
 0x1d0   : > { %952 = vrot.lane.b32.xlu0 %v951_v2, %s2747_s0  ;;  %s3023_s29 = scalar_lea.vmem %s3447_s2, %s2613_s19  ;;  %s3476_s19 = smov 88  }
 0x1d6   : > { %v944_v33 = vpop.f32.mrf.mxu3 }
 0x1d7   : > { %1124 = vrot.lane.b32.xlu2 %v1008_v5, %s2748_s20  ;;  %1009 = vrot.lane.b32.xlu1 %v1008_v5, %s2749_s21  ;;  %v945_v34 = vadd.f32 %v944_v33, %v919_v32  ;;  %v2649_v32 = vld [vmem:[%s3023_s29 + $0x8] sm:$0xff] }
 0x1d8   : > { %1070 = vrot.lane.b32.xlu0 %v951_v2, %s3467_s22  ;;  %v2645_v33 = vld [vmem:[%s3455_s10 + $0x8] sm:$0xff] }
 0x1d9   : > { %v948_v35 = vpack.c.bf16 %v945_v34, %v945_v34  ;;  %v2650_v34 = vld [vmem:[%s3023_s29 + $0x10] sm:$0xff] }
 0x1db   : > { %v1045_v36 = vunpack.c.l.b16 %v948_v35  ;;  %v991_v39 = vsel %vm989_vm2, %v948_v35, 0  ;;  %v2644_v35 = vld [vmem:[%s3455_s10] sm:$0xff] }
 0x1dc   : > { %1000 = vmatpush.bf16.msrb.mxu1 %v991_v39 }
 0x1dd   : > { %v1046_v37 = vpack.c.b16 %v1045_v36, %v1045_v36  ;;  %v2651_v36 = vld [vmem:[%s3023_s29 + $0x18] sm:$0xff] }
 0x1de   : > { %v946_v38 = vpop.f32.mrf.mxu3 }
 0x1df   : > { %1068 = vrot.lane.b32.xlu1 %v1008_v5, %s2751_s23  ;;  %v2652_v38 = vld [vmem:[%s3023_s29 + $0x20] sm:$0xff] }
 0x229   : > { %v1127_v10 = vpop.permute.xlu2 %1126 }
 0x22a   : > { %v1132_v13 = vsel %vm954_vm1, %v1127_v10, 0 }
 0x231   : > { %v1125_v16 = vpop.permute.xlu2 %1124 }
 0x241   : > { %v1012_v6 = vpop.permute.xlu1 %1011 }
 0x242   : > { %v1017_v7 = vsel %vm954_vm1, %v1012_v6, 0  ;;  %v953_v8 = vpop.permute.xlu0 %952 }
 0x243   : > { %v959_v9 = vsel %vm954_vm1, %v953_v8, 0 }
 0x244   : > { %968 = vmatpush.bf16.xpose.msrb.mxu2 %v959_v9 }
 0x249   : > { %v1010_v11 = vpop.permute.xlu1 %1009 }
 0x24a   : > { %v1071_v12 = vpop.permute.xlu0 %1070 }
 0x24b   : > { %2470 = vmatmul.msk.bf16.vlgmr.msrb.gmra.mxu2 %vm954_vm1, %v906_v1  ;;  %v1076_v14 = vsel %vm954_vm1, %v1071_v12, 0 }
 0x24c   : > { %1026 = vmatpush.bf16.xpose.msra.mxu2 %v1017_v7  ;;  %1085 = vmatpush.bf16.xpose.msrb.mxu0 %v1076_v14 }
 0x251   : > { %v1069_v15 = vpop.permute.xlu1 %1068 }
 0x253   : > { %2474 = vmatmul.msk.bf16.vlgmr.msrb.gmra.mxu0 %vm954_vm1, %v1069_v15 }
 0x254   : > { %1141 = vmatpush.bf16.xpose.msrb.mxu2 %v1132_v13  ;;  %1224 = vmatpush.bf16.msra.mxu0 %v2645_v33 }
 0x258   : > { %1225 = vmatpush.bf16.msra.mxu0 %v2644_v35 }
 0x25b   : > { %2472 = vmatmul.msk.bf16.vlgmr.msra.gmra.mxu2 %vm954_vm1, %v1010_v11 }
 0x26b   : > { %2476 = vmatmul.msk.bf16.vlgmr.msrb.gmra.mxu2 %vm954_vm1, %v1125_v16 }
 0x2ce   : > { %v970_v20 = vpop.f32.mrf.mxu2 }
 0x2cf   : > { %v974_v21 = vsel %vm954_vm1, %v970_v20, -inf }
 0x2d0   : > { %v1087_v22 = vpop.f32.mrf.mxu0  ;;  %975 = vmax.xlane.f32.xlu0 %v974_v21 }
 0x2d1   : > { %v1091_v28 = vsel %vm954_vm1, %v1087_v22, -inf }
 0x2d6   : > { %v972_v23 = vpop.f32.mrf.mxu2 }
 0x2d8   : > { %v1089_v24 = vpop.f32.mrf.mxu0 }
 0x2de   : > { %v1028_v25 = vpop.f32.mrf.mxu2 }
 0x2df   : > { %v1032_v26 = vsel %vm954_vm1, %v1028_v25, -inf }
 0x2e0   : > { %1033 = vmax.xlane.f32.xlu2 %v1032_v26 }
 0x2e6   : > { %v1030_v27 = vpop.f32.mrf.mxu2 }
 0x2e8   : > { %1092 = vmax.xlane.f32.xlu2 %v1091_v28 }
 0x2ee   : > { %v1143_v29 = vpop.f32.mrf.mxu2 }
 0x2ef   : > { %v1147_v30 = vsel %vm954_vm1, %v1143_v29, -inf }
 0x2f0   : > { %1148 = vmax.xlane.f32.xlu1 %v1147_v30  ;;  %v2656_v30 = vld [vmem:[%s3454_s9] sm:$0xff] }
 0x2f6   : > { %v1145_v31 = vpop.f32.mrf.mxu2 }
 0x2f7   : > { %v2648_v31 = vld [vmem:[%s3023_s29] sm:$0xff] }
 0x309   : > { %1047 = vrot.lane.b32.xlu1 %v1046_v37, %s2749_s21 }
 0x343   : > { %v976_v43 = vpop.xlane.xlu0 %975 }
 0x344   : > { %v977_v47 = vsub.f32 %v970_v20, %v976_v43 }
 0x346   : > { %v978_v51 = vmul.f32 1.442695, %v977_v47  ;;  %v2655_v47 = vld [vmem:[%s3023_s29 + $0x38] sm:$0xff] }
 0x353   : > { %v1034_v40 = vpop.xlane.xlu2 %1033 }
 0x354   : > { %v1035_v41 = vsub.f32 %v1028_v25, %v1034_v40 }
 0x356   : > { %v1036_v42 = vmul.f32 1.442695, %v1035_v41 }
 0x358   : > { %2695 = vpow2.f32 %v1036_v42 }
 0x35b   : > { %v1093_v44 = vpop.xlane.xlu2 %1092 }
 0x35c   : > { %v1094_v45 = vsub.f32 %v1087_v22, %v1093_v44  ;;  %v2657_v22 = vld [vmem:[%s3454_s9 + $0x8] sm:$0xff] }
 0x35d   : > { %1403 = vmatpush.bf16.msra.mxu2 %v2657_v22 }
 0x35e   : > { %v2696_v46 = vpop.eup %2695  ;;  %v1095_v48 = vmul.f32 1.442695, %v1094_v45  ;;  %v2653_v45 = vld [vmem:[%s3023_s29 + $0x28] sm:$0xff] }
 0x35f   : > { %v1038_v50 = vsel %vm954_vm1, %v2696_v46, 0.0 }
 0x360   : > { %2697 = vpow2.f32 %v1095_v48  ;;  %1039 = vadd.xlane.f32.xlu2 %v1038_v50 }
 0x361   : > { %2699 = vpow2.f32 %v978_v51  ;;  %1404 = vmatpush.bf16.msra.mxu2 %v2656_v30 }
 0x363   : > { %v1149_v52 = vpop.xlane.xlu1 %1148 }
 0x364   : > { %v1150_v55 = vsub.f32 %v1143_v29, %v1149_v52  ;;  %2536 = vmatmul.msk.bf16.vlgmr.msra.gmra.mxu2 %vm852_vm0, %v2648_v31 }
 0x366   : > { %v2698_v56 = vpop.eup %2697  ;;  %v1151_v57 = vmul.f32 1.442695, %v1150_v55 }
 0x367   : > { %v1097_v58 = vsel %vm954_vm1, %v2698_v56, 0.0  ;;  %v2700_v59 = vpop.eup %2699 }
 0x368   : > { %2701 = vpow2.f32 %v1151_v57  ;;  %1098 = vadd.xlane.f32.xlu0 %v1097_v58  ;;  %v980_v61 = vsel %vm954_vm1, %v2700_v59, 0.0 }
 0x36e   : > { %v2702_v60 = vpop.eup %2701 }
 0x36f   : > { %v1153_v62 = vsel %vm954_vm1, %v2702_v60, 0.0 }
 0x370   : > { %981 = vadd.xlane.f32.xlu0 %v980_v61  ;;  %1154 = vadd.xlane.f32.xlu2 %v1153_v62 }
 0x374   : > { %2537 = vmatmul.msk.bf16.gmra.mxu2 %vm852_vm0, %v2649_v32 }
 0x37b   : > { %v1048_v63 = vpop.permute.xlu1 %1047 }
 0x37c   : > { %v1053_v0 = vsel %vm989_vm2, %v1048_v63, 0 }
 0x37d   : > { %1062 = vmatpush.bf16.msrb.mxu3 %v1053_v0 }
 0x384   : > { %1103 = vrot.lane.b32.xlu0 %v1046_v37, %s2751_s23  ;;  %2538 = vmatmul.msk.bf16.gmra.mxu2 %vm852_vm0, %v2650_v34 }
 0x388   : > { %1159 = vrot.lane.b32.xlu2 %v1046_v37, %s2748_s20 }
 0x394   : > { %2539 = vmatmul.msk.bf16.gmra.mxu2 %vm852_vm0, %v2651_v36 }
 0x3a4   : > { %2540 = vmatmul.msk.bf16.gmra.mxu2 %vm852_vm0, %v2652_v38 }
 0x3b4   : > { %2541 = vmatmul.msk.bf16.gmra.mxu2 %vm852_vm0, %v2653_v45 }
 0x3d3   : > { %v1040_v1 = vpop.xlane.xlu2 %1039 }
 0x3d4   : > { %2703 = vrcp.f32 %v1040_v1 }
 0x3da   : > { %v2704_v2 = vpop.eup %2703 }
 0x3db   : > { %v1042_v3 = vmul.f32 %v2704_v2, %v2696_v46  ;;  %v1099_v4 = vpop.xlane.xlu0 %1098  ;;  %v2654_v46 = vld [vmem:[%s3023_s29 + $0x30] sm:$0xff]  ;;  %s3480_s29 = smov 24  }
 0x3dc   : > { %2542 = vmatmul.msk.bf16.gmra.mxu2 %vm852_vm0, %v2654_v46 }
 0x3dd   : > { %v1043_v5 = vpack.c.bf16 %v1042_v3, %v1042_v3  ;;  %v3081_v3 = vperm.slane %v2951_v49, 5 }
 0x3df   : > { %2473 = vmatmul.msk.bf16.vlgmr.msrb.gmra.mxu3 %vm954_vm1, %v1043_v5 }
 0x3e3   : > { %v982_v6 = vpop.xlane.xlu0 %981  ;;  %v1155_v7 = vpop.xlane.xlu2 %1154 }
 0x3e4   : > { %2705 = vrcp.f32 %v982_v6 }
 0x3e5   : > { %2707 = vrcp.f32 %v1155_v7 }
 0x3e6   : > { %2709 = vrcp.f32 %v1099_v4 }
 0x3e7   : > { %v3054_v48 = vpop.f32.mrf.mxu2 }
 0x3ea   : > { %v2706_v8 = vpop.eup %2705 }
 0x3eb   : > { %v2708_v9 = vpop.eup %2707  ;;  %v984_v10 = vmul.f32 %v2706_v8, %v2700_v59  ;;  %v1160_v11 = vpop.permute.xlu2 %1159  ;;  %v1202_v59 = vperm.slane %v2951_v49, 3 }
 0x3ec   : > { %v1157_v12 = vmul.f32 %v2708_v9, %v2702_v60  ;;  %v1165_v13 = vsel %vm989_vm2, %v1160_v11, 0  ;;  %v2710_v16 = vpop.eup %2709  ;;  %2543 = vmatmul.msk.bf16.gmra.mxu2 %vm852_vm0, %v2655_v47 }
 0x3ed   : > { %1174 = vmatpush.bf16.msra.mxu3 %v1165_v13  ;;  %v985_v14 = vpack.c.bf16 %v984_v10, %v984_v10  ;;  %v1101_v19 = vmul.f32 %v2710_v16, %v2698_v56 }
 0x3ee   : > { %v1158_v15 = vpack.c.bf16 %v1157_v12, %v1157_v12 }
 0x3ef   : > { %2471 = vmatmul.msk.bf16.vlgmr.msrb.gmra.mxu1 %vm954_vm1, %v985_v14  ;;  %v1102_v20 = vpack.c.bf16 %v1101_v19, %v1101_v19  ;;  %v3056_v50 = vpop.f32.mrf.mxu2 }
 0x3f0   : > { %2477 = vmatmul.msk.bf16.vlgmr.msra.gmra.mxu3 %vm954_vm1, %v1158_v15 }
 0x3f6   : > { %v1104_v17 = vpop.permute.xlu0 %1103 }
 0x3f7   : > { %v1109_v18 = vsel %vm989_vm2, %v1104_v17, 0  ;;  %v3058_v51 = vpop.f32.mrf.mxu2 }
 0x3f8   : > { %1118 = vmatpush.bf16.msra.mxu1 %v1109_v18  ;;  %v1449_v16 = vadd.f32 %v3081_v3, %v3058_v51 }
 0x3ff   : > { %2475 = vmatmul.msk.bf16.vlgmr.msra.gmra.mxu1 %vm954_vm1, %v1102_v20  ;;  %v3060_v52 = vpop.f32.mrf.mxu2  ;;  %v1465_v20 = vpack.c.bf16 %v1449_v16, %v1449_v16 }
 0x400   : > { %v1450_v17 = vadd.f32 %v3081_v3, %v3060_v52 }
 0x407   : > { %v3062_v55 = vpop.f32.mrf.mxu2 }
 0x408   : > { %v1451_v8 = vadd.f32 %v3081_v3, %v3062_v55 }
 0x40a   : > { %v1467_v12 = vpack.c.bf16 %v1451_v8, %v1451_v8 }
 0x40c   : > { %v1536_v18 = vunpack.c.l.b16 %v1467_v12 }
 0x40f   : > { %v3064_v56 = vpop.f32.mrf.mxu2 }
 0x410   : > { %v1452_v9 = vadd.f32 %v3081_v3, %v3064_v56 }
 0x412   : > { %v1468_v13 = vpack.c.bf16 %v1452_v9, %v1452_v9 }
 0x414   : > { %v1537_v19 = vunpack.c.l.b16 %v1468_v13 }
 0x416   : > { %v3103_v22 = vpack.c.b16 %v1537_v19, %v1536_v18 }
 0x417   : > { %v3066_v57 = vpop.f32.mrf.mxu2 }
 0x418   : > { %v1453_v9 = vadd.f32 %v3081_v3, %v3066_v57 }
 0x41a   : > { %v1469_v12 = vpack.c.bf16 %v1453_v9, %v1453_v9 }
 0x41c   : > { %v1538_v18 = vunpack.c.l.b16 %v1469_v12 }
 0x41f   : > { %v3068_v58 = vpop.f32.mrf.mxu2 }
 0x427   : > { %v3074_v63 = vpop.f32.mrf.mxu2 }
 0x428   : > { %v1455_v4 = vadd.f32 %v3081_v3, %v3074_v63 }
 0x42f   : > { %v3078_v2 = vpop.f32.mrf.mxu2 }
 0x430   : > { %v1456_v5 = vadd.f32 %v3081_v3, %v3078_v2 }
 0x432   : > { %v1472_v6 = vpack.c.bf16 %v1456_v5, %v1456_v5 }
 0x434   : > { %v1541_v11 = vunpack.c.l.b16 %v1472_v6 }
 0x437   : > { %v3087_v7 = vpop.f32.mrf.mxu2 }
 0x43f   : > { %v3095_v15 = vpop.f32.mrf.mxu2 }
 0x462   : > { %v1064_v21 = vpop.f32.mrf.mxu3 }
 0x463   : > { %1181 = vrot.lane.b32.xlu1 %v1064_v21, %s3466_s28  ;;  %v1466_v21 = vpack.c.bf16 %v1450_v17, %v1450_v17 }
 0x46a   : > { %v1066_v23 = vpop.f32.mrf.mxu3 }
 0x46b   : > { %v3105_v23 = vpop.f32.mrf.mxu2 }
 0x46c   : > { %v1002_v24 = vpop.f32.mrf.mxu1 }
 0x473   : > { %v1176_v25 = vpop.f32.mrf.mxu3  ;;  %v3115_v31 = vpop.f32.mrf.mxu2 }
 0x474   : > { %1189 = vrot.lane.b32.xlu0 %v1176_v25, %s3471_s18  ;;  %v1004_v26 = vpop.f32.mrf.mxu1  ;;  %v1448_v25 = vadd.f32 %v3081_v3, %v3056_v50 }
 0x475   : > { %v1534_v26 = vunpack.c.l.b16 %v1465_v20 }
 0x47b   : > { %v1178_v27 = vpop.f32.mrf.mxu3  ;;  %v3121_v35 = vpop.f32.mrf.mxu2 }
 0x47c   : > { %v1120_v28 = vpop.f32.mrf.mxu1  ;;  %v1535_v27 = vunpack.c.l.b16 %v1466_v21  ;;  %v1461_v36 = vadd.f32 %v3081_v3, %v3121_v35 }
 0x47d   : > { %1185 = vrot.lane.b32.xlu1 %v1120_v28, %s2754_s27 }
 0x47e   : > { %v3113_v30 = vpack.c.b16 %v1535_v27, %v1534_v26 }
 0x483   : > { %v3127_v38 = vpop.f32.mrf.mxu2 }
 0x484   : > { %v1122_v29 = vpop.f32.mrf.mxu1 }
 0x485   : > { %v1464_v29 = vpack.c.bf16 %v1448_v25, %v1448_v25 }
 0x487   : > { %v1533_v33 = vunpack.c.l.b16 %v1464_v29 }
 0x4d5   : > { %v1182_v37 = vpop.permute.xlu1 %1181 }
 0x4d6   : > { %v1192_v39 = vsel %vm954_vm1, %v1002_v24, %v1182_v37  ;;  %v1447_v24 = vadd.f32 %v3081_v3, %v3054_v48  ;;  %v1477_v37 = vpack.c.bf16 %v1461_v36, %v1461_v36 }
 0x4d8   : > { %v1463_v28 = vpack.c.bf16 %v1447_v24, %v1447_v24 }
 0x4da   : > { %v1532_v32 = vunpack.c.l.b16 %v1463_v28 }
 0x4dc   : > { %v3119_v34 = vpack.c.b16 %v1533_v33, %v1532_v32 }
 0x4e6   : > { %v1190_v41 = vpop.permute.xlu0 %1189 }
 0x4ef   : > { %v1186_v40 = vpop.permute.xlu1 %1185 }
 0x4f0   : > { %v1194_v42 = vsel %vm1193_vm3, %v1192_v39, %v1186_v40  ;;  %v1459_v39 = vadd.f32 %v3081_v3, %v3105_v23  ;;  %v1460_v40 = vadd.f32 %v3081_v3, %v3115_v31 }
 0x4f1   : > { %v1196_v43 = vsel %vm1195_vm4, %v1194_v42, %v1190_v41  ;;  %v1462_v41 = vadd.f32 %v3081_v3, %v3127_v38  ;;  %v1546_v42 = vunpack.c.l.b16 %v1477_v37 }
 0x4f2   : > { %v1201_v44 = vpack.c.bf16 %v1196_v43, %v1196_v43  ;;  %v1476_v45 = vpack.c.bf16 %v1460_v40, %v1460_v40 }
 0x4f3   : > { %v1478_v43 = vpack.c.bf16 %v1462_v41, %v1462_v41  ;;  %v1563_v41 = vsel %vm954_vm1, %v3113_v30, 0 }
 0x4f4   : > { %2486 = vmatmul.msk.bf16.vlgmr.msra.gmra.mxu0 %vm852_vm0, %v1201_v44  ;;  %v1475_v44 = vpack.c.bf16 %v1459_v39, %v1459_v39 }
 0x4f5   : > { %v1547_v46 = vunpack.c.l.b16 %v1478_v43  ;;  %v2647_v43 = vld [vmem:[%s3453_s8 + $0x8] sm:$0xff] }
 0x4f6   : > { %1293 = vmatpush.bf16.msrb.mxu1 %v2647_v43 }
 0x4f7   : > { %v1555_v47 = vpack.c.b16 %v1547_v46, %v1546_v42  ;;  %v1560_v42 = vsel %vm954_vm1, %v3119_v34, 0 }
 0x4f9   : > { %1702 = vrot.lane.b32.xlu0 %v1555_v47, %s2749_s21  ;;  %v1581_v16 = vsel %vm954_vm1, %v1555_v47, 0 }
 0x4fa   : > { %1583 = vmatpush.bf16.xpose.msrb.mxu3 %v1581_v16 }
 0x571   : > { %v1227_v60 = vpop.f32.mrf.mxu0 }
 0x572   : > { %v1228_v61 = vadd.f32 %v1227_v60, %v1202_v59  ;;  %v1544_v59 = vunpack.c.l.b16 %v1475_v44  ;;  %v1545_v60 = vunpack.c.l.b16 %v1476_v45  ;;  %v1703_v44 = vpop.permute.xlu0 %1702 }
 0x573   : > { %v1729_v45 = vsel %vm954_vm1, %v1703_v44, 0 }
 0x574   : > { %v3072_v62 = vadd.f32 %v1228_v61, %v2961_v53  ;;  %v1471_v53 = vpack.c.bf16 %v1455_v4, %v1455_v4  ;;  %v1554_v61 = vpack.c.b16 %v1545_v60, %v1544_v59  ;;  %v1479_v59 = vperm.slane %v2951_v49, 6 }
 0x576   : > { %v1232_v0 = vsel %vm852_vm0, %v3072_v62, 0.0  ;;  %v1540_v10 = vunpack.c.l.b16 %v1471_v53  ;;  %1700 = vrot.lane.b32.xlu0 %v1554_v61, %s2749_s21  ;;  %v1578_v21 = vsel %vm954_vm1, %v1554_v61, 0 }
 0x577   : > { %1233 = vadd.xlane.f32.xlu2 %v1232_v0  ;;  %v1457_v0 = vadd.f32 %v3081_v3, %v3087_v7  ;;  %1584 = vmatpush.bf16.xpose.msrb.mxu3 %v1578_v21 }
 0x578   : > { %v3093_v14 = vpack.c.b16 %v1541_v11, %v1540_v10  ;;  %v1454_v10 = vadd.f32 %v3081_v3, %v3068_v58  ;;  %v2755_v11 = vmov 32.0  }
 0x579   : > { %v1229_v1 = vpop.f32.mrf.mxu0  ;;  %v1473_v4 = vpack.c.bf16 %v1457_v0, %v1457_v0  ;;  %2711 = vrcp.f32 %v2755_v11 }
 0x57a   : > { %v1458_v1 = vadd.f32 %v3081_v3, %v3095_v15  ;;  %v1470_v13 = vpack.c.bf16 %v1454_v10, %v1454_v10  ;;  %v1572_v36 = vsel %vm954_vm1, %v3093_v14, 0 }
 0x57b   : > { %v1542_v53 = vunpack.c.l.b16 %v1473_v4 }
 0x57c   : > { %v1474_v5 = vpack.c.bf16 %v1458_v1, %v1458_v1  ;;  %v1539_v19 = vunpack.c.l.b16 %v1470_v13 }
 0x57e   : > { %v1543_v6 = vunpack.c.l.b16 %v1474_v5  ;;  %1807 = vrot.lane.b32.xlu0 %v1555_v47, %s2751_s23  ;;  %v1551_v24 = vpack.c.b16 %v1539_v19, %v1538_v18 }
 0x57f   : > { %v2712_v17 = vpop.eup %2711 }
 0x580   : > { %v1553_v8 = vpack.c.b16 %v1543_v6, %v1542_v53  ;;  %v1236_v20 = vmul.f32 32.0, %v2712_v17  ;;  %vm1240_vm5 = vweird.f32 %v2712_v17  ;;  %v1569_v40 = vsel %vm954_vm1, %v1551_v24, 0 }
 0x582   : > { %v1237_v3 = vsub.f32 1.0, %v1236_v20  ;;  %v1575_v27 = vsel %vm954_vm1, %v1553_v8, 0 }
 0x583   : > { %1585 = vmatpush.bf16.xpose.msrb.mxu3 %v1575_v27 }
 0x584   : > { %v1238_v25 = vmul.f32 %v2712_v17, %v1237_v3 }
 0x586   : > { %1698 = vrot.lane.b32.xlu0 %v1553_v8, %s2749_s21  ;;  %v1239_v26 = vadd.f32 %v2712_v17, %v1238_v25  ;;  %v3210_v25 = vld [vmem:[%s3459_s14 + $0x8] sm:$0x7f] }
 0x588   : > { %v3153_v28 = vsel %vm1240_vm5, %v2712_v17, %v1239_v26 }
 0x58b   : > { %1586 = vmatpush.bf16.xpose.msrb.mxu3 %v1572_v36 }
 0x58e   : > { %1805 = vrot.lane.b32.xlu0 %v1554_v61, %s2751_s23 }
 0x58f   : > { %1696 = vrot.lane.b32.xlu2 %v3093_v14, %s2749_s21 }
 0x593   : > { %1587 = vmatpush.bf16.xpose.msrb.mxu3 %v1569_v40 }
 0x596   : > { %1694 = vrot.lane.b32.xlu0 %v1551_v24, %s2749_s21 }
 0x597   : > { %1692 = vrot.lane.b32.xlu2 %v3103_v22, %s2749_s21 }
 0x59e   : > { %1912 = vrot.lane.b32.xlu0 %v1555_v47, %s2748_s20 }
 0x59f   : > { %1690 = vrot.lane.b32.xlu2 %v3113_v30, %s2749_s21 }
 0x5a6   : > { %1801 = vrot.lane.b32.xlu0 %v3093_v14, %s2751_s23 }
 0x5a7   : > { %1688 = vrot.lane.b32.xlu2 %v3119_v34, %s2749_s21 }
 0x5ae   : > { %1910 = vrot.lane.b32.xlu0 %v1554_v61, %s2748_s20 }
 0x5b6   : > { %1908 = vrot.lane.b32.xlu0 %v1553_v8, %s2748_s20 }
 0x5be   : > { %1906 = vrot.lane.b32.xlu0 %v3093_v14, %s2748_s20  ;;  %v2646_v14 = vld [vmem:[%s3453_s8] sm:$0xff] }
 0x5bf   : > { %1294 = vmatpush.bf16.msrb.mxu1 %v2646_v14 }
 0x5c3   : > { %1731 = vmatpush.bf16.xpose.msra.mxu1 %v1729_v45 }
 0x5c6   : > { %1904 = vrot.lane.b32.xlu0 %v1551_v24, %s2748_s20 }
 0x5e8   : > { %v1701_v46 = vpop.permute.xlu0 %1700 }
 0x5e9   : > { %v1726_v47 = vsel %vm954_vm1, %v1701_v46, 0 }
 0x5ea   : > { %v1234_v29 = vpop.xlane.xlu2 %1233  ;;  %1732 = vmatpush.bf16.xpose.msra.mxu1 %v1726_v47 }
 0x5eb   : > { %v1242_v32 = vmul.f32 %v3153_v28, %v1234_v29 }
 0x5ed   : > { %v3157_v33 = vsub.f32 %v3072_v62, %v1242_v32  ;;  %v1566_v62 = vsel %vm954_vm1, %v3103_v22, 0  ;;  %v1261_v32 = vperm.slane %v3210_v25, 1 }
 0x5ee   : > { %1588 = vmatpush.bf16.xpose.msrb.mxu3 %v1566_v62 }
 0x5ef   : > { %v1244_v37 = vmul.f32 %v3157_v33, %v3157_v33 }
 0x5f0   : > { %v1808_v60 = vpop.permute.xlu0 %1807 }
 0x5f1   : > { %v1245_v39 = vsel %vm852_vm0, %v1244_v37, 0.0  ;;  %v1834_v61 = vsel %vm954_vm1, %v1808_v60, 0  ;;  %v1263_v37 = vperm.slane %v3210_v25, 2 }
 0x5f2   : > { %1246 = vadd.xlane.f32.xlu1 %v1245_v39  ;;  %v1697_v5 = vpop.permute.xlu2 %1696 }
 0x5f3   : > { %v1720_v53 = vsel %vm954_vm1, %v1697_v5, 0 }
 0x5f6   : > { %1589 = vmatpush.bf16.xpose.msrb.mxu3 %v1563_v41 }
 0x5f8   : > { %v1699_v0 = vpop.permute.xlu0 %1698 }
 0x5f9   : > { %v1723_v1 = vsel %vm954_vm1, %v1699_v0, 0 }
 0x5fa   : > { %1733 = vmatpush.bf16.xpose.msra.mxu1 %v1723_v1  ;;  %v1693_v9 = vpop.permute.xlu2 %1692 }
 0x5fb   : > { %v1714_v10 = vsel %vm954_vm1, %v1693_v9, 0 }
 0x5fe   : > { %1590 = vmatpush.bf16.xpose.msrb.mxu3 %v1560_v42 }
 0x600   : > { %v1806_v4 = vpop.permute.xlu0 %1805 }
 0x602   : > { %1734 = vmatpush.bf16.xpose.msra.mxu1 %v1720_v53  ;;  %v1691_v11 = vpop.permute.xlu2 %1690 }
 0x603   : > { %v1711_v12 = vsel %vm954_vm1, %v1691_v11, 0 }
 0x606   : > { %1836 = vmatpush.bf16.xpose.msra.mxu3 %v1834_v61 }
 0x608   : > { %v1695_v6 = vpop.permute.xlu0 %1694 }
 0x60a   : > { %v1689_v17 = vpop.permute.xlu2 %1688 }
 0x60b   : > { %1803 = vrot.lane.b32.xlu1 %v1553_v8, %s2751_s23  ;;  %v1831_v8 = vsel %vm954_vm1, %v1806_v4, 0  ;;  %v1708_v19 = vsel %vm954_vm1, %v1689_v17, 0 }
 0x60e   : > { %1837 = vmatpush.bf16.xpose.msra.mxu3 %v1831_v8 }
 0x610   : > { %v1913_v27 = vpop.permute.xlu0 %1912 }
 0x611   : > { %v1939_v44 = vsel %vm954_vm1, %v1913_v27, 0 }
 0x613   : > { %1799 = vrot.lane.b32.xlu1 %v1551_v24, %s2751_s23 }
 0x618   : > { %v1802_v43 = vpop.permute.xlu0 %1801 }
 0x619   : > { %v1825_v46 = vsel %vm954_vm1, %v1802_v43, 0 }
 0x61b   : > { %1797 = vrot.lane.b32.xlu1 %v3103_v22, %s2751_s23 }
 0x620   : > { %v1911_v0 = vpop.permute.xlu0 %1910 }
 0x623   : > { %1795 = vrot.lane.b32.xlu1 %v3113_v30, %s2751_s23 }
 0x628   : > { %v1909_v5 = vpop.permute.xlu0 %1908 }
 0x629   : > { %v1933_v53 = vsel %vm954_vm1, %v1909_v5, 0 }
 0x62b   : > { %1793 = vrot.lane.b32.xlu1 %v3119_v34, %s2751_s23 }
 0x630   : > { %v1907_v8 = vpop.permute.xlu0 %1906 }
 0x631   : > { %v1930_v9 = vsel %vm954_vm1, %v1907_v8, 0 }
 0x633   : > { %1900 = vrot.lane.b32.xlu1 %v3113_v30, %s2748_s20  ;;  %v1717_v30 = vsel %vm954_vm1, %v1695_v6, 0 }
 0x634   : > { %1735 = vmatpush.bf16.xpose.msra.mxu1 %v1717_v30 }
 0x63b   : > { %1481 = vrot.lane.b32.xlu1 %v1479_v59, %s2744_s26 }
 0x63c   : > { %1736 = vmatpush.bf16.xpose.msra.mxu1 %v1714_v10 }
 0x644   : > { %1737 = vmatpush.bf16.xpose.msra.mxu1 %v1711_v12 }
 0x64c   : > { %1738 = vmatpush.bf16.xpose.msra.mxu1 %v1708_v19 }
 0x665   : > { %v1247_v13 = vpop.xlane.xlu1 %1246 }
 0x666   : > { %v1248_v16 = vmul.f32 %v1247_v13, %v3153_v28 }
 0x668   : > { %v1249_v18 = vadd.f32 1e-05, %v1248_v16 }
 0x66a   : > { %2713 = vrsqrt.f32 %v1249_v18  ;;  %vm1256_vm7 = vweird.f32 %v1249_v18 }
 0x670   : > { %v2714_v20 = vpop.eup %2713 }
 0x671   : > { %v1251_v21 = vmul.f32 %v2714_v20, %v1249_v18  ;;  %vm1257_vm6 = vweird.f32 %v2714_v20 }
 0x672   : > { %vm1258_vm8 = vmor %vm1256_vm7, %vm1257_vm6 }
 0x673   : > { %v1252_v24 = vmul.f32 %v2714_v20, %v1251_v21 }
 0x675   : > { %v1253_v3 = vmul.f32 0.5, %v1252_v24 }
 0x677   : > { %v1254_v26 = vsub.f32 1.5, %v1253_v3 }
 0x679   : > { %v1255_v29 = vmul.f32 %v2714_v20, %v1254_v26  ;;  %v1905_v26 = vpop.permute.xlu0 %1904 }
 0x67b   : > { %v1259_v36 = vsel %vm1258_vm8, %v2714_v20, %v1255_v29 }
 0x67c   : > { %v1260_v39 = vmul.f32 %v1259_v36, %v3157_v33 }
 0x67d   : > { %v1804_v40 = vpop.permute.xlu1 %1803 }
 0x67e   : > { %v1262_v62 = vmul.f32 %v1261_v32, %v1260_v39  ;;  %v1828_v41 = vsel %vm954_vm1, %v1804_v40, 0 }
 0x67f   : > { %1838 = vmatpush.bf16.xpose.msra.mxu3 %v1828_v41 }
 0x680   : > { %v3216_v42 = vadd.f32 %v1263_v37, %v1262_v62 }
 0x682   : > { %v1265_v14 = vadd.f32 %v3216_v42, %v2963_v54  ;;  %v1936_v54 = vsel %vm954_vm1, %v1911_v0, 0 }
 0x684   : > { %v1270_v45 = vpack.c.bf16 %v1265_v14, %v1265_v14 }
 0x685   : > { %v1800_v47 = vpop.permute.xlu1 %1799 }
 0x686   : > { %2495 = vmatmul.msk.bf16.vlgmr.msrb.gmra.mxu1 %vm852_vm0, %v1270_v45  ;;  %v1822_v33 = vsel %vm954_vm1, %v1800_v47, 0 }
 0x687   : > { %1839 = vmatpush.bf16.xpose.msra.mxu3 %v1825_v46  ;;  %1941 = vmatpush.bf16.xpose.msrb.mxu1 %v1939_v44 }
 0x68d   : > { %v1798_v59 = vpop.permute.xlu1 %1797 }
 0x68e   : > { %v1819_v60 = vsel %vm954_vm1, %v1798_v59, 0 }
 0x68f   : > { %1840 = vmatpush.bf16.xpose.msra.mxu3 %v1822_v33  ;;  %1942 = vmatpush.bf16.xpose.msrb.mxu1 %v1936_v54 }
 0x695   : > { %v1796_v61 = vpop.permute.xlu1 %1795 }
 0x696   : > { %v1816_v1 = vsel %vm954_vm1, %v1796_v61, 0 }
 0x697   : > { %1841 = vmatpush.bf16.xpose.msra.mxu3 %v1819_v60  ;;  %1943 = vmatpush.bf16.xpose.msrb.mxu1 %v1933_v53 }
 0x69d   : > { %v1794_v4 = vpop.permute.xlu1 %1793 }
 0x69e   : > { %v1813_v30 = vsel %vm954_vm1, %v1794_v4, 0 }
 0x69f   : > { %1842 = vmatpush.bf16.xpose.msra.mxu3 %v1816_v1  ;;  %1944 = vmatpush.bf16.xpose.msrb.mxu1 %v1930_v9 }
 0x6a5   : > { %v3228_v6 = vpop.permute.xlu1 %1900 }
 0x6a7   : > { %1843 = vmatpush.bf16.xpose.msra.mxu3 %v1813_v30 }
 0x6ad   : > { %v3232_v10 = vpop.permute.xlu1 %1481 }
 0x6ae   : > { %v1498_v11 = vadd.f32 %v3232_v10, %v3121_v35  ;;  %v1499_v12 = vadd.f32 %v3232_v10, %v3127_v38  ;;  %v1492_v17 = vadd.f32 %v3232_v10, %v3074_v63  ;;  %v1493_v18 = vadd.f32 %v3232_v10, %v3078_v2 }
 0x6af   : > { %v1927_v35 = vsel %vm954_vm1, %v1905_v26, 0  ;;  %v1488_v63 = vadd.f32 %v3232_v10, %v3062_v55  ;;  %v1489_v2 = vadd.f32 %v3232_v10, %v3064_v56  ;;  %v1496_v40 = vadd.f32 %v3232_v10, %v3105_v23 }
 0x6b0   : > { %v1514_v13 = vpack.c.bf16 %v1498_v11, %v1498_v11  ;;  %v1515_v16 = vpack.c.bf16 %v1499_v12, %v1499_v12  ;;  %v1508_v24 = vpack.c.bf16 %v1492_v17, %v1492_v17  ;;  %v1509_v3 = vpack.c.bf16 %v1493_v18, %v1493_v18  ;;  %1945 = vmatpush.bf16.xpose.msrb.mxu1 %v1927_v35 }
 0x6b1   : > { %v1504_v32 = vpack.c.bf16 %v1488_v63, %v1488_v63  ;;  %v1505_v36 = vpack.c.bf16 %v1489_v2, %v1489_v2  ;;  %v1497_v62 = vadd.f32 %v3232_v10, %v3115_v31  ;;  %v1512_v55 = vpack.c.bf16 %v1496_v40, %v1496_v40 }
 0x6b2   : > { %v1636_v19 = vunpack.c.l.b16 %v1514_v13  ;;  %v1637_v20 = vunpack.c.l.b16 %v1515_v16  ;;  %v1630_v38 = vunpack.c.l.b16 %v1508_v24  ;;  %v1631_v27 = vunpack.c.l.b16 %v1509_v3 }
 0x6b3   : > { %v1626_v37 = vunpack.c.l.b16 %v1504_v32  ;;  %v1627_v39 = vunpack.c.l.b16 %v1505_v36  ;;  %v1513_v43 = vpack.c.bf16 %v1497_v62, %v1497_v62  ;;  %v1634_v56 = vunpack.c.l.b16 %v1512_v55 }
 0x6b4   : > { %v3242_v21 = vpack.c.b16 %v1637_v20, %v1636_v19  ;;  %v3251_v29 = vpack.c.b16 %v1631_v27, %v1630_v38  ;;  %v1486_v44 = vadd.f32 %v3232_v10, %v3058_v51  ;;  %v1487_v45 = vadd.f32 %v3232_v10, %v3060_v52 }
 0x6b5   : > { %v3259_v41 = vpack.c.b16 %v1627_v39, %v1626_v37  ;;  %v1635_v14 = vunpack.c.l.b16 %v1513_v43  ;;  %v1494_v59 = vadd.f32 %v3232_v10, %v3087_v7  ;;  %v1495_v60 = vadd.f32 %v3232_v10, %v3095_v15 }
 0x6b6   : > { %1660 = vrot.lane.b32.xlu1 %v3242_v21, %s2747_s0  ;;  %v1502_v23 = vpack.c.bf16 %v1486_v44, %v1486_v44  ;;  %v1503_v47 = vpack.c.bf16 %v1487_v45, %v1487_v45  ;;  %v1484_v1 = vadd.f32 %v3232_v10, %v3054_v48  ;;  %v1485_v4 = vadd.f32 %v3232_v10, %v3056_v50 }
 0x6b7   : > { %v3267_v46 = vpack.c.b16 %v1635_v14, %v1634_v56  ;;  %v1510_v51 = vpack.c.bf16 %v1494_v59, %v1494_v59  ;;  %v1511_v0 = vpack.c.bf16 %v1495_v60, %v1495_v60  ;;  %v1271_v48 = vperm.slane %v2951_v49, 4 }
 0x6b8   : > { %v1624_v31 = vunpack.c.l.b16 %v1502_v23  ;;  %v1625_v33 = vunpack.c.l.b16 %v1503_v47  ;;  %v1500_v7 = vpack.c.bf16 %v1484_v1, %v1484_v1  ;;  %v1501_v53 = vpack.c.bf16 %v1485_v4, %v1485_v4 }
 0x6b9   : > { %v1632_v52 = vunpack.c.l.b16 %v1510_v51  ;;  %v1633_v54 = vunpack.c.l.b16 %v1511_v0  ;;  %v1490_v49 = vadd.f32 %v3232_v10, %v3066_v57  ;;  %v1491_v17 = vadd.f32 %v3232_v10, %v3068_v58 }
 0x6ba   : > { %v3275_v61 = vpack.c.b16 %v1625_v33, %v1624_v31  ;;  %v1622_v15 = vunpack.c.l.b16 %v1500_v7  ;;  %v1623_v30 = vunpack.c.l.b16 %v1501_v53  ;;  %v1921_v35 = vsel %vm954_vm1, %v3228_v6, 0 }
 0x6bb   : > { %v3283_v5 = vpack.c.b16 %v1633_v54, %v1632_v52  ;;  %v1506_v18 = vpack.c.bf16 %v1490_v49, %v1490_v49  ;;  %v1507_v19 = vpack.c.bf16 %v1491_v17, %v1491_v17 }
 0x6bc   : > { %v3287_v8 = vpack.c.b16 %v1623_v30, %v1622_v15 }
 0x6bd   : > { %v1629_v20 = vunpack.c.l.b16 %v1507_v19 }
 0x6be   : > { %1654 = vrot.lane.b32.xlu1 %v3251_v29, %s2747_s0 }
 0x6c6   : > { %1650 = vrot.lane.b32.xlu1 %v3259_v41, %s2747_s0 }
 0x6ce   : > { %1766 = vrot.lane.b32.xlu1 %v3267_v46, %s3476_s19 }
 0x6d6   : > { %1648 = vrot.lane.b32.xlu1 %v3275_v61, %s2747_s0 }
 0x6de   : > { %1764 = vrot.lane.b32.xlu1 %v3283_v5, %s3476_s19 }
 0x6e6   : > { %1646 = vrot.lane.b32.xlu1 %v3287_v8, %s2747_s0 }
 0x6ee   : > { %1873 = vrot.lane.b32.xlu1 %v3242_v21, %s3477_s1 }
 0x6f6   : > { %1863 = vrot.lane.b32.xlu1 %v3259_v41, %s3477_s1 }
 0x6fe   : > { %1859 = vrot.lane.b32.xlu1 %v3287_v8, %s3477_s1 }
 0x703   : > { %v1296_v50 = vpop.f32.mrf.mxu1 }
 0x704   : > { %v1297_v9 = vadd.f32 %v1296_v50, %v1271_v48 }
 0x706   : > { %v1300_v11 = vpack.c.bf16 %v1297_v9, %v1297_v9 }
 0x708   : > { %v1684_v12 = vunpack.c.l.b16 %v1300_v11  ;;  %2544 = vmatmul.msk.bf16.vlgmr.msrb.gmra.mxu3 %vm954_vm1, %v1300_v11 }
 0x70a   : > { %v1685_v13 = vpack.c.b16 %v1684_v12, %v1684_v12 }
 0x70b   : > { %v1298_v16 = vpop.f32.mrf.mxu1 }
 0x70c   : > { %1791 = vrot.lane.b32.xlu0 %v1685_v13, %s2751_s23  ;;  %1686 = vrot.lane.b32.xlu2 %v1685_v13, %s2749_s21 }
 0x714   : > { %1896 = vrot.lane.b32.xlu0 %v1685_v13, %s2748_s20  ;;  %1902 = vrot.lane.b32.xlu2 %v3103_v22, %s2748_s20  ;;  %v1628_v22 = vunpack.c.l.b16 %v1506_v18 }
 0x716   : > { %v3316_v3 = vpack.c.b16 %v1629_v20, %v1628_v22 }
 0x71c   : > { %1656 = vrot.lane.b32.xlu0 %v3283_v5, %s2747_s0  ;;  %1898 = vrot.lane.b32.xlu2 %v3119_v34, %s2748_s20  ;;  %s3479_s20 = smov 8  }
 0x724   : > { %1768 = vrot.lane.b32.xlu0 %v3242_v21, %s3476_s19  ;;  %1658 = vrot.lane.b32.xlu2 %v3267_v46, %s2747_s0 }
 0x728   : > { %v1661_v24 = vpop.permute.xlu1 %1660 }
 0x729   : > { %1670 = vmatpush.bf16.msrb.mxu0 %v1661_v24 }
 0x72c   : > { %1760 = vrot.lane.b32.xlu0 %v3316_v3, %s3476_s19  ;;  %1652 = vrot.lane.b32.xlu2 %v3316_v3, %s2747_s0  ;;  %s3478_s0 = smov 72  }
 0x730   : > { %v1655_v10 = vpop.permute.xlu1 %1654 }
 0x734   : > { %1758 = vrot.lane.b32.xlu0 %v3259_v41, %s3476_s19  ;;  %1762 = vrot.lane.b32.xlu2 %v3251_v29, %s3476_s19 }
 0x738   : > { %v1651_v38 = vpop.permute.xlu1 %1650 }
 0x73c   : > { %1756 = vrot.lane.b32.xlu0 %v3275_v61, %s3476_s19  ;;  %1871 = vrot.lane.b32.xlu2 %v3267_v46, %s3477_s1 }
 0x740   : > { %v1767_v32 = vpop.permute.xlu1 %1766 }
 0x744   : > { %1754 = vrot.lane.b32.xlu0 %v3287_v8, %s3476_s19  ;;  %1869 = vrot.lane.b32.xlu2 %v3283_v5, %s3477_s1  ;;  %s3481_s19 = sshll.u32 %s3483_s25, 3 }
 0x748   : > { %v1649_v39 = vpop.permute.xlu1 %1648 }
 0x74c   : > { %1867 = vrot.lane.b32.xlu2 %v3251_v29, %s3477_s1 }
 0x750   : > { %v1765_v43 = vpop.permute.xlu1 %1764 }
 0x758   : > { %v1647_v14 = vpop.permute.xlu1 %1646 }
 0x760   : > { %v1874_v30 = vpop.permute.xlu1 %1873 }
 0x766   : > { %v1687_v57 = vpop.permute.xlu2 %1686 }
 0x767   : > { %2545 = vmatmul.msk.bf16.vlgmr.msra.gmra.mxu1 %vm954_vm1, %v1687_v57 }
 0x768   : > { %v1864_v11 = vpop.permute.xlu1 %1863 }
 0x76e   : > { %v1903_v58 = vpop.permute.xlu2 %1902 }
 0x76f   : > { %v1924_v34 = vsel %vm954_vm1, %v1903_v58, 0 }
 0x770   : > { %1946 = vmatpush.bf16.xpose.msrb.mxu1 %v1924_v34  ;;  %v1860_v13 = vpop.permute.xlu1 %1859 }
 0x776   : > { %v1899_v26 = vpop.permute.xlu2 %1898 }
 0x777   : > { %v1918_v2 = vsel %vm954_vm1, %v1899_v26, 0 }
 0x778   : > { %1947 = vmatpush.bf16.xpose.msrb.mxu1 %v1921_v35 }
 0x77e   : > { %v1792_v27 = vpop.permute.xlu0 %1791  ;;  %v1659_v63 = vpop.permute.xlu2 %1658 }
 0x77f   : > { %1671 = vmatpush.bf16.msrb.mxu0 %v1659_v63  ;;  %2546 = vmatmul.msk.bf16.vlgmr.msra.gmra.mxu3 %vm954_vm1, %v1792_v27 }
 0x780   : > { %1948 = vmatpush.bf16.xpose.msrb.mxu1 %v1918_v2 }
 0x786   : > { %v1897_v36 = vpop.permute.xlu0 %1896  ;;  %v1653_v62 = vpop.permute.xlu2 %1652 }
 0x787   : > { %2547 = vmatmul.msk.bf16.vlgmr.msrb.gmra.mxu1 %vm954_vm1, %v1897_v36 }
 0x78b   : > { %v1592_v37 = vpop.f32.mrf.mxu3 }
 0x78c   : > { %1596 = vmax.xlane.f32.xlu2 %v1592_v37 }
 0x78e   : > { %v1657_v40 = vpop.permute.xlu0 %1656  ;;  %v1763_v45 = vpop.permute.xlu2 %1762 }
 0x78f   : > { %1672 = vmatpush.bf16.msrb.mxu0 %v1657_v40 }
 0x793   : > { %v1594_v6 = vpop.f32.mrf.mxu3  ;;  %1673 = vmatpush.bf16.msrb.mxu0 %v1655_v10 }
 0x796   : > { %v1769_v55 = vpop.permute.xlu0 %1768  ;;  %v1872_v33 = vpop.permute.xlu2 %1871 }
 0x797   : > { %1674 = vmatpush.bf16.msrb.mxu0 %v1653_v62 }
 0x79b   : > { %1675 = vmatpush.bf16.msrb.mxu0 %v1651_v38 }
 0x79e   : > { %v1761_v56 = vpop.permute.xlu0 %1760 }
 0x79f   : > { %1676 = vmatpush.bf16.msrb.mxu0 %v1649_v39 }
 0x7a3   : > { %1677 = vmatpush.bf16.msrb.mxu0 %v1647_v14 }
 0x7a4   : > { %1978 = vrot.lane.b32.xlu2 %v3242_v21, %s3478_s0 }
 0x7a6   : > { %v1759_v44 = vpop.permute.xlu0 %1758 }
 0x7a7   : > { %1778 = vmatpush.bf16.msra.mxu0 %v1769_v55 }
 0x7ab   : > { %1779 = vmatpush.bf16.msra.mxu0 %v1767_v32 }
 0x7ac   : > { %1976 = vrot.lane.b32.xlu2 %v3267_v46, %s3478_s0  ;;  %v1870_v46 = vpop.permute.xlu2 %1869 }
 0x7ae   : > { %v1757_v23 = vpop.permute.xlu0 %1756 }
 0x7af   : > { %1780 = vmatpush.bf16.msra.mxu0 %v1765_v43 }
 0x7b3   : > { %1781 = vmatpush.bf16.msra.mxu0 %v1763_v45  ;;  %v2659_v45 = vld [vmem:[%s3455_s10 + $0x18] sm:$0xff] }
 0x7b4   : > { %1861 = vrot.lane.b32.xlu2 %v3275_v61, %s3477_s1  ;;  %v1868_v51 = vpop.permute.xlu2 %1867  ;;  %2044 = vmatpush.bf16.msrb.mxu2 %v2659_v45 }
 0x7b6   : > { %v1755_v47 = vpop.permute.xlu0 %1754 }
 0x7b7   : > { %1782 = vmatpush.bf16.msra.mxu0 %v1761_v56 }
 0x7bb   : > { %1783 = vmatpush.bf16.msra.mxu0 %v1759_v44 }
 0x7bc   : > { %1974 = vrot.lane.b32.xlu2 %v3283_v5, %s3478_s0 }
 0x7bf   : > { %1784 = vmatpush.bf16.msra.mxu0 %v1757_v23  ;;  %v2658_v23 = vld [vmem:[%s3455_s10 + $0x10] sm:$0xff] }
 0x7c0   : > { %2045 = vmatpush.bf16.msrb.mxu2 %v2658_v23 }
 0x7c3   : > { %1785 = vmatpush.bf16.msra.mxu0 %v1755_v47 }
 0x7e4   : > { %v1740_v21 = vpop.f32.mrf.mxu1 }
 0x7e5   : > { %1744 = vmax.xlane.f32.xlu0 %v1740_v21 }
 0x7ec   : > { %v1742_v31 = vpop.f32.mrf.mxu1 }
 0x7f9   : > { %1865 = vrot.lane.b32.xlu0 %v3316_v3, %s3477_s1 }
 0x7ff   : > { %v1597_v54 = vpop.xlane.xlu2 %1596 }
 0x800   : > { %v1598_v1 = vsub.f32 %v1592_v37, %v1597_v54 }
 0x802   : > { %v1845_v59 = vpop.f32.mrf.mxu3  ;;  %v1599_v4 = vmul.f32 1.442695, %v1598_v1  ;;  %v2735_v1 = vld [vmem:[%s3459_s14] sm:$0xff] }
 0x803   : > { %1849 = vmax.xlane.f32.xlu1 %v1845_v59 }
 0x804   : > { %v1950_v60 = vpop.f32.mrf.mxu1  ;;  %2715 = vpow2.f32 %v1599_v4  ;;  %v2022_v4 = vperm.slane %v2735_v1, 7 }
 0x805   : > { %1954 = vmax.xlane.f32.xlu2 %v1950_v60 }
 0x807   : > { %v1979_v7 = vpop.permute.xlu2 %1978 }
 0x80a   : > { %v1847_v0 = vpop.f32.mrf.mxu3  ;;  %v2716_v5 = vpop.eup %2715 }
 0x80c   : > { %v1952_v52 = vpop.f32.mrf.mxu1 }
 0x80f   : > { %v1977_v50 = vpop.permute.xlu2 %1976 }
 0x817   : > { %v1862_v12 = vpop.permute.xlu2 %1861 }
 0x81c   : > { %1970 = vrot.lane.b32.xlu1 %v3316_v3, %s3478_s0 }
 0x81d   : > { %1972 = vrot.lane.b32.xlu2 %v3251_v29, %s3478_s0 }
 0x81f   : > { %v1975_v16 = vpop.permute.xlu2 %1974 }
 0x823   : > { %1601 = vadd.xlane.f32.xlu0 %v2716_v5 }
 0x858   : > { %v1745_v53 = vpop.xlane.xlu0 %1744 }
 0x859   : > { %v1746_v15 = vsub.f32 %v1740_v21, %v1745_v53 }
 0x85b   : > { %v1747_v48 = vmul.f32 1.442695, %v1746_v15 }
 0x85d   : > { %2717 = vpow2.f32 %v1747_v48 }
 0x863   : > { %v2718_v9 = vpop.eup %2717 }
 0x864   : > { %1749 = vadd.xlane.f32.xlu1 %v2718_v9 }
 0x86b   : > { %v1866_v3 = vpop.permute.xlu0 %1865 }
 0x876   : > { %v1850_v49 = vpop.xlane.xlu1 %1849 }
 0x877   : > { %v1851_v17 = vsub.f32 %v1845_v59, %v1850_v49 }
 0x878   : > { %v1955_v18 = vpop.xlane.xlu2 %1954 }
 0x879   : > { %v1852_v19 = vmul.f32 1.442695, %v1851_v17  ;;  %v1956_v29 = vsub.f32 %v1950_v60, %v1955_v18  ;;  %v2668_v18 = vld [vmem:[%s3458_s13 + $0x30] sm:$0xff] }
 0x87b   : > { %2719 = vpow2.f32 %v1852_v19  ;;  %v1957_v22 = vmul.f32 1.442695, %v1956_v29  ;;  %v2667_v29 = vld [vmem:[%s3458_s13 + $0x28] sm:$0xff] }
 0x87d   : > { %2721 = vpow2.f32 %v1957_v22  ;;  %1966 = vrot.lane.b32.xlu1 %v3275_v61, %s3478_s0  ;;  %v2666_v22 = vld [vmem:[%s3458_s13 + $0x20] sm:$0xff] }
 0x881   : > { %v2720_v20 = vpop.eup %2719 }
 0x882   : > { %1854 = vadd.xlane.f32.xlu0 %v2720_v20 }
 0x883   : > { %v2722_v24 = vpop.eup %2721 }
 0x884   : > { %1959 = vadd.xlane.f32.xlu2 %v2722_v24 }
 0x885   : > { %1964 = vrot.lane.b32.xlu1 %v3287_v8, %s3478_s0 }
 0x88e   : > { %v1971_v61 = vpop.permute.xlu1 %1970 }
 0x896   : > { %v1602_v57 = vpop.xlane.xlu0 %1601  ;;  %1968 = vrot.lane.b32.xlu0 %v3259_v41, %s3478_s0  ;;  %v1973_v41 = vpop.permute.xlu2 %1972 }
 0x897   : > { %2723 = vrcp.f32 %v1602_v57 }
 0x89d   : > { %v2724_v58 = vpop.eup %2723 }
 0x89e   : > { %v1604_v34 = vmul.f32 %v2724_v58, %v2716_v5 }
 0x8a0   : > { %v1605_v10 = vpack.c.bf16 %v1604_v34, %v1604_v34  ;;  %v2664_v34 = vld [vmem:[%s3458_s13 + $0x10] sm:$0xff] }
 0x8a2   : > { %1678 = vmatmul.bf16.vlgmr.msrb.gmra.mxu0 %v1605_v10 }
 0x8a3   : > { %1883 = vmatpush.bf16.msrb.mxu0 %v1874_v30 }
 0x8a7   : > { %1884 = vmatpush.bf16.msrb.mxu0 %v1872_v33 }
 0x8ab   : > { %1885 = vmatpush.bf16.msrb.mxu0 %v1870_v46 }
 0x8af   : > { %1886 = vmatpush.bf16.msrb.mxu0 %v1868_v51 }
 0x8b3   : > { %1887 = vmatpush.bf16.msrb.mxu0 %v1866_v3  ;;  %v2665_v3 = vld [vmem:[%s3458_s13 + $0x18] sm:$0xff] }
 0x8b7   : > { %1888 = vmatpush.bf16.msrb.mxu0 %v1864_v11 }
 0x8bb   : > { %1889 = vmatpush.bf16.msrb.mxu0 %v1862_v12 }
 0x8bf   : > { %1890 = vmatpush.bf16.msrb.mxu0 %v1860_v13  ;;  %v2661_v13 = vld [vmem:[%s3456_s11 + $0x8] sm:$0xff] }
 0x8c0   : > { %2108 = vmatpush.bf16.msrb.mxu3 %v2661_v13 }
 0x8d7   : > { %v1750_v8 = vpop.xlane.xlu1 %1749 }
 0x8d8   : > { %2725 = vrcp.f32 %v1750_v8  ;;  %v2074_v8 = vperm.slane %v3210_v25, 3 }
 0x8de   : > { %v2726_v26 = vpop.eup %2725 }
 0x8df   : > { %v1752_v35 = vmul.f32 %v2726_v26, %v2718_v9 }
 0x8e1   : > { %v1753_v38 = vpack.c.bf16 %v1752_v35, %v1752_v35  ;;  %v2076_v35 = vperm.slane %v3210_v25, 4 }
 0x8e3   : > { %1786 = vmatmul.bf16.vlgmr.msra.gmra.mxu0 %v1753_v38 }
 0x8e4   : > { %1988 = vmatpush.bf16.msra.mxu0 %v1979_v7 }
 0x8e8   : > { %1989 = vmatpush.bf16.msra.mxu0 %v1977_v50 }
 0x8ec   : > { %1990 = vmatpush.bf16.msra.mxu0 %v1975_v16  ;;  %v2669_v16 = vld [vmem:[%s3458_s13 + $0x38] sm:$0xff] }
 0x8ef   : > { %v1967_v37 = vpop.permute.xlu1 %1966 }
 0x8f0   : > { %1991 = vmatpush.bf16.msra.mxu0 %v1973_v41 }
 0x8f4   : > { %1992 = vmatpush.bf16.msra.mxu0 %v1971_v61 }
 0x8f5   : > { %v1855_v27 = vpop.xlane.xlu0 %1854 }
 0x8f6   : > { %2727 = vrcp.f32 %v1855_v27 }
 0x8f7   : > { %v1960_v36 = vpop.xlane.xlu2 %1959  ;;  %v1965_v62 = vpop.permute.xlu1 %1964 }
 0x8f8   : > { %2729 = vrcp.f32 %v1960_v36  ;;  %v2693_v36 = vld [vmem:[%s3457_s12] ss:$0 sm:$0xff] }
 0x8fc   : > { %v2728_v63 = vpop.eup %2727 }
 0x8fd   : > { %v1857_v2 = vmul.f32 %v2728_v63, %v2720_v20 }
 0x8fe   : > { %v2730_v40 = vpop.eup %2729 }
 0x8ff   : > { %v1858_v32 = vpack.c.bf16 %v1857_v2, %v1857_v2  ;;  %v1962_v6 = vmul.f32 %v2730_v40, %v2722_v24  ;;  %v2663_v2 = vld [vmem:[%s3458_s13 + $0x8] sm:$0xff] }
 0x901   : > { %1891 = vmatmul.bf16.vlgmr.msrb.gmra.mxu0 %v1858_v32  ;;  %v1963_v55 = vpack.c.bf16 %v1962_v6, %v1962_v6  ;;  %v2662_v32 = vld [vmem:[%s3458_s13] sm:$0xff] }
 0x908   : > { %v1969_v39 = vpop.permute.xlu0 %1968 }
 0x909   : > { %1993 = vmatpush.bf16.msra.mxu0 %v1969_v39 }
 0x90d   : > { %1994 = vmatpush.bf16.msra.mxu0 %v1967_v37 }
 0x911   : > { %1995 = vmatpush.bf16.msra.mxu0 %v1965_v62 }
 0x914   : > { %1996 = vmatmul.bf16.vlgmr.msra.gmra.mxu0 %v1963_v55  ;;  %v2133_v55 = vperm.slane %v3210_v25, 0 }
 0x915   : > { %2182 = vmatpush.bf16.msrb.mxu0 %v2669_v16 }
 0x919   : > { %2183 = vmatpush.bf16.msrb.mxu0 %v2668_v18 }
 0x91d   : > { %2184 = vmatpush.bf16.msrb.mxu0 %v2667_v29 }
 0x91f   : > { %v1679_v43 = vpop.f32.mrf.mxu0 }
 0x921   : > { %2185 = vmatpush.bf16.msrb.mxu0 %v2666_v22 }
 0x925   : > { %2186 = vmatpush.bf16.msrb.mxu0 %v2665_v3 }
 0x927   : > { %v1681_v56 = vpop.f32.mrf.mxu0 }
 0x929   : > { %2187 = vmatpush.bf16.msrb.mxu0 %v2664_v34 }
 0x92d   : > { %2188 = vmatpush.bf16.msrb.mxu0 %v2663_v2 }
 0x931   : > { %2189 = vmatpush.bf16.msrb.mxu0 %v2662_v32 }
 0x960   : > { %v1787_v14 = vpop.f32.mrf.mxu0 }
 0x961   : > { %2002 = vrot.lane.b32.xlu1 %v1787_v14, %s3479_s20  ;;  %s583_s20 = scalar_lea.vmem %s3462_s17, %s3481_s19 }
 0x968   : > { %v1789_v44 = vpop.f32.mrf.mxu0 }
 0x97e   : > { %v1892_v47 = vpop.f32.mrf.mxu0 }
 0x97f   : > { %2006 = vrot.lane.b32.xlu0 %v1892_v47, %s2754_s27 }
 0x986   : > { %v1894_v21 = vpop.f32.mrf.mxu0 }
 0x991   : > { %v1997_v31 = vpop.f32.mrf.mxu0 }
 0x992   : > { %2010 = vrot.lane.b32.xlu1 %v1997_v31, %s3480_s29 }
 0x999   : > { %v1999_v33 = vpop.f32.mrf.mxu0 }
 0x9d3   : > { %v2003_v46 = vpop.permute.xlu1 %2002 }
 0x9d4   : > { %v2013_v60 = vsel %vm954_vm1, %v1679_v43, %v2003_v46  ;;  %v2671_v46 = vld [vmem:[%s3460_s15 + $0x8] sm:$0xff] }
 0x9d5   : > { %2252 = vmatpush.bf16.msra.mxu1 %v2671_v46 }
 0x9f1   : > { %v2007_v59 = vpop.permute.xlu0 %2006 }
 0x9f2   : > { %v2014_v51 = vsel %vm1193_vm3, %v2013_v60, %v2007_v59  ;;  %v2670_v59 = vld [vmem:[%s3460_s15] sm:$0xff] }
 0x9f3   : > { %2253 = vmatpush.bf16.msra.mxu1 %v2670_v59 }
 0xa04   : > { %v2011_v0 = vpop.permute.xlu1 %2010 }
 0xa05   : > { %v2015_v52 = vsel %vm1195_vm4, %v2014_v51, %v2011_v0 }
 0xa06   : > { %v2021_v54 = vpack.c.bf16 %v2015_v52, %v2015_v52 }
 0xa08   : > { %2560 = vmatmul.msk.bf16.vlgmr.msrb.gmra.mxu2 %vm852_vm0, %v2021_v54 }
 0xa8b   : > { %v2047_v5 = vpop.f32.mrf.mxu2 }
 0xa8c   : > { %v2048_v7 = vadd.f32 %v2047_v5, %v2022_v4 }
 0xa8e   : > { %v2051_v53 = vadd.f32 %v2048_v7, %v3216_v42  ;;  %v2660_v42 = vld [vmem:[%s3456_s11] sm:$0xff] }
 0xa8f   : > { %2109 = vmatpush.bf16.msrb.mxu3 %v2660_v42 }
 0xa90   : > { %v2052_v15 = vsel %vm852_vm0, %v2051_v53, 0.0 }
 0xa91   : > { %2053 = vadd.xlane.f32.xlu0 %v2052_v15 }
 0xa93   : > { %v2049_v30 = vpop.f32.mrf.mxu2 }
 0xb04   : > { %v2054_v48 = vpop.xlane.xlu0 %2053 }
 0xb05   : > { %v2055_v50 = vmul.f32 %v2054_v48, %v3153_v28  ;;  %v2220_v48 = vperm.slane %v3210_v25, 6 }
 0xb07   : > { %v2056_v9 = vsub.f32 %v2051_v53, %v2055_v50  ;;  %v2218_v53 = vperm.slane %v3210_v25, 5 }
 0xb09   : > { %v2057_v11 = vmul.f32 %v2056_v9, %v2056_v9 }
 0xb0b   : > { %v2058_v12 = vsel %vm852_vm0, %v2057_v11, 0.0  ;;  %v2694_v11 = vld [vmem:[%s3461_s16] ss:$0 sm:$0xff] }
 0xb0c   : > { %2059 = vadd.xlane.f32.xlu1 %v2058_v12 }
 0xb7f   : > { %v2060_v49 = vpop.xlane.xlu1 %2059 }
 0xb80   : > { %v2061_v17 = vmul.f32 %v2060_v49, %v3153_v28 }
 0xb82   : > { %v2062_v19 = vadd.f32 1e-05, %v2061_v17 }
 0xb84   : > { %2731 = vrsqrt.f32 %v2062_v19  ;;  %vm2069_vm10 = vweird.f32 %v2062_v19 }
 0xb8a   : > { %v2732_v20 = vpop.eup %2731 }
 0xb8b   : > { %v2064_v24 = vmul.f32 %v2732_v20, %v2062_v19  ;;  %vm2070_vm9 = vweird.f32 %v2732_v20 }
 0xb8c   : > { %vm2071_vm11 = vmor %vm2069_vm10, %vm2070_vm9 }
 0xb8d   : > { %v2065_v57 = vmul.f32 %v2732_v20, %v2064_v24 }
 0xb8f   : > { %v2066_v58 = vmul.f32 0.5, %v2065_v57 }
 0xb91   : > { %v2067_v10 = vsub.f32 1.5, %v2066_v58 }
 0xb93   : > { %v2068_v61 = vmul.f32 %v2732_v20, %v2067_v10 }
 0xb95   : > { %v2072_v26 = vsel %vm2071_vm11, %v2732_v20, %v2068_v61 }
 0xb96   : > { %v2073_v38 = vmul.f32 %v2072_v26, %v2056_v9 }
 0xb98   : > { %v2075_v41 = vmul.f32 %v2074_v8, %v2073_v38 }
 0xb9a   : > { %v2077_v27 = vadd.f32 %v2076_v35, %v2075_v41 }
 0xb9c   : > { %v2082_v63 = vpack.c.bf16 %v2077_v27, %v2077_v27 }
 0xb9e   : > { %2569 = vmatmul.msk.bf16.vlgmr.msrb.gmra.mxu3 %vm852_vm0, %v2082_v63 }
 0xc21   : > { %v2111_v37 = vpop.f32.mrf.mxu3 }
 0xc22   : > { %v2112_v39 = vadd.f32 %v2693_v36, %v2111_v37 }
 0xc24   : > { %v2115_v40 = vmax.f32 %v2112_v39, 0.0 }
 0xc26   : > { %v2132_v6 = vpack.c.bf16 %v2115_v40, %v2115_v40 }
 0xc28   : > { %2190 = vmatmul.bf16.vlgmr.msrb.gmra.mxu0 %v2132_v6 }
 0xc29   : > { %v2113_v62 = vpop.f32.mrf.mxu3 }
 0xca5   : > { %v2191_v43 = vpop.f32.mrf.mxu0 }
 0xca6   : > { %v2192_v56 = vadd.f32 %v2191_v43, %v2133_v55 }
 0xca8   : > { %v2195_v14 = vadd.f32 %v2192_v56, %v2077_v27 }
 0xcaa   : > { %v2196_v44 = vsel %vm852_vm0, %v2195_v14, 0.0 }
 0xcab   : > { %2197 = vadd.xlane.f32.xlu2 %v2196_v44 }
 0xcad   : > { %v2193_v45 = vpop.f32.mrf.mxu0 }
 0xd1e   : > { %v2198_v23 = vpop.xlane.xlu2 %2197 }
 0xd1f   : > { %v2199_v47 = vmul.f32 %v2198_v23, %v3153_v28 }
 0xd21   : > { %v2200_v21 = vsub.f32 %v2195_v14, %v2199_v47 }
 0xd23   : > { %v2201_v31 = vmul.f32 %v2200_v21, %v2200_v21 }
 0xd25   : > { %v2202_v33 = vsel %vm852_vm0, %v2201_v31, 0.0 }
 0xd26   : > { %2203 = vadd.xlane.f32.xlu2 %v2202_v33 }
 0xd99   : > { %v2204_v60 = vpop.xlane.xlu2 %2203 }
 0xd9a   : > { %v2205_v51 = vmul.f32 %v2204_v60, %v3153_v28 }
 0xd9c   : > { %v2206_v0 = vadd.f32 1e-05, %v2205_v51 }
 0xd9e   : > { %2733 = vrsqrt.f32 %v2206_v0  ;;  %vm2213_vm13 = vweird.f32 %v2206_v0 }
 0xda4   : > { %v2734_v52 = vpop.eup %2733 }
 0xda5   : > { %v2208_v54 = vmul.f32 %v2734_v52, %v2206_v0  ;;  %vm2214_vm12 = vweird.f32 %v2734_v52 }
 0xda6   : > { %vm2215_vm14 = vmor %vm2213_vm13, %vm2214_vm12 }
 0xda7   : > { %v2209_v1 = vmul.f32 %v2734_v52, %v2208_v54 }
 0xda9   : > { %v2210_v4 = vmul.f32 0.5, %v2209_v1 }
 0xdab   : > { %v2211_v5 = vsub.f32 1.5, %v2210_v4 }
 0xdad   : > { %v2212_v7 = vmul.f32 %v2734_v52, %v2211_v5 }
 0xdaf   : > { %v2216_v15 = vsel %vm2215_vm14, %v2734_v52, %v2212_v7 }
 0xdb0   : > { %v2217_v30 = vmul.f32 %v2216_v15, %v2200_v21 }
 0xdb2   : > { %v2219_v50 = vmul.f32 %v2218_v53, %v2217_v30 }
 0xdb4   : > { %v2221_v28 = vadd.f32 %v2220_v48, %v2219_v50 }
 0xdb6   : > { %v2226_v9 = vpack.c.bf16 %v2221_v28, %v2221_v28 }
 0xdb8   : > { %2610 = vmatmul.msk.bf16.vlgmr.msra.gmra.mxu1 %vm852_vm0, %v2226_v9 }
 0xe35   : > { %v2255_v12 = vpop.f32.mrf.mxu1 }
 0xe36   : > { %v2256_v13 = vadd.f32 %v2694_v11, %v2255_v12 }
 0xe38   : > { %2259 = vst [vmem:[%s583_s20] sm:$0xff] %v2256_v13 }
 0xe3d   : > { %v2257_v42 = vpop.f32.mrf.mxu1 }
 0xe3e PF: > { %s27_s24 = sadd.s32 1, %s2742_s24  }
 0xe3f   : > { %p24_p4 = scmp.ge.s32.totalorder %s27_s24, 4  }
 0xe41   :  { %26 = sbr.rel (!%p24_p4) target bundleno = 3 (0x3), region = 125 }

</bundles_post_ra>
